<compile_context>
chip_gen: v7x
topology: tpu7x:2x2x1
jax: 0.10.0
libtpu: 0.0.40
codegen_flags: <defaults>
</compile_context>

<pallas_src>
import jax
import jax.numpy as jnp
from jax.experimental import pallas as pl
from jax.experimental.pallas import tpu as pltpu

# logical (PyTorch) sizes
D_IN, D_H, D_Z = 900, 400, 120
# lane-padded sizes used inside the kernel
D_IN_P, D_H_P, D_Z_P = 1024, 512, 128


def _round_up(x, m):
    return (x + m - 1) // m * m


def _vae_kernel(x_ref, eps_ref,
                w1_ref, b1_ref,
                wcat_ref, bcat_ref,
                w3_ref, b3_ref,
                w4_ref, b4_ref,
                recon_ref, ml_ref):
    bf16 = jnp.bfloat16
    x = x_ref[...]  # already bf16

    # encode: fc1 + ReLU (f32 accumulate, f32 elementwise)
    h1 = jnp.maximum(
        jnp.dot(x, w1_ref[...], preferred_element_type=jnp.float32) + b1_ref[...],
        0.0)

    # fused mu|logvar projection: one (tb,512)x(512,256) matmul
    ml = (jnp.dot(h1.astype(bf16), wcat_ref[...],
                  preferred_element_type=jnp.float32) + bcat_ref[...])
    mu = ml[:, :D_Z_P]
    logvar = ml[:, D_Z_P:]

    # reparameterize (eps supplied from host, zero in padded lanes)
    std = jnp.exp(0.5 * logvar)
    z = mu + eps_ref[...] * std

    # decode
    h3 = jnp.maximum(
        jnp.dot(z.astype(bf16), w3_ref[...],
                preferred_element_type=jnp.float32) + b3_ref[...],
        0.0)
    logits = (jnp.dot(h3.astype(bf16), w4_ref[...],
                      preferred_element_type=jnp.float32) + b4_ref[...])

    recon_ref[...] = jax.nn.sigmoid(logits).astype(recon_ref.dtype)
    ml_ref[...] = ml


def pack_params(params):
    """Zero-pad to lane-aligned shapes, fuse fc21|fc22, weights in bf16."""
    (w1, b1, w21, b21, w22, b22, w3, b3, w4, b4) = params
    f32, bf16 = jnp.float32, jnp.bfloat16

    w1p = jnp.zeros((D_IN_P, D_H_P), f32).at[:D_IN, :D_H].set(w1).astype(bf16)
    b1p = jnp.zeros((1, D_H_P), f32).at[:, :D_H].set(b1)

    wcat = (jnp.zeros((D_H_P, 2 * D_Z_P), f32)
            .at[:D_H, :D_Z].set(w21)
            .at[:D_H, D_Z_P:D_Z_P + D_Z].set(w22)).astype(bf16)
    bcat = (jnp.zeros((1, 2 * D_Z_P), f32)
            .at[:, :D_Z].set(b21)
            .at[:, D_Z_P:D_Z_P + D_Z].set(b22))

    w3p = jnp.zeros((D_Z_P, D_H_P), f32).at[:D_Z, :D_H].set(w3).astype(bf16)
    b3p = jnp.zeros((1, D_H_P), f32).at[:, :D_H].set(b3)

    w4p = jnp.zeros((D_H_P, D_IN_P), f32).at[:D_H, :D_IN].set(w4).astype(bf16)
    b4p = jnp.zeros((1, D_IN_P), f32).at[:, :D_IN].set(b4)

    return (w1p, b1p, wcat, bcat, w3p, b3p, w4p, b4p)


def _choose_tb(b_pad, tile_b):
    """Pick a batch tile: >=2 grid steps when possible (v7x megacore) and
    <=~12.5% over-padding, second-to-last dim kept a multiple of 8."""
    tb = min(tile_b, b_pad)
    if b_pad >= 16 and _round_up(b_pad, tb) // tb < 2:
        tb = _round_up(pl.cdiv(b_pad, 2), 8)
    while tb > 8 and (_round_up(b_pad, tb) - b_pad) * 8 > b_pad:
        tb = _round_up(tb // 2, 8)
    return tb


def vae_forward(x_img, eps, params, *, tile_b=512):
    """x_img: (B, 1, 30, 30) float32; eps: (B, 120) float32."""
    B = x_img.shape[0]
    x = x_img.reshape(B, -1)  # x.view(-1, 900)
    assert x.shape[1] == D_IN

    # pad batch to a multiple of the (adaptively chosen) tile
    b_pad = _round_up(max(B, 1), 8)
    tb = _choose_tb(b_pad, tile_b)
    b_pad = _round_up(b_pad, tb)
    grid = (b_pad // tb,)

    # x streamed bf16 (matches bf16 MXU operands); eps kept f32 (elementwise)
    x_p = jnp.zeros((b_pad, D_IN_P), jnp.bfloat16).at[:B, :D_IN].set(
        x.astype(jnp.bfloat16))
    eps_p = jnp.zeros((b_pad, D_Z_P), jnp.float32).at[:B, :D_Z].set(eps)

    packed = pack_params(params)

    def tile_spec(feat):
        return pl.BlockSpec((tb, feat), lambda i: (i, 0))

    def resident_spec(a):
        # full array, same block index every grid step -> DMA'd once,
        # stays resident in VMEM across the whole batch loop
        return pl.BlockSpec(a.shape, lambda i: (0, 0))

    in_specs = ([tile_spec(D_IN_P), tile_spec(D_Z_P)]
                + [resident_spec(p) for p in packed])

    out_shapes = (
        jax.ShapeDtypeStruct((b_pad, D_IN_P), jnp.bfloat16),    # recon (padded)
        jax.ShapeDtypeStruct((b_pad, 2 * D_Z_P), jnp.float32),  # mu|logvar fused
    )
    out_specs = (tile_spec(D_IN_P), tile_spec(2 * D_Z_P))

    recon_p, ml_p = pl.pallas_call(
        _vae_kernel,
        grid=grid,
        out_shape=out_shapes,
        in_specs=in_specs,
        out_specs=out_specs,
        compiler_params=pltpu.CompilerParams(
            dimension_semantics=("parallel",),
            vmem_limit_bytes=32 * 1024 * 1024),
    )(x_p, eps_p, *packed)

    # slice back to the logical shapes
    recon = recon_p[:B, :D_IN].astype(jnp.float32)
    mu = ml_p[:B, :D_Z]
    logvar = ml_p[:B, D_Z_P:D_Z_P + D_Z]
    return recon, mu, logvar


def init_params(key):
    """Deterministic init matching nn.Linear shapes (stored as (in, out))."""
    def linear(k, fan_in, fan_out):
        kw, kb = jax.random.split(k)
        bound = 1.0 / jnp.sqrt(float(fan_in))
        w = jax.random.uniform(kw, (fan_in, fan_out), jnp.float32, -bound, bound)
        b = jax.random.uniform(kb, (1, fan_out), jnp.float32, -bound, bound)
        return w, b

    k1, k21, k22, k3, k4 = jax.random.split(key, 5)
    w1, b1 = linear(k1, D_IN, D_H)
    w21, b21 = linear(k21, D_H, D_Z)
    w22, b22 = linear(k22, D_H, D_Z)
    w3, b3 = linear(k3, D_Z, D_H)
    w4, b4 = linear(k4, D_H, D_IN)
    return (w1, b1, w21, b21, w22, b22, w3, b3, w4, b4)


def _reference(x_img, eps, params):
    """Plain-JAX reference mirroring the kernel's bf16-operand / f32-accumulate
    matmuls so the self-check can use a tight tolerance."""
    (w1, b1, w21, b21, w22, b22, w3, b3, w4, b4) = params
    bf16 = jnp.bfloat16

    def mm(a, w):
        return jnp.dot(a.astype(bf16), w.astype(bf16),
                       preferred_element_type=jnp.float32)

    x = x_img.reshape(x_img.shape[0], D_IN)
    h1 = jax.nn.relu(mm(x, w1) + b1)
    mu = mm(h1, w21) + b21
    logvar = mm(h1, w22) + b22
    z = mu + eps * jnp.exp(0.5 * logvar)
    h3 = jax.nn.relu(mm(z, w3) + b3)
    recon = jax.nn.sigmoid(mm(h3, w4) + b4)
    return recon, mu, logvar


if __name__ == "__main__":
    key = jax.random.PRNGKey(0)
    kx, keps, kp = jax.random.split(key, 3)

    B = 2
    x_img = jax.random.normal(kx, (B, 1, 30, 30), jnp.float32)
    eps = jax.random.normal(keps, (B, D_Z), jnp.float32)  # randn_like(std)
    params = init_params(kp)

    recon, mu, logvar = vae_forward(x_img, eps, params)
    jax.block_until_ready((recon, mu, logvar))

    # sanity check against a plain-JAX reference (bf16-matmul tolerance)
    r_ref, mu_ref, lv_ref = _reference(x_img, eps, params)
    assert jnp.allclose(recon, r_ref, atol=1e-2, rtol=1e-2)
    assert jnp.allclose(mu, mu_ref, atol=1e-2, rtol=1e-2)
    assert jnp.allclose(logvar, lv_ref, atol=1e-2, rtol=1e-2)

    print("KERNEL_OK")
</pallas_src>

<mosaic_0001>
module attributes {stable_mosaic.version = 11 : i64} {
  func.func @_vae_kernel(%arg0: i32, %arg1: memref<8x1024xbf16, #tpu.memory_space<vmem>>, %arg2: memref<8x128xf32, #tpu.memory_space<vmem>>, %arg3: memref<1024x512xbf16, #tpu.memory_space<vmem>>, %arg4: memref<1x512xf32, #tpu.memory_space<vmem>>, %arg5: memref<512x256xbf16, #tpu.memory_space<vmem>>, %arg6: memref<1x256xf32, #tpu.memory_space<vmem>>, %arg7: memref<128x512xbf16, #tpu.memory_space<vmem>>, %arg8: memref<1x512xf32, #tpu.memory_space<vmem>>, %arg9: memref<512x1024xbf16, #tpu.memory_space<vmem>>, %arg10: memref<1x1024xf32, #tpu.memory_space<vmem>>, %arg11: memref<8x1024xbf16, #tpu.memory_space<vmem>>, %arg12: memref<8x256xf32, #tpu.memory_space<vmem>>) attributes {dimension_semantics = [#tpu.dimension_semantics<parallel>], iteration_bounds = array<i64: 1>, scalar_prefetch = 0 : i64, scratch_operands = 0 : i64, tpu.core_type = #tpu.core_type<tc>, window_params = [{transform_indices = @transform_0, window_bounds = array<i64: 8, 1024>}, {transform_indices = @transform_1, window_bounds = array<i64: 8, 128>}, {pipeline_mode = #tpu.pipeline_mode<synchronous>, transform_indices = @transform_2, window_bounds = array<i64: 1024, 512>}, {pipeline_mode = #tpu.pipeline_mode<synchronous>, transform_indices = @transform_3, window_bounds = array<i64: 1, 512>}, {pipeline_mode = #tpu.pipeline_mode<synchronous>, transform_indices = @transform_4, window_bounds = array<i64: 512, 256>}, {pipeline_mode = #tpu.pipeline_mode<synchronous>, transform_indices = @transform_5, window_bounds = array<i64: 1, 256>}, {pipeline_mode = #tpu.pipeline_mode<synchronous>, transform_indices = @transform_6, window_bounds = array<i64: 128, 512>}, {pipeline_mode = #tpu.pipeline_mode<synchronous>, transform_indices = @transform_7, window_bounds = array<i64: 1, 512>}, {pipeline_mode = #tpu.pipeline_mode<synchronous>, transform_indices = @transform_8, window_bounds = array<i64: 512, 1024>}, {pipeline_mode = #tpu.pipeline_mode<synchronous>, transform_indices = @transform_9, window_bounds = array<i64: 1, 1024>}, {transform_indices = @transform_10, window_bounds = array<i64: 8, 1024>}, {transform_indices = @transform_11, window_bounds = array<i64: 8, 256>}]} {
    %c0 = arith.constant 0 : index
    %c0_0 = arith.constant 0 : index
    %0 = vector.load %arg1[%c0, %c0_0] : memref<8x1024xbf16, #tpu.memory_space<vmem>>, vector<8x1024xbf16>
    %c0_1 = arith.constant 0 : index
    %c0_2 = arith.constant 0 : index
    %1 = vector.load %arg3[%c0_1, %c0_2] : memref<1024x512xbf16, #tpu.memory_space<vmem>>, vector<1024x512xbf16>
    %cst = arith.constant dense<0.000000e+00> : vector<8x512xf32>
    %2 = tpu.matmul %0, %1, %cst {dimension_numbers = #tpu.dot_dimension_numbers<[1], [0], [0], [1], [0, 0, 1, 1], [], []>} : vector<8x1024xbf16>, vector<1024x512xbf16>, vector<8x512xf32> -> vector<8x512xf32>
    %c0_3 = arith.constant 0 : index
    %c0_4 = arith.constant 0 : index
    %3 = vector.load %arg4[%c0_3, %c0_4] : memref<1x512xf32, #tpu.memory_space<vmem>>, vector<1x512xf32>
    %4 = vector.broadcast %3 : vector<1x512xf32> to vector<8x512xf32>
    %5 = arith.addf %2, %4 : vector<8x512xf32>
    %cst_5 = arith.constant 0.000000e+00 : f32
    %6 = vector.broadcast %cst_5 : f32 to vector<8x512xf32>
    %7 = arith.maximumf %5, %6 : vector<8x512xf32>
    %8 = arith.truncf %7 : vector<8x512xf32> to vector<8x512xbf16>
    %c0_6 = arith.constant 0 : index
    %c0_7 = arith.constant 0 : index
    %9 = vector.load %arg5[%c0_6, %c0_7] : memref<512x256xbf16, #tpu.memory_space<vmem>>, vector<512x256xbf16>
    %cst_8 = arith.constant dense<0.000000e+00> : vector<8x256xf32>
    %10 = tpu.matmul %8, %9, %cst_8 {dimension_numbers = #tpu.dot_dimension_numbers<[1], [0], [0], [1], [0, 0, 1, 1], [], []>} : vector<8x512xbf16>, vector<512x256xbf16>, vector<8x256xf32> -> vector<8x256xf32>
    %c0_9 = arith.constant 0 : index
    %c0_10 = arith.constant 0 : index
    %11 = vector.load %arg6[%c0_9, %c0_10] : memref<1x256xf32, #tpu.memory_space<vmem>>, vector<1x256xf32>
    %12 = vector.broadcast %11 : vector<1x256xf32> to vector<8x256xf32>
    %13 = arith.addf %10, %12 : vector<8x256xf32>
    %14 = vector.extract_strided_slice %13 {offsets = [0, 0], sizes = [8, 128], strides = [1, 1]} : vector<8x256xf32> to vector<8x128xf32>
    %15 = vector.extract_strided_slice %13 {offsets = [0, 128], sizes = [8, 128], strides = [1, 1]} : vector<8x256xf32> to vector<8x128xf32>
    %cst_11 = arith.constant 5.000000e-01 : f32
    %16 = vector.broadcast %cst_11 : f32 to vector<8x128xf32>
    %17 = arith.mulf %16, %15 : vector<8x128xf32>
    %18 = math.exp %17 : vector<8x128xf32>
    %c0_12 = arith.constant 0 : index
    %c0_13 = arith.constant 0 : index
    %19 = vector.load %arg2[%c0_12, %c0_13] : memref<8x128xf32, #tpu.memory_space<vmem>>, vector<8x128xf32>
    %20 = arith.mulf %19, %18 : vector<8x128xf32>
    %21 = arith.addf %14, %20 : vector<8x128xf32>
    %22 = arith.truncf %21 : vector<8x128xf32> to vector<8x128xbf16>
    %c0_14 = arith.constant 0 : index
    %c0_15 = arith.constant 0 : index
    %23 = vector.load %arg7[%c0_14, %c0_15] : memref<128x512xbf16, #tpu.memory_space<vmem>>, vector<128x512xbf16>
    %cst_16 = arith.constant dense<0.000000e+00> : vector<8x512xf32>
    %24 = tpu.matmul %22, %23, %cst_16 {dimension_numbers = #tpu.dot_dimension_numbers<[1], [0], [0], [1], [0, 0, 1, 1], [], []>} : vector<8x128xbf16>, vector<128x512xbf16>, vector<8x512xf32> -> vector<8x512xf32>
    %c0_17 = arith.constant 0 : index
    %c0_18 = arith.constant 0 : index
    %25 = vector.load %arg8[%c0_17, %c0_18] : memref<1x512xf32, #tpu.memory_space<vmem>>, vector<1x512xf32>
    %26 = vector.broadcast %25 : vector<1x512xf32> to vector<8x512xf32>
    %27 = arith.addf %24, %26 : vector<8x512xf32>
    %cst_19 = arith.constant 0.000000e+00 : f32
    %28 = vector.broadcast %cst_19 : f32 to vector<8x512xf32>
    %29 = arith.maximumf %27, %28 : vector<8x512xf32>
    %30 = arith.truncf %29 : vector<8x512xf32> to vector<8x512xbf16>
    %c0_20 = arith.constant 0 : index
    %c0_21 = arith.constant 0 : index
    %31 = vector.load %arg9[%c0_20, %c0_21] : memref<512x1024xbf16, #tpu.memory_space<vmem>>, vector<512x1024xbf16>
    %cst_22 = arith.constant dense<0.000000e+00> : vector<8x1024xf32>
    %32 = tpu.matmul %30, %31, %cst_22 {dimension_numbers = #tpu.dot_dimension_numbers<[1], [0], [0], [1], [0, 0, 1, 1], [], []>} : vector<8x512xbf16>, vector<512x1024xbf16>, vector<8x1024xf32> -> vector<8x1024xf32>
    %c0_23 = arith.constant 0 : index
    %c0_24 = arith.constant 0 : index
    %33 = vector.load %arg10[%c0_23, %c0_24] : memref<1x1024xf32, #tpu.memory_space<vmem>>, vector<1x1024xf32>
    %34 = vector.broadcast %33 : vector<1x1024xf32> to vector<8x1024xf32>
    %35 = arith.addf %32, %34 : vector<8x1024xf32>
    %36 = arith.negf %35 : vector<8x1024xf32>
    %37 = math.exp %36 : vector<8x1024xf32>
    %cst_25 = arith.constant 1.000000e+00 : f32
    %38 = vector.broadcast %cst_25 : f32 to vector<8x1024xf32>
    %39 = arith.addf %38, %37 : vector<8x1024xf32>
    %40 = arith.divf %38, %39 : vector<8x1024xf32>
    %41 = arith.truncf %40 : vector<8x1024xf32> to vector<8x1024xbf16>
    %c0_26 = arith.constant 0 : index
    %c0_27 = arith.constant 0 : index
    %42 = vector.load %arg11[%c0_26, %c0_27] : memref<8x1024xbf16, #tpu.memory_space<vmem>>, vector<8x1024xbf16>
    tpu.vector_store %arg11[%c0_26, %c0_27], %41 {strides = array<i32>} : memref<8x1024xbf16, #tpu.memory_space<vmem>>, vector<8x1024xbf16>,
    %c0_28 = arith.constant 0 : index
    %c0_29 = arith.constant 0 : index
    %43 = vector.load %arg12[%c0_28, %c0_29] : memref<8x256xf32, #tpu.memory_space<vmem>>, vector<8x256xf32>
    tpu.vector_store %arg12[%c0_28, %c0_29], %13 {strides = array<i32>} : memref<8x256xf32, #tpu.memory_space<vmem>>, vector<8x256xf32>,
    return
  }
  func.func @transform_0(%arg0: i32) -> (i32, i32) {
    %c0_i32 = arith.constant 0 : i32
    %c0_i32_0 = arith.constant 0 : i32
    return %arg0, %c0_i32 : i32, i32
  }
  func.func @transform_1(%arg0: i32) -> (i32, i32) {
    %c0_i32 = arith.constant 0 : i32
    %c0_i32_0 = arith.constant 0 : i32
    return %arg0, %c0_i32 : i32, i32
  }
  func.func @transform_2(%arg0: i32) -> (i32, i32) {
    %c0_i32 = arith.constant 0 : i32
    %c0_i32_0 = arith.constant 0 : i32
    %c0_i32_1 = arith.constant 0 : i32
    return %c0_i32, %c0_i32_0 : i32, i32
  }
  func.func @transform_3(%arg0: i32) -> (i32, i32) {
    %c0_i32 = arith.constant 0 : i32
    %c0_i32_0 = arith.constant 0 : i32
    %c0_i32_1 = arith.constant 0 : i32
    return %c0_i32, %c0_i32_0 : i32, i32
  }
  func.func @transform_4(%arg0: i32) -> (i32, i32) {
    %c0_i32 = arith.constant 0 : i32
    %c0_i32_0 = arith.constant 0 : i32
    %c0_i32_1 = arith.constant 0 : i32
    return %c0_i32, %c0_i32_0 : i32, i32
  }
  func.func @transform_5(%arg0: i32) -> (i32, i32) {
    %c0_i32 = arith.constant 0 : i32
    %c0_i32_0 = arith.constant 0 : i32
    %c0_i32_1 = arith.constant 0 : i32
    return %c0_i32, %c0_i32_0 : i32, i32
  }
  func.func @transform_6(%arg0: i32) -> (i32, i32) {
    %c0_i32 = arith.constant 0 : i32
    %c0_i32_0 = arith.constant 0 : i32
    %c0_i32_1 = arith.constant 0 : i32
    return %c0_i32, %c0_i32_0 : i32, i32
  }
  func.func @transform_7(%arg0: i32) -> (i32, i32) {
    %c0_i32 = arith.constant 0 : i32
    %c0_i32_0 = arith.constant 0 : i32
    %c0_i32_1 = arith.constant 0 : i32
    return %c0_i32, %c0_i32_0 : i32, i32
  }
  func.func @transform_8(%arg0: i32) -> (i32, i32) {
    %c0_i32 = arith.constant 0 : i32
    %c0_i32_0 = arith.constant 0 : i32
    %c0_i32_1 = arith.constant 0 : i32
    return %c0_i32, %c0_i32_0 : i32, i32
  }
  func.func @transform_9(%arg0: i32) -> (i32, i32) {
    %c0_i32 = arith.constant 0 : i32
    %c0_i32_0 = arith.constant 0 : i32
    %c0_i32_1 = arith.constant 0 : i32
    return %c0_i32, %c0_i32_0 : i32, i32
  }
  func.func @transform_10(%arg0: i32) -> (i32, i32) {
    %c0_i32 = arith.constant 0 : i32
    %c0_i32_0 = arith.constant 0 : i32
    return %arg0, %c0_i32 : i32, i32
  }
  func.func @transform_11(%arg0: i32) -> (i32, i32) {
    %c0_i32 = arith.constant 0 : i32
    %c0_i32_0 = arith.constant 0 : i32
    return %arg0, %c0_i32 : i32, i32
  }
}

</mosaic_0001>

<bundles_post_ra>
// kernel: tpu_custom_call.1
= control target key start
LH: loop header
LB: loop body
LE: loop exit
PB: predicated region body
PF: predicated region fallthrough
CT: control target
= control target key end

     0   :  { %17 = vsyncpa [#allocation3], 0  ;;  %s6628_s0 = inlined_call_operand.hbm [shape: bf16[8,1024], index: 0, kind: input, shape index: {}]   ;;  %s6629_s1 = inlined_call_operand.hbm [shape: f32[8,128], index: 1, kind: input, shape index: {}]   ;;  %s6630_s2 = inlined_call_operand.hbm [shape: bf16[1024,512], index: 2, kind: input, shape index: {}]   ;;  %s6631_s3 = inlined_call_operand.vmem [shape: f32[1,512], index: 3, kind: input, shape index: {}]   ;;  %s6632_s4 = inlined_call_operand.hbm [shape: bf16[512,256], index: 4, kind: input, shape index: {}]   ;;  %s6633_s5 = inlined_call_operand.vmem [shape: f32[1,256], index: 5, kind: input, shape index: {}]   ;;  %s6634_s6 = inlined_call_operand.hbm [shape: bf16[128,512], index: 6, kind: input, shape index: {}]   ;;  %s6635_s7 = inlined_call_operand.vmem [shape: f32[1,512], index: 7, kind: input, shape index: {}]   ;;  %s6636_s8 = inlined_call_operand.hbm [shape: bf16[512,1024], index: 8, kind: input, shape index: {}]   ;;  %s6637_s9 = inlined_call_operand.vmem [shape: f32[1,1024], index: 9, kind: input, shape index: {}]   ;;  %s6638_s10 = inlined_call_operand.hbm [shape: bf16[8,1024], index: 10, kind: output, shape index: {0}]   ;;  %s6639_s11 = inlined_call_operand.hbm [shape: f32[8,256], index: 11, kind: output, shape index: {1}]  }
   0x1   :  { %18 = vsyncpa [#allocation6], 0 }
   0x2   :  { %19 = vsyncpa [#allocation9], 0 }
   0x3   :  { %20 = vsyncpa [#allocation12], 0 }
   0x4   :  { %21 = vsyncpa [#allocation4], 0 }
   0x5   :  { %22 = vsyncpa [#allocation15], 0  ;;  %s6320_s17 = smov [#allocation5]   ;;  %s6321_s19 = smov [#allocation8]  }
   0x6   :  { %s39_s18 = sshll.u32 %s6320_s17, 4  ;;  %s62_s20 = sshll.u32 %s6321_s19, 4  ;;  %s40_s18 = int_to_ptr.vmem [resolvable:$true] %s39_s18  ;;  %s6395_s20 = int_to_ptr.vmem [resolvable:$true] %s62_s20 }
   0x7   :  { %s6132_s23 = scalar_lea.hbm %s6629_s1, 128 }
   0x8   :  { %p6133_p0 = scmp.ne.s32.totalorder %s6629_s1, %s6132_s23  ;;  %p6136_p1 = scmp.lt.u32.totalorder %s6132_s23, %s6629_s1 }
   0xa   :  { %p6138_p2 = pnand %p6136_p1, %p6133_p0 }
   0xc   :  { %6141 = shalt.err (!%p6138_p2)
}
   0xd   :  { %s6142_s28 = scalar_lea.vmem %s40_s18, 128  ;;  %p6147_p4 = scmp.lt.s32.totalorder %s40_s18, %s40_s18 }
   0xe   :  { %p6143_p3 = scmp.ne.s32.totalorder %s40_s18, %s6142_s28  ;;  %p6148_p5 = scmp.lt.s32.totalorder %s6142_s28, %s6142_s28 }
  0x10   :  { %p6149_p6 = por %p6148_p5, %p6147_p4 }
  0x12   :  { %p6150_p7 = pnand %p6149_p6, %p6143_p3 }
  0x14   :  { %6153 = shalt.err (!%p6150_p7)
}
  0x15   :  { %42 = dma.hbm_to_vmem [thread:$0]  %s6629_s1, 128, %s40_s18, [#allocation6]  }
  0x16   :  { %s6154_s14 = scalar_lea.hbm %s6632_s4, 8192 }
  0x17   :  { %p6155_p8 = scmp.ne.s32.totalorder %s6632_s4, %s6154_s14  ;;  %p6158_p9 = scmp.lt.u32.totalorder %s6154_s14, %s6632_s4 }
  0x19   :  { %p6160_p10 = pnand %p6158_p9, %p6155_p8 }
  0x1b   :  { %6163 = shalt.err (!%p6160_p10)
}
  0x1c   :  { %s6164_s21 = scalar_lea.vmem %s6395_s20, 8192  ;;  %p6169_p12 = scmp.lt.s32.totalorder %s6395_s20, %s6395_s20 }
  0x1d   :  { %p6165_p11 = scmp.ne.s32.totalorder %s6395_s20, %s6164_s21  ;;  %p6170_p13 = scmp.lt.s32.totalorder %s6164_s21, %s6164_s21 }
  0x1f   :  { %p6171_p0 = por %p6170_p13, %p6169_p12 }
  0x21   :  { %p6172_p1 = pnand %p6171_p0, %p6165_p11 }
  0x23   :  { %6175 = shalt.err (!%p6172_p1)
}
  0x24   :  { %s6322_s1 = smov 128   ;;  %s6323_s18 = smov 8  }
  0x25   :  { %68 = dma.hbm_to_vmem [thread:$0]  %s6632_s4, 8192, %s6395_s20, [#allocation9], %s6322_s1, %s6322_s1, %s6323_s18  }
  0x26   :  { %s6324_s24 = smov [#allocation2]   ;;  %s6325_s26 = smov [#allocation7]  }
  0x27   :  { %s29_s25 = sshll.u32 %s6324_s24, 4  ;;  %s48_s27 = sshll.u32 %s6325_s26, 4  ;;  %s30_s25 = int_to_ptr.vmem [resolvable:$true] %s29_s25  ;;  %s6426_s27 = int_to_ptr.vmem [resolvable:$true] %s48_s27 }
  0x28   :  { %s6176_s30 = scalar_lea.hbm %s6628_s0, 512 }
  0x29   :  { %p6177_p2 = scmp.ne.s32.totalorder %s6628_s0, %s6176_s30  ;;  %p6180_p3 = scmp.lt.u32.totalorder %s6176_s30, %s6628_s0 }
  0x2b   :  { %p6182_p4 = pnand %p6180_p3, %p6177_p2 }
  0x2d   :  { %6185 = shalt.err (!%p6182_p4)
}
  0x2e   :  { %s6186_s4 = scalar_lea.vmem %s30_s25, 512  ;;  %p6191_p6 = scmp.lt.s32.totalorder %s30_s25, %s30_s25 }
  0x2f   :  { %p6187_p5 = scmp.ne.s32.totalorder %s30_s25, %s6186_s4  ;;  %p6192_p7 = scmp.lt.s32.totalorder %s6186_s4, %s6186_s4 }
  0x31   :  { %p6193_p8 = por %p6192_p7, %p6191_p6 }
  0x33   :  { %p6194_p9 = pnand %p6193_p8, %p6187_p5 }
  0x35   :  { %6197 = shalt.err (!%p6194_p9)
}
  0x36   :  { %32 = dma.hbm_to_vmem [thread:$0]  %s6628_s0, 512, %s30_s25, [#allocation3]  }
  0x37   :  { %s6198_s21 = scalar_lea.hbm %s6630_s2, 32768 }
  0x38   :  { %p6199_p10 = scmp.ne.s32.totalorder %s6630_s2, %s6198_s21  ;;  %p6202_p11 = scmp.lt.u32.totalorder %s6198_s21, %s6630_s2 }
  0x3a   :  { %p6204_p12 = pnand %p6202_p11, %p6199_p10 }
  0x3c   :  { %6207 = shalt.err (!%p6204_p12)
}
  0x3d   :  { %s6208_s24 = scalar_lea.vmem %s6426_s27, 32768  ;;  %p6213_p0 = scmp.lt.s32.totalorder %s6426_s27, %s6426_s27 }
  0x3e   :  { %p6209_p13 = scmp.ne.s32.totalorder %s6426_s27, %s6208_s24  ;;  %p6214_p1 = scmp.lt.s32.totalorder %s6208_s24, %s6208_s24 }
  0x40   :  { %p6215_p2 = por %p6214_p1, %p6213_p0 }
  0x42   :  { %p6216_p3 = pnand %p6215_p2, %p6209_p13 }
  0x44   :  { %6219 = shalt.err (!%p6216_p3)
}
  0x45   :  { %s6326_s0 = smov 256   ;;  %s6327_s25 = smov 16  }
  0x46   :  { %54 = dma.hbm_to_vmem [thread:$0]  %s6630_s2, 32768, %s6426_s27, [#allocation6], %s6326_s0, %s6326_s0, %s6327_s25  }
  0x47   :  { %s6328_s29 = smov [#allocation10]   ;;  %s6329_s12 = smov [#allocation11]  }
  0x48   :  { %s76_s30 = sshll.u32 %s6328_s29, 4  ;;  %s90_s13 = sshll.u32 %s6329_s12, 4  ;;  %s77_s30 = int_to_ptr.vmem [resolvable:$true] %s76_s30  ;;  %s6457_s13 = int_to_ptr.vmem [resolvable:$true] %s90_s13 }
  0x49   :  { %s6220_s4 = scalar_lea.hbm %s6634_s6, 4096 }
  0x4a   :  { %p6221_p4 = scmp.ne.s32.totalorder %s6634_s6, %s6220_s4  ;;  %p6224_p5 = scmp.lt.u32.totalorder %s6220_s4, %s6634_s6 }
  0x4c   :  { %p6226_p6 = pnand %p6224_p5, %p6221_p4 }
  0x4e   :  { %6229 = shalt.err (!%p6226_p6)
}
  0x4f   :  { %s6230_s2 = scalar_lea.vmem %s77_s30, 4096  ;;  %p6235_p8 = scmp.lt.s32.totalorder %s77_s30, %s77_s30 }
  0x50   :  { %p6231_p7 = scmp.ne.s32.totalorder %s77_s30, %s6230_s2  ;;  %p6236_p9 = scmp.lt.s32.totalorder %s6230_s2, %s6230_s2 }
  0x52   :  { %p6237_p10 = por %p6236_p9, %p6235_p8 }
  0x54   :  { %p6238_p11 = pnand %p6237_p10, %p6231_p7 }
  0x56   :  { %6241 = shalt.err (!%p6238_p11)
}
  0x57   :  { %82 = dma.hbm_to_vmem [thread:$0]  %s6634_s6, 4096, %s77_s30, [#allocation9], %s6326_s0, %s6326_s0, %s6327_s25  }
  0x58   :  { %s6242_s22 = scalar_lea.hbm %s6636_s8, 32768 }
  0x59   :  { %p6243_p12 = scmp.ne.s32.totalorder %s6636_s8, %s6242_s22  ;;  %p6246_p13 = scmp.lt.u32.totalorder %s6242_s22, %s6636_s8 }
  0x5b   :  { %p6248_p0 = pnand %p6246_p13, %p6243_p12 }
  0x5d   :  { %6251 = shalt.err (!%p6248_p0)
}
  0x5e   :  { %s6252_s29 = scalar_lea.vmem %s6457_s13, 32768  ;;  %p6257_p2 = scmp.lt.s32.totalorder %s6457_s13, %s6457_s13 }
  0x5f   :  { %p6253_p1 = scmp.ne.s32.totalorder %s6457_s13, %s6252_s29  ;;  %p6258_p3 = scmp.lt.s32.totalorder %s6252_s29, %s6252_s29 }
  0x61   :  { %p6259_p4 = por %p6258_p3, %p6257_p2 }
  0x63   :  { %p6260_p5 = pnand %p6259_p4, %p6253_p1 }
  0x65   :  { %6263 = shalt.err (!%p6260_p5)
}
  0x66   :  { %s6330_s6 = smov 512   ;;  %s6331_s0 = smov 32  }
  0x67   :  { %96 = dma.hbm_to_vmem [thread:$0]  %s6636_s8, 32768, %s6457_s13, [#allocation12], %s6330_s6, %s6330_s6, %s6331_s0  }
  0x68   :  { %6308 = dma.done.wait [#allocation3], 512  }
  0x69   :  { %6309 = vsyncadd [#allocation3], 4294966784 }
  0x6a   :  { %6310 = dma.done.wait [#allocation6], 32896  }
  0x6b   :  { %6311 = vsyncadd [#allocation6], 4294934400 }
  0x6c   :  { %6312 = dma.done.wait [#allocation9], 12288  }
  0x6d   :  { %6313 = vsyncadd [#allocation9], 4294955008 }
  0x6e   :  { %6314 = dma.done.wait [#allocation12], 32768  }
  0x6f   :  { %6315 = vsyncadd [#allocation12], 4294934528  ;;  %v5562_v0 = vld [vmem:[#allocation7 + $0x4] ss:$16 sps:$4 sm:$0xff]   ;;  %v5564_v1 = vld [vmem:[#allocation7 + $0xc] ss:$16 sps:$4 sm:$0xff]  }
  0x70   :  { %1708 = vmatprep.subr.bf16.mxu0 %v5562_v0  ;;  %v5566_v2 = vld [vmem:[#allocation7] ss:$16 sps:$4 sm:$0xff]   ;;  %v5567_v3 = vld [vmem:[#allocation7 + $0x8] ss:$16 sps:$4 sm:$0xff]   ;;  %1872 = vmatprep.subr.bf16.mxu1 %v5564_v1  ;;  %v5568_v4 = vld [vmem:[#allocation7 + $0x24] ss:$16 sps:$4 sm:$0xff]  }
  0x71   :  { %1709 = vmatpush1.bf16.msra.mxu0 %v5566_v2  ;;  %1873 = vmatpush1.bf16.msra.mxu1 %v5567_v3  ;;  %v5570_v5 = vld [vmem:[#allocation7 + $0x2c] ss:$16 sps:$4 sm:$0xff]   ;;  %v5572_v6 = vld [vmem:[#allocation7 + $0x20] ss:$16 sps:$4 sm:$0xff]   ;;  %v5573_v7 = vld [vmem:[#allocation7 + $0x28] ss:$16 sps:$4 sm:$0xff]  }
  0x72   :  { %1710 = vmatprep.subr.bf16.mxu0 %v5568_v4  ;;  %1874 = vmatprep.subr.bf16.mxu1 %v5570_v5  ;;  %v5574_v8 = vld [vmem:[#allocation7 + $0x44] ss:$16 sps:$4 sm:$0xff]   ;;  %v5576_v9 = vld [vmem:[#allocation7 + $0x4c] ss:$16 sps:$4 sm:$0xff]   ;;  %v5578_v10 = vld [vmem:[#allocation7 + $0x40] ss:$16 sps:$4 sm:$0xff]  }
  0x73   :  { %v5579_v11 = vld [vmem:[#allocation7 + $0x48] ss:$16 sps:$4 sm:$0xff]   ;;  %v5580_v12 = vld [vmem:[#allocation7 + $0x64] ss:$16 sps:$4 sm:$0xff]   ;;  %v5582_v13 = vld [vmem:[#allocation7 + $0x6c] ss:$16 sps:$4 sm:$0xff]  }
  0x74   :  { %v5584_v14 = vld [vmem:[#allocation7 + $0x60] ss:$16 sps:$4 sm:$0xff]   ;;  %v5585_v15 = vld [vmem:[#allocation7 + $0x68] ss:$16 sps:$4 sm:$0xff]   ;;  %v5586_v16 = vld [vmem:[#allocation7 + $0x84] ss:$16 sps:$4 sm:$0xff]  }
  0x75   :  { %1711 = vmatpush1.bf16.msra.mxu0 %v5572_v6  ;;  %1875 = vmatpush1.bf16.msra.mxu1 %v5573_v7  ;;  %v5588_v17 = vld [vmem:[#allocation7 + $0x8c] ss:$16 sps:$4 sm:$0xff]   ;;  %v5590_v18 = vld [vmem:[#allocation7 + $0x80] ss:$16 sps:$4 sm:$0xff]   ;;  %v5591_v19 = vld [vmem:[#allocation7 + $0x88] ss:$16 sps:$4 sm:$0xff]  }
  0x76   :  { %1712 = vmatprep.subr.bf16.mxu0 %v5574_v8  ;;  %1876 = vmatprep.subr.bf16.mxu1 %v5576_v9  ;;  %v5592_v20 = vld [vmem:[#allocation7 + $0xa4] ss:$16 sps:$4 sm:$0xff]   ;;  %v5594_v21 = vld [vmem:[#allocation7 + $0xac] ss:$16 sps:$4 sm:$0xff]   ;;  %v5596_v22 = vld [vmem:[#allocation7 + $0xa0] ss:$16 sps:$4 sm:$0xff]  }
  0x77   :  { %v5597_v23 = vld [vmem:[#allocation7 + $0xa8] ss:$16 sps:$4 sm:$0xff]   ;;  %v5598_v24 = vld [vmem:[#allocation7 + $0xc4] ss:$16 sps:$4 sm:$0xff]   ;;  %v5600_v25 = vld [vmem:[#allocation7 + $0xcc] ss:$16 sps:$4 sm:$0xff]  }
  0x78   :  { %v5602_v26 = vld [vmem:[#allocation7 + $0xc0] ss:$16 sps:$4 sm:$0xff]   ;;  %v5603_v27 = vld [vmem:[#allocation7 + $0xc8] ss:$16 sps:$4 sm:$0xff]   ;;  %v5604_v28 = vld [vmem:[#allocation7 + $0xe4] ss:$16 sps:$4 sm:$0xff]  }
  0x79   :  { %1713 = vmatpush1.bf16.msra.mxu0 %v5578_v10  ;;  %1877 = vmatpush1.bf16.msra.mxu1 %v5579_v11  ;;  %v5606_v29 = vld [vmem:[#allocation7 + $0xec] ss:$16 sps:$4 sm:$0xff]   ;;  %v5608_v30 = vld [vmem:[#allocation7 + $0xe0] ss:$16 sps:$4 sm:$0xff]   ;;  %v5609_v31 = vld [vmem:[#allocation7 + $0xe8] ss:$16 sps:$4 sm:$0xff]  }
  0x7a   :  { %1714 = vmatprep.subr.bf16.mxu0 %v5580_v12  ;;  %1878 = vmatprep.subr.bf16.mxu1 %v5582_v13  ;;  %v5610_v32 = vld [vmem:[#allocation7 + $0x104] ss:$16 sps:$4 sm:$0xff]   ;;  %v5612_v33 = vld [vmem:[#allocation7 + $0x10c] ss:$16 sps:$4 sm:$0xff]   ;;  %v5614_v34 = vld [vmem:[#allocation7 + $0x100] ss:$16 sps:$4 sm:$0xff]  }
  0x7b   :  { %v5615_v35 = vld [vmem:[#allocation7 + $0x108] ss:$16 sps:$4 sm:$0xff]   ;;  %v5616_v36 = vld [vmem:[#allocation7 + $0x124] ss:$16 sps:$4 sm:$0xff]   ;;  %v5618_v37 = vld [vmem:[#allocation7 + $0x12c] ss:$16 sps:$4 sm:$0xff]  }
  0x7c   :  { %v5620_v38 = vld [vmem:[#allocation7 + $0x120] ss:$16 sps:$4 sm:$0xff]   ;;  %v5621_v39 = vld [vmem:[#allocation7 + $0x128] ss:$16 sps:$4 sm:$0xff]   ;;  %v5622_v40 = vld [vmem:[#allocation7 + $0x144] ss:$16 sps:$4 sm:$0xff]  }
  0x7d   :  { %1715 = vmatpush1.bf16.msra.mxu0 %v5584_v14  ;;  %1879 = vmatpush1.bf16.msra.mxu1 %v5585_v15  ;;  %v5624_v41 = vld [vmem:[#allocation7 + $0x14c] ss:$16 sps:$4 sm:$0xff]   ;;  %v5626_v42 = vld [vmem:[#allocation7 + $0x140] ss:$16 sps:$4 sm:$0xff]   ;;  %v5627_v43 = vld [vmem:[#allocation7 + $0x148] ss:$16 sps:$4 sm:$0xff]  }
  0x7e   :  { %1716 = vmatprep.subr.bf16.mxu0 %v5586_v16  ;;  %1880 = vmatprep.subr.bf16.mxu1 %v5588_v17  ;;  %v5628_v44 = vld [vmem:[#allocation7 + $0x164] ss:$16 sps:$4 sm:$0xff]   ;;  %v5630_v45 = vld [vmem:[#allocation7 + $0x16c] ss:$16 sps:$4 sm:$0xff]   ;;  %v5632_v47 = vld [vmem:[#allocation7 + $0x160] ss:$16 sps:$4 sm:$0xff]  }
  0x7f   :  { %v118_v46 = vld [vmem:[#allocation2] sm:$0xff]  ;;  %v5634_v50 = vld [vmem:[#allocation7 + $0x184] ss:$16 sps:$4 sm:$0xff]   ;;  %v5638_v52 = vld [vmem:[#allocation7 + $0x180] ss:$16 sps:$4 sm:$0xff]  }
  0x80   :  { %v4858_v48 = vcombine.high %v118_v46, %v118_v46  ;;  %v5633_v49 = vld [vmem:[#allocation7 + $0x168] ss:$16 sps:$4 sm:$0xff]   ;;  %v5636_v51 = vld [vmem:[#allocation7 + $0x18c] ss:$16 sps:$4 sm:$0xff]   ;;  %v5640_v54 = vld [vmem:[#allocation7 + $0x1a4] ss:$16 sps:$4 sm:$0xff]   ;;  %v4857_v4 = vcombine.low %v118_v46, %v118_v46 }
  0x81   :  { %1717 = vmatpush1.bf16.msra.mxu0 %v5590_v18  ;;  %1881 = vmatpush1.bf16.msra.mxu1 %v5591_v19  ;;  %v5639_v53 = vld [vmem:[#allocation7 + $0x188] ss:$16 sps:$4 sm:$0xff]   ;;  %v5642_v55 = vld [vmem:[#allocation7 + $0x1ac] ss:$16 sps:$4 sm:$0xff]   ;;  %v5644_v56 = vld [vmem:[#allocation7 + $0x1a0] ss:$16 sps:$4 sm:$0xff]  }
  0x82   :  { %1718 = vmatprep.subr.bf16.mxu0 %v5592_v20  ;;  %1882 = vmatprep.subr.bf16.mxu1 %v5594_v21  ;;  %v5645_v57 = vld [vmem:[#allocation7 + $0x1a8] ss:$16 sps:$4 sm:$0xff]   ;;  %v5646_v58 = vld [vmem:[#allocation7 + $0x1c4] ss:$16 sps:$4 sm:$0xff]   ;;  %v5648_v59 = vld [vmem:[#allocation7 + $0x1cc] ss:$16 sps:$4 sm:$0xff]  }
  0x83   :  { %1740 = vmatprep.mubr.bf16.mxu0 %v4858_v48  ;;  %1904 = vmatprep.mubr.bf16.mxu1 %v4858_v48  ;;  %v5650_v60 = vld [vmem:[#allocation7 + $0x1c0] ss:$16 sps:$4 sm:$0xff]   ;;  %v5651_v61 = vld [vmem:[#allocation7 + $0x1c8] ss:$16 sps:$4 sm:$0xff]   ;;  %v5652_v62 = vld [vmem:[#allocation7 + $0x1e4] ss:$16 sps:$4 sm:$0xff]  }
  0x84   :  { %v5654_v63 = vld [vmem:[#allocation7 + $0x1ec] ss:$16 sps:$4 sm:$0xff]   ;;  %v5656_v0 = vld [vmem:[#allocation7 + $0x1e0] ss:$16 sps:$4 sm:$0xff]   ;;  %v5657_v1 = vld [vmem:[#allocation7 + $0x1e8] ss:$16 sps:$4 sm:$0xff]  }
  0x85   :  { %1719 = vmatpush1.bf16.msra.mxu0 %v5596_v22  ;;  %1883 = vmatpush1.bf16.msra.mxu1 %v5597_v23  ;;  %v5662_v2 = vld [vmem:[#allocation7 + $0x204] ss:$16 sps:$4 sm:$0xff]   ;;  %v5665_v3 = vld [vmem:[#allocation7 + $0x20c] ss:$16 sps:$4 sm:$0xff]   ;;  %v5660_v5 = vld [vmem:[#allocation7 + $0x200] ss:$16 sps:$4 sm:$0xff]  }
  0x86   :  { %1720 = vmatprep.subr.bf16.mxu0 %v5598_v24  ;;  %1884 = vmatprep.subr.bf16.mxu1 %v5600_v25  ;;  %v5663_v6 = vld [vmem:[#allocation7 + $0x208] ss:$16 sps:$4 sm:$0xff]   ;;  %v5668_v7 = vld [vmem:[#allocation7 + $0x224] ss:$16 sps:$4 sm:$0xff]   ;;  %v5671_v8 = vld [vmem:[#allocation7 + $0x22c] ss:$16 sps:$4 sm:$0xff]  }
  0x87   :  { %v5666_v9 = vld [vmem:[#allocation7 + $0x220] ss:$16 sps:$4 sm:$0xff]   ;;  %v5669_v10 = vld [vmem:[#allocation7 + $0x228] ss:$16 sps:$4 sm:$0xff]   ;;  %v5674_v11 = vld [vmem:[#allocation7 + $0x244] ss:$16 sps:$4 sm:$0xff]  }
  0x88   :  { %v5677_v12 = vld [vmem:[#allocation7 + $0x24c] ss:$16 sps:$4 sm:$0xff]   ;;  %v5672_v13 = vld [vmem:[#allocation7 + $0x240] ss:$16 sps:$4 sm:$0xff]   ;;  %v5675_v14 = vld [vmem:[#allocation7 + $0x248] ss:$16 sps:$4 sm:$0xff]  }
  0x89   :  { %1721 = vmatpush1.bf16.msra.mxu0 %v5602_v26  ;;  %1885 = vmatpush1.bf16.msra.mxu1 %v5603_v27  ;;  %v5680_v15 = vld [vmem:[#allocation7 + $0x264] ss:$16 sps:$4 sm:$0xff]   ;;  %v5683_v16 = vld [vmem:[#allocation7 + $0x26c] ss:$16 sps:$4 sm:$0xff]   ;;  %v5678_v17 = vld [vmem:[#allocation7 + $0x260] ss:$16 sps:$4 sm:$0xff]  }
  0x8a   :  { %1722 = vmatprep.subr.bf16.mxu0 %v5604_v28  ;;  %1886 = vmatprep.subr.bf16.mxu1 %v5606_v29  ;;  %v5681_v18 = vld [vmem:[#allocation7 + $0x268] ss:$16 sps:$4 sm:$0xff]   ;;  %v5686_v19 = vld [vmem:[#allocation7 + $0x284] ss:$16 sps:$4 sm:$0xff]   ;;  %v5689_v20 = vld [vmem:[#allocation7 + $0x28c] ss:$16 sps:$4 sm:$0xff]  }
  0x8b   :  { %v5684_v21 = vld [vmem:[#allocation7 + $0x280] ss:$16 sps:$4 sm:$0xff]   ;;  %v5687_v22 = vld [vmem:[#allocation7 + $0x288] ss:$16 sps:$4 sm:$0xff]   ;;  %v5692_v23 = vld [vmem:[#allocation7 + $0x2a4] ss:$16 sps:$4 sm:$0xff]  }
  0x8c   :  { %v5695_v24 = vld [vmem:[#allocation7 + $0x2ac] ss:$16 sps:$4 sm:$0xff]   ;;  %v5690_v25 = vld [vmem:[#allocation7 + $0x2a0] ss:$16 sps:$4 sm:$0xff]   ;;  %v5693_v26 = vld [vmem:[#allocation7 + $0x2a8] ss:$16 sps:$4 sm:$0xff]  }
  0x8d   :  { %1723 = vmatpush1.bf16.msra.mxu0 %v5608_v30  ;;  %1887 = vmatpush1.bf16.msra.mxu1 %v5609_v31  ;;  %v5698_v27 = vld [vmem:[#allocation7 + $0x2c4] ss:$16 sps:$4 sm:$0xff]   ;;  %v5701_v28 = vld [vmem:[#allocation7 + $0x2cc] ss:$16 sps:$4 sm:$0xff]   ;;  %v5696_v31 = vld [vmem:[#allocation7 + $0x2c0] ss:$16 sps:$4 sm:$0xff]  }
  0x8e   :  { %1724 = vmatprep.subr.bf16.mxu0 %v5610_v32  ;;  %1888 = vmatprep.subr.bf16.mxu1 %v5612_v33  ;;  %v6488_v29 = vld [vmem:[#allocation2 + $0x8] sm:$0xff]  ;;  %v5699_v32 = vld [vmem:[#allocation7 + $0x2c8] ss:$16 sps:$4 sm:$0xff]   ;;  %v5725_v46 = vld [vmem:[#allocation7 + $0x34c] ss:$16 sps:$4 sm:$0xff]  }
  0x8f   :  { %v4860_v30 = vcombine.high %v6488_v29, %v6488_v29  ;;  %v5704_v33 = vld [vmem:[#allocation7 + $0x2e4] ss:$16 sps:$4 sm:$0xff]   ;;  %v5723_v48 = vld [vmem:[#allocation7 + $0x348] ss:$16 sps:$4 sm:$0xff]  }
  0x91   :  { %1725 = vmatpush1.bf16.msra.mxu0 %v5614_v34  ;;  %1889 = vmatpush1.bf16.msra.mxu1 %v5615_v35  ;;  %v5707_v34 = vld [vmem:[#allocation7 + $0x2ec] ss:$16 sps:$4 sm:$0xff]   ;;  %v5702_v35 = vld [vmem:[#allocation7 + $0x2e0] ss:$16 sps:$4 sm:$0xff]  }
  0x92   :  { %1726 = vmatprep.subr.bf16.mxu0 %v5616_v36  ;;  %1890 = vmatprep.subr.bf16.mxu1 %v5618_v37  ;;  %v5705_v36 = vld [vmem:[#allocation7 + $0x2e8] ss:$16 sps:$4 sm:$0xff]   ;;  %v5710_v37 = vld [vmem:[#allocation7 + $0x304] ss:$16 sps:$4 sm:$0xff]  }
  0x95   :  { %1727 = vmatpush1.bf16.msra.mxu0 %v5620_v38  ;;  %1891 = vmatpush1.bf16.msra.mxu1 %v5621_v39  ;;  %v5713_v38 = vld [vmem:[#allocation7 + $0x30c] ss:$16 sps:$4 sm:$0xff]   ;;  %v5708_v39 = vld [vmem:[#allocation7 + $0x300] ss:$16 sps:$4 sm:$0xff]  }
  0x96   :  { %1728 = vmatprep.subr.bf16.mxu0 %v5622_v40  ;;  %1892 = vmatprep.subr.bf16.mxu1 %v5624_v41  ;;  %v5711_v40 = vld [vmem:[#allocation7 + $0x308] ss:$16 sps:$4 sm:$0xff]   ;;  %v5716_v41 = vld [vmem:[#allocation7 + $0x324] ss:$16 sps:$4 sm:$0xff]  }
  0x99   :  { %1729 = vmatpush1.bf16.msra.mxu0 %v5626_v42  ;;  %1893 = vmatpush1.bf16.msra.mxu1 %v5627_v43  ;;  %v5719_v42 = vld [vmem:[#allocation7 + $0x32c] ss:$16 sps:$4 sm:$0xff]   ;;  %v5714_v43 = vld [vmem:[#allocation7 + $0x320] ss:$16 sps:$4 sm:$0xff]  }
  0x9a   :  { %1730 = vmatprep.subr.bf16.mxu0 %v5628_v44  ;;  %1894 = vmatprep.subr.bf16.mxu1 %v5630_v45  ;;  %v5717_v44 = vld [vmem:[#allocation7 + $0x328] ss:$16 sps:$4 sm:$0xff]   ;;  %v5722_v45 = vld [vmem:[#allocation7 + $0x344] ss:$16 sps:$4 sm:$0xff]  }
  0x9d   :  { %1731 = vmatpush1.bf16.msra.mxu0 %v5632_v47  ;;  %1895 = vmatpush1.bf16.msra.mxu1 %v5633_v49  ;;  %v5720_v47 = vld [vmem:[#allocation7 + $0x340] ss:$16 sps:$4 sm:$0xff]   ;;  %v5728_v49 = vld [vmem:[#allocation7 + $0x364] ss:$16 sps:$4 sm:$0xff]  }
  0x9e   :  { %1732 = vmatprep.subr.bf16.mxu0 %v5634_v50  ;;  %1896 = vmatprep.subr.bf16.mxu1 %v5636_v51  ;;  %v5731_v50 = vld [vmem:[#allocation7 + $0x36c] ss:$16 sps:$4 sm:$0xff]   ;;  %v5726_v51 = vld [vmem:[#allocation7 + $0x360] ss:$16 sps:$4 sm:$0xff]  }
  0xa1   :  { %1733 = vmatpush1.bf16.msra.mxu0 %v5638_v52  ;;  %1897 = vmatpush1.bf16.msra.mxu1 %v5639_v53  ;;  %v5729_v52 = vld [vmem:[#allocation7 + $0x368] ss:$16 sps:$4 sm:$0xff]   ;;  %v5734_v53 = vld [vmem:[#allocation7 + $0x384] ss:$16 sps:$4 sm:$0xff]  }
  0xa2   :  { %1734 = vmatprep.subr.bf16.mxu0 %v5640_v54  ;;  %1898 = vmatprep.subr.bf16.mxu1 %v5642_v55  ;;  %v5737_v54 = vld [vmem:[#allocation7 + $0x38c] ss:$16 sps:$4 sm:$0xff]   ;;  %v5732_v55 = vld [vmem:[#allocation7 + $0x380] ss:$16 sps:$4 sm:$0xff]  }
  0xa5   :  { %1735 = vmatpush1.bf16.msra.mxu0 %v5644_v56  ;;  %1899 = vmatpush1.bf16.msra.mxu1 %v5645_v57  ;;  %v5735_v56 = vld [vmem:[#allocation7 + $0x388] ss:$16 sps:$4 sm:$0xff]   ;;  %v5740_v57 = vld [vmem:[#allocation7 + $0x3a4] ss:$16 sps:$4 sm:$0xff]  }
  0xa6   :  { %1736 = vmatprep.subr.bf16.mxu0 %v5646_v58  ;;  %1900 = vmatprep.subr.bf16.mxu1 %v5648_v59  ;;  %v5743_v58 = vld [vmem:[#allocation7 + $0x3ac] ss:$16 sps:$4 sm:$0xff]   ;;  %v5738_v59 = vld [vmem:[#allocation7 + $0x3a0] ss:$16 sps:$4 sm:$0xff]  }
  0xa9   :  { %1737 = vmatpush1.bf16.msra.mxu0 %v5650_v60  ;;  %1901 = vmatpush1.bf16.msra.mxu1 %v5651_v61  ;;  %v5741_v60 = vld [vmem:[#allocation7 + $0x3a8] ss:$16 sps:$4 sm:$0xff]   ;;  %v5746_v61 = vld [vmem:[#allocation7 + $0x3c4] ss:$16 sps:$4 sm:$0xff]  }
  0xaa   :  { %1738 = vmatprep.subr.bf16.mxu0 %v5652_v62  ;;  %1902 = vmatprep.subr.bf16.mxu1 %v5654_v63  ;;  %v5749_v62 = vld [vmem:[#allocation7 + $0x3cc] ss:$16 sps:$4 sm:$0xff]   ;;  %v5744_v63 = vld [vmem:[#allocation7 + $0x3c0] ss:$16 sps:$4 sm:$0xff]  }
  0xad   :  { %1739 = vmatpush1.bf16.msra.mxu0 %v5656_v0  ;;  %1903 = vmatpush1.bf16.msra.mxu1 %v5657_v1  ;;  %v5747_v0 = vld [vmem:[#allocation7 + $0x3c8] ss:$16 sps:$4 sm:$0xff]   ;;  %v5752_v1 = vld [vmem:[#allocation7 + $0x3e4] ss:$16 sps:$4 sm:$0xff]  }
  0xae   :  { %1749 = vmatprep.subr.bf16.mxu0 %v5662_v2  ;;  %1913 = vmatprep.subr.bf16.mxu1 %v5665_v3  ;;  %v5755_v2 = vld [vmem:[#allocation7 + $0x3ec] ss:$16 sps:$4 sm:$0xff]   ;;  %v5750_v3 = vld [vmem:[#allocation7 + $0x3e0] ss:$16 sps:$4 sm:$0xff]  }
  0xb0   :  { %1741 = vmatmul.mubr.bf16.vlgmr.msra.gmra.mrb[0].mxu0 %v4857_v4  ;;  %1905 = vmatmul.mubr.bf16.vlgmr.msra.gmra.mrb[0].mxu1 %v4857_v4  ;;  %v5753_v4 = vld [vmem:[#allocation7 + $0x3e8] ss:$16 sps:$4 sm:$0xff]  }
  0xb1   :  { %1750 = vmatpush1.bf16.msra.mxu0 %v5660_v5  ;;  %1914 = vmatpush1.bf16.msra.mxu1 %v5663_v6  ;;  %v5760_v5 = vld [vmem:[#allocation7 + $0x404] ss:$16 sps:$4 sm:$0xff]   ;;  %v5763_v6 = vld [vmem:[#allocation7 + $0x40c] ss:$16 sps:$4 sm:$0xff]  }
  0xb2   :  { %1751 = vmatprep.subr.bf16.mxu0 %v5668_v7  ;;  %1915 = vmatprep.subr.bf16.mxu1 %v5671_v8  ;;  %v4859_v7 = vcombine.low %v6488_v29, %v6488_v29  ;;  %v5758_v8 = vld [vmem:[#allocation7 + $0x400] ss:$16 sps:$4 sm:$0xff]   ;;  %v5793_v29 = vld [vmem:[#allocation7 + $0x4ac] ss:$16 sps:$4 sm:$0xff]  }
  0xb3   :  { %1781 = vmatprep.mubr.bf16.mxu0 %v4860_v30  ;;  %1945 = vmatprep.mubr.bf16.mxu1 %v4860_v30  ;;  %v5788_v30 = vld [vmem:[#allocation7 + $0x4a0] ss:$16 sps:$4 sm:$0xff]  }
  0xb5   :  { %1752 = vmatpush1.bf16.msra.mxu0 %v5666_v9  ;;  %1916 = vmatpush1.bf16.msra.mxu1 %v5669_v10  ;;  %v5761_v9 = vld [vmem:[#allocation7 + $0x408] ss:$16 sps:$4 sm:$0xff]   ;;  %v5766_v10 = vld [vmem:[#allocation7 + $0x424] ss:$16 sps:$4 sm:$0xff]  }
  0xb6   :  { %1753 = vmatprep.subr.bf16.mxu0 %v5674_v11  ;;  %1917 = vmatprep.subr.bf16.mxu1 %v5677_v12  ;;  %v6494_v11 = vld [vmem:[#allocation2 + $0x10] sm:$0xff] }
  0xb7   :  { %v5769_v12 = vld [vmem:[#allocation7 + $0x42c] ss:$16 sps:$4 sm:$0xff]  }
  0xb9   :  { %1754 = vmatpush1.bf16.msra.mxu0 %v5672_v13  ;;  %1918 = vmatpush1.bf16.msra.mxu1 %v5675_v14  ;;  %v4862_v13 = vcombine.high %v6494_v11, %v6494_v11  ;;  %v5764_v14 = vld [vmem:[#allocation7 + $0x420] ss:$16 sps:$4 sm:$0xff]  }
  0xba   :  { %1755 = vmatprep.subr.bf16.mxu0 %v5680_v15  ;;  %1919 = vmatprep.subr.bf16.mxu1 %v5683_v16  ;;  %v5767_v15 = vld [vmem:[#allocation7 + $0x428] ss:$16 sps:$4 sm:$0xff]   ;;  %v5772_v16 = vld [vmem:[#allocation7 + $0x444] ss:$16 sps:$4 sm:$0xff]  }
  0xbd   :  { %1756 = vmatpush1.bf16.msra.mxu0 %v5678_v17  ;;  %1920 = vmatpush1.bf16.msra.mxu1 %v5681_v18  ;;  %v5775_v17 = vld [vmem:[#allocation7 + $0x44c] ss:$16 sps:$4 sm:$0xff]   ;;  %v5770_v18 = vld [vmem:[#allocation7 + $0x440] ss:$16 sps:$4 sm:$0xff]  }
  0xbe   :  { %1757 = vmatprep.subr.bf16.mxu0 %v5686_v19  ;;  %1921 = vmatprep.subr.bf16.mxu1 %v5689_v20  ;;  %v5773_v19 = vld [vmem:[#allocation7 + $0x448] ss:$16 sps:$4 sm:$0xff]   ;;  %v5778_v20 = vld [vmem:[#allocation7 + $0x464] ss:$16 sps:$4 sm:$0xff]  }
  0xc1   :  { %1758 = vmatpush1.bf16.msra.mxu0 %v5684_v21  ;;  %1922 = vmatpush1.bf16.msra.mxu1 %v5687_v22  ;;  %v5781_v21 = vld [vmem:[#allocation7 + $0x46c] ss:$16 sps:$4 sm:$0xff]   ;;  %v5776_v22 = vld [vmem:[#allocation7 + $0x460] ss:$16 sps:$4 sm:$0xff]  }
  0xc2   :  { %1759 = vmatprep.subr.bf16.mxu0 %v5692_v23  ;;  %1923 = vmatprep.subr.bf16.mxu1 %v5695_v24  ;;  %v5779_v23 = vld [vmem:[#allocation7 + $0x468] ss:$16 sps:$4 sm:$0xff]   ;;  %v5784_v24 = vld [vmem:[#allocation7 + $0x484] ss:$16 sps:$4 sm:$0xff]  }
  0xc5   :  { %1760 = vmatpush1.bf16.msra.mxu0 %v5690_v25  ;;  %1924 = vmatpush1.bf16.msra.mxu1 %v5693_v26  ;;  %v5787_v25 = vld [vmem:[#allocation7 + $0x48c] ss:$16 sps:$4 sm:$0xff]   ;;  %v5782_v26 = vld [vmem:[#allocation7 + $0x480] ss:$16 sps:$4 sm:$0xff]  }
  0xc6   :  { %1761 = vmatprep.subr.bf16.mxu0 %v5698_v27  ;;  %1925 = vmatprep.subr.bf16.mxu1 %v5701_v28  ;;  %v5785_v27 = vld [vmem:[#allocation7 + $0x488] ss:$16 sps:$4 sm:$0xff]   ;;  %v5790_v28 = vld [vmem:[#allocation7 + $0x4a4] ss:$16 sps:$4 sm:$0xff]  }
  0xc9   :  { %1762 = vmatpush1.bf16.msra.mxu0 %v5696_v31  ;;  %1926 = vmatpush1.bf16.msra.mxu1 %v5699_v32  ;;  %v5791_v31 = vld [vmem:[#allocation7 + $0x4a8] ss:$16 sps:$4 sm:$0xff]   ;;  %v5796_v32 = vld [vmem:[#allocation7 + $0x4c4] ss:$16 sps:$4 sm:$0xff]  }
  0xca   :  { %1763 = vmatprep.subr.bf16.mxu0 %v5704_v33  ;;  %1927 = vmatprep.subr.bf16.mxu1 %v5707_v34  ;;  %v5799_v33 = vld [vmem:[#allocation7 + $0x4cc] ss:$16 sps:$4 sm:$0xff]   ;;  %v5794_v34 = vld [vmem:[#allocation7 + $0x4c0] ss:$16 sps:$4 sm:$0xff]  }
  0xcd   :  { %1764 = vmatpush1.bf16.msra.mxu0 %v5702_v35  ;;  %1928 = vmatpush1.bf16.msra.mxu1 %v5705_v36  ;;  %v5797_v35 = vld [vmem:[#allocation7 + $0x4c8] ss:$16 sps:$4 sm:$0xff]   ;;  %v5802_v36 = vld [vmem:[#allocation7 + $0x4e4] ss:$16 sps:$4 sm:$0xff]  }
  0xce   :  { %1765 = vmatprep.subr.bf16.mxu0 %v5710_v37  ;;  %1929 = vmatprep.subr.bf16.mxu1 %v5713_v38  ;;  %v5805_v37 = vld [vmem:[#allocation7 + $0x4ec] ss:$16 sps:$4 sm:$0xff]   ;;  %v5800_v38 = vld [vmem:[#allocation7 + $0x4e0] ss:$16 sps:$4 sm:$0xff]  }
  0xd1   :  { %1766 = vmatpush1.bf16.msra.mxu0 %v5708_v39  ;;  %1930 = vmatpush1.bf16.msra.mxu1 %v5711_v40  ;;  %v5803_v39 = vld [vmem:[#allocation7 + $0x4e8] ss:$16 sps:$4 sm:$0xff]   ;;  %v5808_v40 = vld [vmem:[#allocation7 + $0x504] ss:$16 sps:$4 sm:$0xff]  }
  0xd2   :  { %1767 = vmatprep.subr.bf16.mxu0 %v5716_v41  ;;  %1931 = vmatprep.subr.bf16.mxu1 %v5719_v42  ;;  %v5811_v41 = vld [vmem:[#allocation7 + $0x50c] ss:$16 sps:$4 sm:$0xff]   ;;  %v5806_v42 = vld [vmem:[#allocation7 + $0x500] ss:$16 sps:$4 sm:$0xff]  }
  0xd5   :  { %1768 = vmatpush1.bf16.msra.mxu0 %v5714_v43  ;;  %1932 = vmatpush1.bf16.msra.mxu1 %v5717_v44  ;;  %v5809_v43 = vld [vmem:[#allocation7 + $0x508] ss:$16 sps:$4 sm:$0xff]   ;;  %v5814_v44 = vld [vmem:[#allocation7 + $0x524] ss:$16 sps:$4 sm:$0xff]  }
  0xd6   :  { %1769 = vmatprep.subr.bf16.mxu0 %v5722_v45  ;;  %1933 = vmatprep.subr.bf16.mxu1 %v5725_v46  ;;  %v5817_v45 = vld [vmem:[#allocation7 + $0x52c] ss:$16 sps:$4 sm:$0xff]   ;;  %v5812_v46 = vld [vmem:[#allocation7 + $0x520] ss:$16 sps:$4 sm:$0xff]  }
  0xd9   :  { %1770 = vmatpush1.bf16.msra.mxu0 %v5720_v47  ;;  %1934 = vmatpush1.bf16.msra.mxu1 %v5723_v48  ;;  %v5815_v47 = vld [vmem:[#allocation7 + $0x528] ss:$16 sps:$4 sm:$0xff]   ;;  %v5820_v48 = vld [vmem:[#allocation7 + $0x544] ss:$16 sps:$4 sm:$0xff]  }
  0xda   :  { %1771 = vmatprep.subr.bf16.mxu0 %v5728_v49  ;;  %1935 = vmatprep.subr.bf16.mxu1 %v5731_v50  ;;  %v5823_v49 = vld [vmem:[#allocation7 + $0x54c] ss:$16 sps:$4 sm:$0xff]   ;;  %v5818_v50 = vld [vmem:[#allocation7 + $0x540] ss:$16 sps:$4 sm:$0xff]  }
  0xdd   :  { %1772 = vmatpush1.bf16.msra.mxu0 %v5726_v51  ;;  %1936 = vmatpush1.bf16.msra.mxu1 %v5729_v52  ;;  %v5821_v51 = vld [vmem:[#allocation7 + $0x548] ss:$16 sps:$4 sm:$0xff]   ;;  %v5826_v52 = vld [vmem:[#allocation7 + $0x564] ss:$16 sps:$4 sm:$0xff]  }
  0xde   :  { %1773 = vmatprep.subr.bf16.mxu0 %v5734_v53  ;;  %1937 = vmatprep.subr.bf16.mxu1 %v5737_v54  ;;  %v5829_v53 = vld [vmem:[#allocation7 + $0x56c] ss:$16 sps:$4 sm:$0xff]   ;;  %v5824_v54 = vld [vmem:[#allocation7 + $0x560] ss:$16 sps:$4 sm:$0xff]  }
  0xe1   :  { %1774 = vmatpush1.bf16.msra.mxu0 %v5732_v55  ;;  %1938 = vmatpush1.bf16.msra.mxu1 %v5735_v56  ;;  %v5827_v55 = vld [vmem:[#allocation7 + $0x568] ss:$16 sps:$4 sm:$0xff]   ;;  %v5832_v56 = vld [vmem:[#allocation7 + $0x584] ss:$16 sps:$4 sm:$0xff]  }
  0xe2   :  { %1775 = vmatprep.subr.bf16.mxu0 %v5740_v57  ;;  %1939 = vmatprep.subr.bf16.mxu1 %v5743_v58  ;;  %v5835_v57 = vld [vmem:[#allocation7 + $0x58c] ss:$16 sps:$4 sm:$0xff]   ;;  %v5830_v58 = vld [vmem:[#allocation7 + $0x580] ss:$16 sps:$4 sm:$0xff]  }
  0xe5   :  { %1776 = vmatpush1.bf16.msra.mxu0 %v5738_v59  ;;  %1940 = vmatpush1.bf16.msra.mxu1 %v5741_v60  ;;  %v5833_v59 = vld [vmem:[#allocation7 + $0x588] ss:$16 sps:$4 sm:$0xff]   ;;  %v5838_v60 = vld [vmem:[#allocation7 + $0x5a4] ss:$16 sps:$4 sm:$0xff]  }
  0xe6   :  { %1777 = vmatprep.subr.bf16.mxu0 %v5746_v61  ;;  %1941 = vmatprep.subr.bf16.mxu1 %v5749_v62  ;;  %v5841_v61 = vld [vmem:[#allocation7 + $0x5ac] ss:$16 sps:$4 sm:$0xff]   ;;  %v5836_v62 = vld [vmem:[#allocation7 + $0x5a0] ss:$16 sps:$4 sm:$0xff]  }
  0xe9   :  { %1778 = vmatpush1.bf16.msra.mxu0 %v5744_v63  ;;  %1942 = vmatpush1.bf16.msra.mxu1 %v5747_v0  ;;  %v5839_v63 = vld [vmem:[#allocation7 + $0x5a8] ss:$16 sps:$4 sm:$0xff]   ;;  %v5844_v0 = vld [vmem:[#allocation7 + $0x5c4] ss:$16 sps:$4 sm:$0xff]  }
  0xea   :  { %1779 = vmatprep.subr.bf16.mxu0 %v5752_v1  ;;  %1943 = vmatprep.subr.bf16.mxu1 %v5755_v2  ;;  %v5847_v1 = vld [vmem:[#allocation7 + $0x5cc] ss:$16 sps:$4 sm:$0xff]   ;;  %v5842_v2 = vld [vmem:[#allocation7 + $0x5c0] ss:$16 sps:$4 sm:$0xff]  }
  0xed   :  { %1780 = vmatpush1.bf16.msra.mxu0 %v5750_v3  ;;  %1944 = vmatpush1.bf16.msra.mxu1 %v5753_v4  ;;  %v5845_v3 = vld [vmem:[#allocation7 + $0x5c8] ss:$16 sps:$4 sm:$0xff]   ;;  %v5850_v4 = vld [vmem:[#allocation7 + $0x5e4] ss:$16 sps:$4 sm:$0xff]  }
  0xee   :  { %1790 = vmatprep.subr.bf16.mxu0 %v5760_v5  ;;  %1954 = vmatprep.subr.bf16.mxu1 %v5763_v6  ;;  %v5853_v5 = vld [vmem:[#allocation7 + $0x5ec] ss:$16 sps:$4 sm:$0xff]   ;;  %v5848_v6 = vld [vmem:[#allocation7 + $0x5e0] ss:$16 sps:$4 sm:$0xff]  }
  0xf0   :  { %1782 = vmatmul.mubr.bf16.vlgmr.msra.gmra.mrb[0].mxu0 %v4859_v7  ;;  %1946 = vmatmul.mubr.bf16.vlgmr.msra.gmra.mrb[0].mxu1 %v4859_v7  ;;  %v5851_v7 = vld [vmem:[#allocation7 + $0x5e8] ss:$16 sps:$4 sm:$0xff]  }
  0xf1   :  { %1791 = vmatpush1.bf16.msra.mxu0 %v5758_v8  ;;  %1955 = vmatpush1.bf16.msra.mxu1 %v5761_v9  ;;  %v5858_v8 = vld [vmem:[#allocation7 + $0x604] ss:$16 sps:$4 sm:$0xff]   ;;  %v5861_v9 = vld [vmem:[#allocation7 + $0x60c] ss:$16 sps:$4 sm:$0xff]  }
  0xf2   :  { %1792 = vmatprep.subr.bf16.mxu0 %v5766_v10  ;;  %1956 = vmatprep.subr.bf16.mxu1 %v5769_v12  ;;  %v5856_v10 = vld [vmem:[#allocation7 + $0x600] ss:$16 sps:$4 sm:$0xff]   ;;  %v5859_v12 = vld [vmem:[#allocation7 + $0x608] ss:$16 sps:$4 sm:$0xff]  }
  0xf3   :  { %1822 = vmatprep.mubr.bf16.mxu0 %v4862_v13  ;;  %1986 = vmatprep.mubr.bf16.mxu1 %v4862_v13  ;;  %v6498_v13 = vld [vmem:[#allocation2 + $0x18] sm:$0xff] }
  0xf5   :  { %1793 = vmatpush1.bf16.msra.mxu0 %v5764_v14  ;;  %1957 = vmatpush1.bf16.msra.mxu1 %v5767_v15  ;;  %v4861_v14 = vcombine.low %v6494_v11, %v6494_v11  ;;  %v5864_v15 = vld [vmem:[#allocation7 + $0x624] ss:$16 sps:$4 sm:$0xff]   ;;  %v5868_v11 = vld [vmem:[#allocation7 + $0x640] ss:$16 sps:$4 sm:$0xff]  }
  0xf6   :  { %1794 = vmatprep.subr.bf16.mxu0 %v5772_v16  ;;  %1958 = vmatprep.subr.bf16.mxu1 %v5775_v17  ;;  %v5867_v16 = vld [vmem:[#allocation7 + $0x62c] ss:$16 sps:$4 sm:$0xff]   ;;  %v5862_v17 = vld [vmem:[#allocation7 + $0x620] ss:$16 sps:$4 sm:$0xff]  }
  0xf9   :  { %1795 = vmatpush1.bf16.msra.mxu0 %v5770_v18  ;;  %1959 = vmatpush1.bf16.msra.mxu1 %v5773_v19  ;;  %v5865_v18 = vld [vmem:[#allocation7 + $0x628] ss:$16 sps:$4 sm:$0xff]   ;;  %v4864_v19 = vcombine.high %v6498_v13, %v6498_v13 }
  0xfa   :  { %1796 = vmatprep.subr.bf16.mxu0 %v5778_v20  ;;  %1960 = vmatprep.subr.bf16.mxu1 %v5781_v21  ;;  %v5870_v20 = vld [vmem:[#allocation7 + $0x644] ss:$16 sps:$4 sm:$0xff]   ;;  %v5873_v21 = vld [vmem:[#allocation7 + $0x64c] ss:$16 sps:$4 sm:$0xff]  }
  0xfd   :  { %1797 = vmatpush1.bf16.msra.mxu0 %v5776_v22  ;;  %1961 = vmatpush1.bf16.msra.mxu1 %v5779_v23  ;;  %v5871_v22 = vld [vmem:[#allocation7 + $0x648] ss:$16 sps:$4 sm:$0xff]   ;;  %v5876_v23 = vld [vmem:[#allocation7 + $0x664] ss:$16 sps:$4 sm:$0xff]  }
  0xfe   :  { %1798 = vmatprep.subr.bf16.mxu0 %v5784_v24  ;;  %1962 = vmatprep.subr.bf16.mxu1 %v5787_v25  ;;  %v5879_v24 = vld [vmem:[#allocation7 + $0x66c] ss:$16 sps:$4 sm:$0xff]   ;;  %v5874_v25 = vld [vmem:[#allocation7 + $0x660] ss:$16 sps:$4 sm:$0xff]  }
 0x101   :  { %1799 = vmatpush1.bf16.msra.mxu0 %v5782_v26  ;;  %1963 = vmatpush1.bf16.msra.mxu1 %v5785_v27  ;;  %v5877_v26 = vld [vmem:[#allocation7 + $0x668] ss:$16 sps:$4 sm:$0xff]   ;;  %v5882_v27 = vld [vmem:[#allocation7 + $0x684] ss:$16 sps:$4 sm:$0xff]  }
 0x102   :  { %1800 = vmatprep.subr.bf16.mxu0 %v5790_v28  ;;  %1964 = vmatprep.subr.bf16.mxu1 %v5793_v29  ;;  %v5885_v28 = vld [vmem:[#allocation7 + $0x68c] ss:$16 sps:$4 sm:$0xff]   ;;  %v5880_v29 = vld [vmem:[#allocation7 + $0x680] ss:$16 sps:$4 sm:$0xff]  }
 0x105   :  { %1801 = vmatpush1.bf16.msra.mxu0 %v5788_v30  ;;  %1965 = vmatpush1.bf16.msra.mxu1 %v5791_v31  ;;  %v5883_v30 = vld [vmem:[#allocation7 + $0x688] ss:$16 sps:$4 sm:$0xff]   ;;  %v5888_v31 = vld [vmem:[#allocation7 + $0x6a4] ss:$16 sps:$4 sm:$0xff]  }
 0x106   :  { %1802 = vmatprep.subr.bf16.mxu0 %v5796_v32  ;;  %1966 = vmatprep.subr.bf16.mxu1 %v5799_v33  ;;  %v5891_v32 = vld [vmem:[#allocation7 + $0x6ac] ss:$16 sps:$4 sm:$0xff]   ;;  %v5886_v33 = vld [vmem:[#allocation7 + $0x6a0] ss:$16 sps:$4 sm:$0xff]  }
 0x109   :  { %1803 = vmatpush1.bf16.msra.mxu0 %v5794_v34  ;;  %1967 = vmatpush1.bf16.msra.mxu1 %v5797_v35  ;;  %v5889_v34 = vld [vmem:[#allocation7 + $0x6a8] ss:$16 sps:$4 sm:$0xff]   ;;  %v5894_v35 = vld [vmem:[#allocation7 + $0x6c4] ss:$16 sps:$4 sm:$0xff]  }
 0x10a   :  { %1804 = vmatprep.subr.bf16.mxu0 %v5802_v36  ;;  %1968 = vmatprep.subr.bf16.mxu1 %v5805_v37  ;;  %v5897_v36 = vld [vmem:[#allocation7 + $0x6cc] ss:$16 sps:$4 sm:$0xff]   ;;  %v5892_v37 = vld [vmem:[#allocation7 + $0x6c0] ss:$16 sps:$4 sm:$0xff]  }
 0x10d   :  { %1805 = vmatpush1.bf16.msra.mxu0 %v5800_v38  ;;  %1969 = vmatpush1.bf16.msra.mxu1 %v5803_v39  ;;  %v5895_v38 = vld [vmem:[#allocation7 + $0x6c8] ss:$16 sps:$4 sm:$0xff]   ;;  %v5900_v39 = vld [vmem:[#allocation7 + $0x6e4] ss:$16 sps:$4 sm:$0xff]  }
 0x10e   :  { %1806 = vmatprep.subr.bf16.mxu0 %v5808_v40  ;;  %1970 = vmatprep.subr.bf16.mxu1 %v5811_v41  ;;  %v5903_v40 = vld [vmem:[#allocation7 + $0x6ec] ss:$16 sps:$4 sm:$0xff]   ;;  %v5898_v41 = vld [vmem:[#allocation7 + $0x6e0] ss:$16 sps:$4 sm:$0xff]  }
 0x111   :  { %1807 = vmatpush1.bf16.msra.mxu0 %v5806_v42  ;;  %1971 = vmatpush1.bf16.msra.mxu1 %v5809_v43  ;;  %v5901_v42 = vld [vmem:[#allocation7 + $0x6e8] ss:$16 sps:$4 sm:$0xff]   ;;  %v5906_v43 = vld [vmem:[#allocation7 + $0x704] ss:$16 sps:$4 sm:$0xff]  }
 0x112   :  { %1808 = vmatprep.subr.bf16.mxu0 %v5814_v44  ;;  %1972 = vmatprep.subr.bf16.mxu1 %v5817_v45  ;;  %v5909_v44 = vld [vmem:[#allocation7 + $0x70c] ss:$16 sps:$4 sm:$0xff]   ;;  %v5904_v45 = vld [vmem:[#allocation7 + $0x700] ss:$16 sps:$4 sm:$0xff]  }
 0x115   :  { %1809 = vmatpush1.bf16.msra.mxu0 %v5812_v46  ;;  %1973 = vmatpush1.bf16.msra.mxu1 %v5815_v47  ;;  %v5907_v46 = vld [vmem:[#allocation7 + $0x708] ss:$16 sps:$4 sm:$0xff]   ;;  %v5912_v47 = vld [vmem:[#allocation7 + $0x724] ss:$16 sps:$4 sm:$0xff]  }
 0x116   :  { %1810 = vmatprep.subr.bf16.mxu0 %v5820_v48  ;;  %1974 = vmatprep.subr.bf16.mxu1 %v5823_v49  ;;  %v5915_v48 = vld [vmem:[#allocation7 + $0x72c] ss:$16 sps:$4 sm:$0xff]   ;;  %v5910_v49 = vld [vmem:[#allocation7 + $0x720] ss:$16 sps:$4 sm:$0xff]  }
 0x119   :  { %1811 = vmatpush1.bf16.msra.mxu0 %v5818_v50  ;;  %1975 = vmatpush1.bf16.msra.mxu1 %v5821_v51  ;;  %v5913_v50 = vld [vmem:[#allocation7 + $0x728] ss:$16 sps:$4 sm:$0xff]   ;;  %v5918_v51 = vld [vmem:[#allocation7 + $0x744] ss:$16 sps:$4 sm:$0xff]  }
 0x11a   :  { %1812 = vmatprep.subr.bf16.mxu0 %v5826_v52  ;;  %1976 = vmatprep.subr.bf16.mxu1 %v5829_v53  ;;  %v5921_v52 = vld [vmem:[#allocation7 + $0x74c] ss:$16 sps:$4 sm:$0xff]   ;;  %v5916_v53 = vld [vmem:[#allocation7 + $0x740] ss:$16 sps:$4 sm:$0xff]  }
 0x11d   :  { %1813 = vmatpush1.bf16.msra.mxu0 %v5824_v54  ;;  %1977 = vmatpush1.bf16.msra.mxu1 %v5827_v55  ;;  %v5919_v54 = vld [vmem:[#allocation7 + $0x748] ss:$16 sps:$4 sm:$0xff]   ;;  %v5924_v55 = vld [vmem:[#allocation7 + $0x764] ss:$16 sps:$4 sm:$0xff]  }
 0x11e   :  { %1814 = vmatprep.subr.bf16.mxu0 %v5832_v56  ;;  %1978 = vmatprep.subr.bf16.mxu1 %v5835_v57  ;;  %v5927_v56 = vld [vmem:[#allocation7 + $0x76c] ss:$16 sps:$4 sm:$0xff]   ;;  %v5922_v57 = vld [vmem:[#allocation7 + $0x760] ss:$16 sps:$4 sm:$0xff]  }
 0x121   :  { %1815 = vmatpush1.bf16.msra.mxu0 %v5830_v58  ;;  %1979 = vmatpush1.bf16.msra.mxu1 %v5833_v59  ;;  %v5925_v58 = vld [vmem:[#allocation7 + $0x768] ss:$16 sps:$4 sm:$0xff]   ;;  %v5930_v59 = vld [vmem:[#allocation7 + $0x784] ss:$16 sps:$4 sm:$0xff]  }
 0x122   :  { %1816 = vmatprep.subr.bf16.mxu0 %v5838_v60  ;;  %1980 = vmatprep.subr.bf16.mxu1 %v5841_v61  ;;  %v5933_v60 = vld [vmem:[#allocation7 + $0x78c] ss:$16 sps:$4 sm:$0xff]   ;;  %v5928_v61 = vld [vmem:[#allocation7 + $0x780] ss:$16 sps:$4 sm:$0xff]  }
 0x125   :  { %1817 = vmatpush1.bf16.msra.mxu0 %v5836_v62  ;;  %1981 = vmatpush1.bf16.msra.mxu1 %v5839_v63  ;;  %v5931_v62 = vld [vmem:[#allocation7 + $0x788] ss:$16 sps:$4 sm:$0xff]   ;;  %v5936_v63 = vld [vmem:[#allocation7 + $0x7a4] ss:$16 sps:$4 sm:$0xff]  }
 0x126   :  { %1818 = vmatprep.subr.bf16.mxu0 %v5844_v0  ;;  %1982 = vmatprep.subr.bf16.mxu1 %v5847_v1  ;;  %v5939_v0 = vld [vmem:[#allocation7 + $0x7ac] ss:$16 sps:$4 sm:$0xff]   ;;  %v5934_v1 = vld [vmem:[#allocation7 + $0x7a0] ss:$16 sps:$4 sm:$0xff]  }
 0x129   :  { %1819 = vmatpush1.bf16.msra.mxu0 %v5842_v2  ;;  %1983 = vmatpush1.bf16.msra.mxu1 %v5845_v3  ;;  %v5937_v2 = vld [vmem:[#allocation7 + $0x7a8] ss:$16 sps:$4 sm:$0xff]   ;;  %v5942_v3 = vld [vmem:[#allocation7 + $0x7c4] ss:$16 sps:$4 sm:$0xff]  }
 0x12a   :  { %1820 = vmatprep.subr.bf16.mxu0 %v5850_v4  ;;  %1984 = vmatprep.subr.bf16.mxu1 %v5853_v5  ;;  %v5945_v4 = vld [vmem:[#allocation7 + $0x7cc] ss:$16 sps:$4 sm:$0xff]   ;;  %v5940_v5 = vld [vmem:[#allocation7 + $0x7c0] ss:$16 sps:$4 sm:$0xff]  }
 0x12d   :  { %1821 = vmatpush1.bf16.msra.mxu0 %v5848_v6  ;;  %1985 = vmatpush1.bf16.msra.mxu1 %v5851_v7  ;;  %v5943_v6 = vld [vmem:[#allocation7 + $0x7c8] ss:$16 sps:$4 sm:$0xff]   ;;  %v5948_v7 = vld [vmem:[#allocation7 + $0x7e4] ss:$16 sps:$4 sm:$0xff]  }
 0x12e   :  { %1831 = vmatprep.subr.bf16.mxu0 %v5858_v8  ;;  %1995 = vmatprep.subr.bf16.mxu1 %v5861_v9  ;;  %v5951_v8 = vld [vmem:[#allocation7 + $0x7ec] ss:$16 sps:$4 sm:$0xff]   ;;  %v5946_v9 = vld [vmem:[#allocation7 + $0x7e0] ss:$16 sps:$4 sm:$0xff]  }
 0x130   :  { %1823 = vmatmul.mubr.bf16.vlgmr.msra.gmra.mrb[0].mxu0 %v4861_v14  ;;  %1987 = vmatmul.mubr.bf16.vlgmr.msra.gmra.mrb[0].mxu1 %v4861_v14  ;;  %v4863_v14 = vcombine.low %v6498_v13, %v6498_v13  ;;  %v5966_v13 = vld [vmem:[#allocation8 + $0x40] ss:$8 sps:$4 sm:$0xff]  }
 0x131   :  { %1832 = vmatpush1.bf16.msra.mxu0 %v5856_v10  ;;  %1996 = vmatpush1.bf16.msra.mxu1 %v5859_v12  ;;  %v5949_v10 = vld [vmem:[#allocation7 + $0x7e8] ss:$16 sps:$4 sm:$0xff]   ;;  %v5956_v12 = vld [vmem:[#allocation8 + $0x4] ss:$8 sps:$4 sm:$0xff]  }
 0x132   :  { %1833 = vmatprep.subr.bf16.mxu0 %v5864_v15  ;;  %1997 = vmatprep.subr.bf16.mxu1 %v5867_v16  ;;  %v5954_v15 = vld [vmem:[#allocation8] ss:$8 sps:$4 sm:$0xff]   ;;  %v5959_v16 = vld [vmem:[#allocation8 + $0x14] ss:$8 sps:$4 sm:$0xff]  }
 0x133   :  { %1863 = vmatprep.mubr.bf16.mxu0 %v4864_v19  ;;  %2027 = vmatprep.mubr.bf16.mxu1 %v4864_v19  ;;  %v5960_v19 = vld [vmem:[#allocation8 + $0x20] ss:$8 sps:$4 sm:$0xff]  }
 0x135   :  { %1834 = vmatpush1.bf16.msra.mxu0 %v5862_v17  ;;  %1998 = vmatpush1.bf16.msra.mxu1 %v5865_v18  ;;  %v5957_v17 = vld [vmem:[#allocation8 + $0x10] ss:$8 sps:$4 sm:$0xff]   ;;  %v5962_v18 = vld [vmem:[#allocation8 + $0x24] ss:$8 sps:$4 sm:$0xff]  }
 0x136   :  { %1835 = vmatprep.subr.bf16.mxu0 %v5870_v20  ;;  %1999 = vmatprep.subr.bf16.mxu1 %v5873_v21  ;;  %v5965_v20 = vld [vmem:[#allocation8 + $0x34] ss:$8 sps:$4 sm:$0xff]   ;;  %v5963_v21 = vld [vmem:[#allocation8 + $0x30] ss:$8 sps:$4 sm:$0xff]  }
 0x139   :  { %1836 = vmatpush1.bf16.msra.mxu0 %v5868_v11  ;;  %2000 = vmatpush1.bf16.msra.mxu1 %v5871_v22  ;;  %v5968_v11 = vld [vmem:[#allocation8 + $0x44] ss:$8 sps:$4 sm:$0xff]   ;;  %v5971_v22 = vld [vmem:[#allocation8 + $0x54] ss:$8 sps:$4 sm:$0xff]  }
 0x13a   :  { %1837 = vmatprep.subr.bf16.mxu0 %v5876_v23  ;;  %2001 = vmatprep.subr.bf16.mxu1 %v5879_v24  ;;  %v5969_v23 = vld [vmem:[#allocation8 + $0x50] ss:$8 sps:$4 sm:$0xff]   ;;  %v5974_v24 = vld [vmem:[#allocation8 + $0x64] ss:$8 sps:$4 sm:$0xff]  }
 0x13d   :  { %1838 = vmatpush1.bf16.msra.mxu0 %v5874_v25  ;;  %2002 = vmatpush1.bf16.msra.mxu1 %v5877_v26  ;;  %v5972_v25 = vld [vmem:[#allocation8 + $0x60] ss:$8 sps:$4 sm:$0xff]   ;;  %v5977_v26 = vld [vmem:[#allocation8 + $0x74] ss:$8 sps:$4 sm:$0xff]  }
 0x13e   :  { %1839 = vmatprep.subr.bf16.mxu0 %v5882_v27  ;;  %2003 = vmatprep.subr.bf16.mxu1 %v5885_v28  ;;  %v5975_v27 = vld [vmem:[#allocation8 + $0x70] ss:$8 sps:$4 sm:$0xff]   ;;  %v5980_v28 = vld [vmem:[#allocation8 + $0x84] ss:$8 sps:$4 sm:$0xff]  }
 0x141   :  { %1840 = vmatpush1.bf16.msra.mxu0 %v5880_v29  ;;  %2004 = vmatpush1.bf16.msra.mxu1 %v5883_v30  ;;  %v5978_v29 = vld [vmem:[#allocation8 + $0x80] ss:$8 sps:$4 sm:$0xff]   ;;  %v5983_v30 = vld [vmem:[#allocation8 + $0x94] ss:$8 sps:$4 sm:$0xff]  }
 0x142   :  { %1841 = vmatprep.subr.bf16.mxu0 %v5888_v31  ;;  %2005 = vmatprep.subr.bf16.mxu1 %v5891_v32  ;;  %v5981_v31 = vld [vmem:[#allocation8 + $0x90] ss:$8 sps:$4 sm:$0xff]   ;;  %v5986_v32 = vld [vmem:[#allocation8 + $0xa4] ss:$8 sps:$4 sm:$0xff]  }
 0x145   :  { %1842 = vmatpush1.bf16.msra.mxu0 %v5886_v33  ;;  %2006 = vmatpush1.bf16.msra.mxu1 %v5889_v34  ;;  %v5984_v33 = vld [vmem:[#allocation8 + $0xa0] ss:$8 sps:$4 sm:$0xff]   ;;  %v5989_v34 = vld [vmem:[#allocation8 + $0xb4] ss:$8 sps:$4 sm:$0xff]  }
 0x146   :  { %1843 = vmatprep.subr.bf16.mxu0 %v5894_v35  ;;  %2007 = vmatprep.subr.bf16.mxu1 %v5897_v36  ;;  %v5987_v35 = vld [vmem:[#allocation8 + $0xb0] ss:$8 sps:$4 sm:$0xff]   ;;  %v5992_v36 = vld [vmem:[#allocation8 + $0xc4] ss:$8 sps:$4 sm:$0xff]  }
 0x149   :  { %1844 = vmatpush1.bf16.msra.mxu0 %v5892_v37  ;;  %2008 = vmatpush1.bf16.msra.mxu1 %v5895_v38  ;;  %v5990_v37 = vld [vmem:[#allocation8 + $0xc0] ss:$8 sps:$4 sm:$0xff]   ;;  %v5995_v38 = vld [vmem:[#allocation8 + $0xd4] ss:$8 sps:$4 sm:$0xff]  }
 0x14a   :  { %1845 = vmatprep.subr.bf16.mxu0 %v5900_v39  ;;  %2009 = vmatprep.subr.bf16.mxu1 %v5903_v40  ;;  %v5993_v39 = vld [vmem:[#allocation8 + $0xd0] ss:$8 sps:$4 sm:$0xff]   ;;  %v5998_v40 = vld [vmem:[#allocation8 + $0xe4] ss:$8 sps:$4 sm:$0xff]  }
 0x14d   :  { %1846 = vmatpush1.bf16.msra.mxu0 %v5898_v41  ;;  %2010 = vmatpush1.bf16.msra.mxu1 %v5901_v42  ;;  %v5996_v41 = vld [vmem:[#allocation8 + $0xe0] ss:$8 sps:$4 sm:$0xff]   ;;  %v6001_v42 = vld [vmem:[#allocation8 + $0xf4] ss:$8 sps:$4 sm:$0xff]  }
 0x14e   :  { %1847 = vmatprep.subr.bf16.mxu0 %v5906_v43  ;;  %2011 = vmatprep.subr.bf16.mxu1 %v5909_v44  ;;  %v5999_v43 = vld [vmem:[#allocation8 + $0xf0] ss:$8 sps:$4 sm:$0xff]   ;;  %v6004_v44 = vld [vmem:[#allocation8 + $0x104] ss:$8 sps:$4 sm:$0xff]  }
 0x151   :  { %1848 = vmatpush1.bf16.msra.mxu0 %v5904_v45  ;;  %2012 = vmatpush1.bf16.msra.mxu1 %v5907_v46  ;;  %v6050_v45 = vld [vmem:[#allocation10] ss:$16 sps:$4 sm:$0xff]   ;;  %v6052_v46 = vld [vmem:[#allocation10 + $0x4] ss:$16 sps:$4 sm:$0xff]  }
 0x152   :  { %1849 = vmatprep.subr.bf16.mxu0 %v5912_v47  ;;  %2013 = vmatprep.subr.bf16.mxu1 %v5915_v48  ;;  %v6055_v47 = vld [vmem:[#allocation10 + $0x24] ss:$16 sps:$4 sm:$0xff]   ;;  %v6053_v48 = vld [vmem:[#allocation10 + $0x20] ss:$16 sps:$4 sm:$0xff]  }
 0x155   :  { %1850 = vmatpush1.bf16.msra.mxu0 %v5910_v49  ;;  %2014 = vmatpush1.bf16.msra.mxu1 %v5913_v50  ;;  %v380_v49 = vlaneseq }
 0x156   :  { %1851 = vmatprep.subr.bf16.mxu0 %v5918_v51  ;;  %2015 = vmatprep.subr.bf16.mxu1 %v5921_v52  ;;  %v6514_v52 = vld [vmem:[%s6631_s3] sm:$0xf] }
 0x157   :  { %v6506_v50 = vshrl.u32 %v380_v49, 7  ;;  %v6061_v49 = vld [vmem:[#allocation10 + $0x64] ss:$16 sps:$4 sm:$0xff]  }
 0x159   :  { %1852 = vmatpush1.bf16.msra.mxu0 %v5916_v53  ;;  %2016 = vmatpush1.bf16.msra.mxu1 %v5919_v54  ;;  %v6509_v51 = vsub.s32 0, %v6506_v50  ;;  %v6517_v53 = vsub.s32 1, %v6506_v50  ;;  %v6520_v54 = vsub.s32 3, %v6506_v50 }
 0x15a   :  { %1853 = vmatprep.subr.bf16.mxu0 %v5924_v55  ;;  %2017 = vmatprep.subr.bf16.mxu1 %v5927_v56 }
 0x15b   :  { %v383_v55 = vrot.slane %v6514_v52, %v6509_v51  ;;  %v387_v56 = vrot.slane %v6514_v52, %v6517_v53 }
 0x15d   :  { %1854 = vmatpush1.bf16.msra.mxu0 %v5922_v57  ;;  %2018 = vmatpush1.bf16.msra.mxu1 %v5925_v58  ;;  %v395_v57 = vrot.slane %v6514_v52, %v6520_v54 }
 0x15e   :  { %1855 = vmatprep.subr.bf16.mxu0 %v5930_v59  ;;  %2019 = vmatprep.subr.bf16.mxu1 %v5933_v60 }
 0x161   :  { %1856 = vmatpush1.bf16.msra.mxu0 %v5928_v61  ;;  %2020 = vmatpush1.bf16.msra.mxu1 %v5931_v62 }
 0x162   :  { %1857 = vmatprep.subr.bf16.mxu0 %v5936_v63  ;;  %2021 = vmatprep.subr.bf16.mxu1 %v5939_v0 }
 0x165   :  { %1858 = vmatpush1.bf16.msra.mxu0 %v5934_v1  ;;  %2022 = vmatpush1.bf16.msra.mxu1 %v5937_v2 }
 0x166   :  { %1859 = vmatprep.subr.bf16.mxu0 %v5942_v3  ;;  %2023 = vmatprep.subr.bf16.mxu1 %v5945_v4 }
 0x169   :  { %1860 = vmatpush1.bf16.msra.mxu0 %v5940_v5  ;;  %2024 = vmatpush1.bf16.msra.mxu1 %v5943_v6 }
 0x16a   :  { %1861 = vmatprep.subr.bf16.mxu0 %v5948_v7  ;;  %2025 = vmatprep.subr.bf16.mxu1 %v5951_v8 }
 0x16d   :  { %1862 = vmatpush1.bf16.msra.mxu0 %v5946_v9  ;;  %2026 = vmatpush1.bf16.msra.mxu1 %v5949_v10  ;;  %v6002_v9 = vld [vmem:[#allocation8 + $0x100] ss:$8 sps:$4 sm:$0xff]  }
 0x16e   :  { %2440 = vmatprep.subr.bf16.mxu0 %v5956_v12  ;;  %2743 = vmatprep.subr.bf16.mxu1 %v6052_v46  ;;  %v6007_v12 = vld [vmem:[#allocation8 + $0x114] ss:$8 sps:$4 sm:$0xff]  }
 0x170   :  { %1864 = vmatmul.mubr.bf16.vlgmr.msra.gmra.mrb[0].mxu0 %v4863_v14  ;;  %2028 = vmatmul.mubr.bf16.vlgmr.msra.gmra.mrb[0].mxu1 %v4863_v14 }
 0x171   :  { %2441 = vmatpush1.bf16.msra.mxu0 %v5954_v15  ;;  %2744 = vmatpush1.bf16.msra.mxu1 %v6050_v45  ;;  %v6005_v15 = vld [vmem:[#allocation8 + $0x110] ss:$8 sps:$4 sm:$0xff]  }
 0x172   :  { %2442 = vmatprep.subr.bf16.mxu0 %v5959_v16  ;;  %2745 = vmatprep.subr.bf16.mxu1 %v6055_v47  ;;  %v6010_v16 = vld [vmem:[#allocation8 + $0x124] ss:$8 sps:$4 sm:$0xff]  }
 0x173   :  { %v6058_v47 = vld [vmem:[#allocation10 + $0x44] ss:$16 sps:$4 sm:$0xff]  }
 0x175   :  { %2443 = vmatpush1.bf16.msra.mxu0 %v5957_v17  ;;  %2746 = vmatpush1.bf16.msra.mxu1 %v6053_v48  ;;  %v6008_v17 = vld [vmem:[#allocation8 + $0x120] ss:$8 sps:$4 sm:$0xff]  }
 0x176   :  { %2444 = vmatprep.subr.bf16.mxu0 %v5962_v18  ;;  %v6013_v18 = vld [vmem:[#allocation8 + $0x134] ss:$8 sps:$4 sm:$0xff]   ;;  %v6056_v48 = vld [vmem:[#allocation10 + $0x40] ss:$16 sps:$4 sm:$0xff]   ;;  %2747 = vmatprep.subr.bf16.mxu1 %v6058_v47  ;;  %v2926_v47 = vld [vmem:[#allocation11 + $0x2e8] sm:$0xff] }
 0x179   :  { %2445 = vmatpush1.bf16.msra.mxu0 %v5960_v19  ;;  %v6011_v19 = vld [vmem:[#allocation8 + $0x130] ss:$8 sps:$4 sm:$0xff]   ;;  %2748 = vmatpush1.bf16.msra.mxu1 %v6056_v48 }
 0x17a   :  { %2446 = vmatprep.subr.bf16.mxu0 %v5965_v20  ;;  %v6016_v20 = vld [vmem:[#allocation8 + $0x144] ss:$8 sps:$4 sm:$0xff]   ;;  %2749 = vmatprep.subr.bf16.mxu1 %v6061_v49 }
 0x17d   :  { %2447 = vmatpush1.bf16.msra.mxu0 %v5963_v21  ;;  %v6014_v21 = vld [vmem:[#allocation8 + $0x140] ss:$8 sps:$4 sm:$0xff]  }
 0x17e   :  { %2448 = vmatprep.subr.bf16.mxu0 %v5968_v11  ;;  %v6019_v11 = vld [vmem:[#allocation8 + $0x154] ss:$8 sps:$4 sm:$0xff]  }
 0x181   :  { %2449 = vmatpush1.bf16.msra.mxu0 %v5966_v13  ;;  %v6017_v13 = vld [vmem:[#allocation8 + $0x150] ss:$8 sps:$4 sm:$0xff]  }
 0x182   :  { %2450 = vmatprep.subr.bf16.mxu0 %v5971_v22  ;;  %v6022_v22 = vld [vmem:[#allocation8 + $0x164] ss:$8 sps:$4 sm:$0xff]  }
 0x185   :  { %2451 = vmatpush1.bf16.msra.mxu0 %v5969_v23  ;;  %v6020_v23 = vld [vmem:[#allocation8 + $0x160] ss:$8 sps:$4 sm:$0xff]  }
 0x186   :  { %2452 = vmatprep.subr.bf16.mxu0 %v5974_v24  ;;  %v6025_v24 = vld [vmem:[#allocation8 + $0x174] ss:$8 sps:$4 sm:$0xff]  }
 0x189   :  { %2453 = vmatpush1.bf16.msra.mxu0 %v5972_v25  ;;  %v6023_v25 = vld [vmem:[#allocation8 + $0x170] ss:$8 sps:$4 sm:$0xff]  }
 0x18a   :  { %2454 = vmatprep.subr.bf16.mxu0 %v5977_v26  ;;  %v6028_v26 = vld [vmem:[#allocation8 + $0x184] ss:$8 sps:$4 sm:$0xff]  }
 0x18d   :  { %2455 = vmatpush1.bf16.msra.mxu0 %v5975_v27  ;;  %v6026_v27 = vld [vmem:[#allocation8 + $0x180] ss:$8 sps:$4 sm:$0xff]  }
 0x18e   :  { %2456 = vmatprep.subr.bf16.mxu0 %v5980_v28  ;;  %v6031_v28 = vld [vmem:[#allocation8 + $0x194] ss:$8 sps:$4 sm:$0xff]  }
 0x191   :  { %2457 = vmatpush1.bf16.msra.mxu0 %v5978_v29  ;;  %v6029_v29 = vld [vmem:[#allocation8 + $0x190] ss:$8 sps:$4 sm:$0xff]  }
 0x192   :  { %2458 = vmatprep.subr.bf16.mxu0 %v5983_v30  ;;  %v6034_v30 = vld [vmem:[#allocation8 + $0x1a4] ss:$8 sps:$4 sm:$0xff]  }
 0x195   :  { %2459 = vmatpush1.bf16.msra.mxu0 %v5981_v31  ;;  %v6032_v31 = vld [vmem:[#allocation8 + $0x1a0] ss:$8 sps:$4 sm:$0xff]  }
 0x196   :  { %2460 = vmatprep.subr.bf16.mxu0 %v5986_v32  ;;  %v6037_v32 = vld [vmem:[#allocation8 + $0x1b4] ss:$8 sps:$4 sm:$0xff]  }
 0x199   :  { %2461 = vmatpush1.bf16.msra.mxu0 %v5984_v33  ;;  %v6035_v33 = vld [vmem:[#allocation8 + $0x1b0] ss:$8 sps:$4 sm:$0xff]  }
 0x19a   :  { %2462 = vmatprep.subr.bf16.mxu0 %v5989_v34  ;;  %v6040_v34 = vld [vmem:[#allocation8 + $0x1c4] ss:$8 sps:$4 sm:$0xff]  }
 0x19d   :  { %2463 = vmatpush1.bf16.msra.mxu0 %v5987_v35  ;;  %v6038_v35 = vld [vmem:[#allocation8 + $0x1c0] ss:$8 sps:$4 sm:$0xff]  }
 0x19e   :  { %2464 = vmatprep.subr.bf16.mxu0 %v5992_v36  ;;  %v6531_v36 = vsub.s32 2, %v6506_v50 }
 0x1a1   :  { %2465 = vmatpush1.bf16.msra.mxu0 %v5990_v37  ;;  %v6043_v37 = vld [vmem:[#allocation8 + $0x1d4] ss:$8 sps:$4 sm:$0xff]  }
 0x1a2   :  { %2466 = vmatprep.subr.bf16.mxu0 %v5995_v38  ;;  %v6041_v38 = vld [vmem:[#allocation8 + $0x1d0] ss:$8 sps:$4 sm:$0xff]  }
 0x1a5   :  { %2467 = vmatpush1.bf16.msra.mxu0 %v5993_v39  ;;  %v391_v39 = vrot.slane %v6514_v52, %v6531_v36  ;;  %v6059_v52 = vld [vmem:[#allocation10 + $0x60] ss:$16 sps:$4 sm:$0xff]  }
 0x1a6   :  { %2468 = vmatprep.subr.bf16.mxu0 %v5998_v40  ;;  %v6046_v40 = vld [vmem:[#allocation8 + $0x1e4] ss:$8 sps:$4 sm:$0xff]   ;;  %2750 = vmatpush1.bf16.msra.mxu1 %v6059_v52 }
 0x1a7   :  { %v2930_v52 = vld [vmem:[#allocation11 + $0x308] sm:$0xff] }
 0x1a9   :  { %2469 = vmatpush1.bf16.msra.mxu0 %v5996_v41  ;;  %v6044_v41 = vld [vmem:[#allocation8 + $0x1e0] ss:$8 sps:$4 sm:$0xff]  }
 0x1aa   :  { %2470 = vmatprep.subr.bf16.mxu0 %v6001_v42 }
 0x1ad   :  { %2471 = vmatpush1.bf16.msra.mxu0 %v5999_v43  ;;  %v6049_v43 = vld [vmem:[#allocation8 + $0x1f4] ss:$8 sps:$4 sm:$0xff]  }
 0x1ae   :  { %2481 = vmatprep.subr.bf16.mxu0 %v6004_v44  ;;  %v6047_v44 = vld [vmem:[#allocation8 + $0x1f0] ss:$8 sps:$4 sm:$0xff]  }
 0x243   :  { %v1865_v58 = vpop.f32.mrb[0].mxu0  ;;  %v6528_v59 = vpop.f32.mrb[0].mxu1 }
 0x244   :  { %v5489_v60 = vadd.f32 %v1865_v58, %v383_v55  ;;  %v1867_v61 = vpop.f32.mrb[1].mxu0  ;;  %v2031_v62 = vpop.f32.mrb[1].mxu1  ;;  %v5491_v42 = vadd.f32 %v6528_v59, %v391_v39  ;;  %v6064_v55 = vld [vmem:[#allocation10 + $0x84] ss:$16 sps:$4 sm:$0xff]   ;;  %v6065_v58 = vld [vmem:[#allocation10 + $0xa0] ss:$16 sps:$4 sm:$0xff]  }
 0x245   :  { %v5490_v63 = vadd.f32 %v1867_v61, %v387_v56  ;;  %v5492_v0 = vadd.f32 %v2031_v62, %v395_v57  ;;  %v1869_v1 = vpop.f32.mrb[2].mxu0  ;;  %v2033_v2 = vpop.f32.mrb[2].mxu1  ;;  %v6062_v56 = vld [vmem:[#allocation10 + $0x80] ss:$16 sps:$4 sm:$0xff]   ;;  %2751 = vmatprep.subr.bf16.mxu1 %v6064_v55  ;;  %v6067_v57 = vld [vmem:[#allocation10 + $0xa4] ss:$16 sps:$4 sm:$0xff]  }
 0x246   :  { %v2036_v3 = vmax.f32 %v5489_v60, 0.0  ;;  %v1870_v4 = vpop.f32.mrb[3].mxu0  ;;  %v2034_v5 = vpop.f32.mrb[3].mxu1  ;;  %v2038_v45 = vmax.f32 %v5491_v42, 0.0  ;;  %2752 = vmatpush1.bf16.msra.mxu1 %v6062_v56  ;;  %v6070_v59 = vld [vmem:[#allocation10 + $0xc4] ss:$16 sps:$4 sm:$0xff]  }
 0x247   :  { %v2037_v6 = vmax.f32 %v5490_v63, 0.0  ;;  %v2039_v7 = vmax.f32 %v5492_v0, 0.0  ;;  %2753 = vmatprep.subr.bf16.mxu1 %v6067_v57  ;;  %v6332_v60 = vmov 0   ;;  %v6068_v61 = vld [vmem:[#allocation10 + $0xc0] ss:$16 sps:$4 sm:$0xff]   ;;  %v2834_v1 = vld [vmem:[#allocation11 + $0x8] sm:$0xff] }
 0x248   :  { %v2040_v10 = vpack.c.bf16 %v2036_v3, %v2036_v3  ;;  %v2042_v46 = vpack.c.bf16 %v2038_v45, %v2038_v45  ;;  %2775 = vmatprep.mubr.bf16.mxu1 %v6332_v60  ;;  %v6073_v62 = vld [vmem:[#allocation10 + $0xe4] ss:$16 sps:$4 sm:$0xff]   ;;  %v6071_v63 = vld [vmem:[#allocation10 + $0xe0] ss:$16 sps:$4 sm:$0xff]   ;;  %v6076_v0 = vld [vmem:[#allocation10 + $0xc] ss:$16 sps:$4 sm:$0xff]  }
 0x249   :  { %v2041_v8 = vpack.c.bf16 %v2037_v6, %v2037_v6  ;;  %v2043_v14 = vpack.c.bf16 %v2039_v7, %v2039_v7  ;;  %v2838_v2 = vld [vmem:[#allocation11 + $0x28] sm:$0xff] }
 0x24a   :  { %2754 = vmatpush1.bf16.msra.mxu1 %v6065_v58  ;;  %v5219_v3 = vcombine.low %v2834_v1, %v2838_v2  ;;  %v5220_v4 = vcombine.high %v2834_v1, %v2838_v2  ;;  %v2842_v5 = vld [vmem:[#allocation11 + $0x48] sm:$0xff] }
 0x24b   :  { %2472 = vmatprep.mubr.bf16.mxu0 %v2041_v8  ;;  %2755 = vmatprep.subr.bf16.mxu1 %v6070_v59  ;;  %v2846_v6 = vld [vmem:[#allocation11 + $0x68] sm:$0xff] }
 0x24c   :  { %2473 = vmatmul.mubr.bf16.vlgmr.msra.gmra.mrb[4].mxu0 %v2040_v10  ;;  %v5228_v7 = vcombine.high %v2842_v5, %v2846_v6  ;;  %v5227_v8 = vcombine.low %v2842_v5, %v2846_v6  ;;  %v2854_v10 = vld [vmem:[#allocation11 + $0xa8] sm:$0xff] }
 0x24d   :  { %2482 = vmatpush1.bf16.msra.mxu0 %v6002_v9  ;;  %2513 = vmatprep.mubr.bf16.mxu0 %v2043_v14  ;;  %v2850_v9 = vld [vmem:[#allocation11 + $0x88] sm:$0xff] }
 0x24e   :  { %2483 = vmatprep.subr.bf16.mxu0 %v6007_v12  ;;  %2756 = vmatpush1.bf16.msra.mxu1 %v6068_v61  ;;  %v5236_v12 = vcombine.high %v2850_v9, %v2854_v10  ;;  %v5235_v14 = vcombine.low %v2850_v9, %v2854_v10  ;;  %v2910_v39 = vld [vmem:[#allocation11 + $0x268] sm:$0xff]  ;;  %v2525_v10 = vld [vmem:[#allocation5] sm:$0xff] }
 0x24f   :  { %2757 = vmatprep.subr.bf16.mxu1 %v6073_v62  ;;  %v2914_v42 = vld [vmem:[#allocation11 + $0x288] sm:$0xff] }
 0x250   :  { %v2934_v55 = vld [vmem:[#allocation11 + $0x328] sm:$0xff] }
 0x251   :  { %2484 = vmatpush1.bf16.msra.mxu0 %v6005_v15  ;;  %v2858_v15 = vld [vmem:[#allocation11 + $0xc8] sm:$0xff]  ;;  %v5316_v56 = vcombine.high %v2930_v52, %v2934_v55  ;;  %v5315_v57 = vcombine.low %v2930_v52, %v2934_v55  ;;  %v2877_v52 = vld [vmem:[#allocation11 + $0x160] sm:$0xff] }
 0x252   :  { %2485 = vmatprep.subr.bf16.mxu0 %v6010_v16  ;;  %2758 = vmatpush1.bf16.msra.mxu1 %v6071_v63  ;;  %v2862_v16 = vld [vmem:[#allocation11 + $0xe8] sm:$0xff]  ;;  %v2108_v63 = vld [vmem:[%s6633_s5] sm:$0x3] }
 0x253   :  { %2784 = vmatprep.subr.bf16.mxu1 %v6076_v0  ;;  %v2938_v58 = vld [vmem:[#allocation11 + $0x348] sm:$0xff]  ;;  %v2113_v0 = vrot.slane %v2108_v63, %v6509_v51  ;;  %v2117_v1 = vrot.slane %v2108_v63, %v6517_v53  ;;  %v2893_v63 = vld [vmem:[#allocation11 + $0x1e0] sm:$0xff] }
 0x254   :  { %v2942_v59 = vld [vmem:[#allocation11 + $0x368] sm:$0xff] }
 0x255   :  { %2486 = vmatpush1.bf16.msra.mxu0 %v6008_v17  ;;  %v5244_v17 = vcombine.high %v2858_v15, %v2862_v16  ;;  %v5324_v61 = vcombine.high %v2938_v58, %v2942_v59  ;;  %v5323_v62 = vcombine.low %v2938_v58, %v2942_v59  ;;  %v2885_v58 = vld [vmem:[#allocation11 + $0x1a0] sm:$0xff] }
 0x256   :  { %2487 = vmatprep.subr.bf16.mxu0 %v6013_v18  ;;  %v5243_v18 = vcombine.low %v2858_v15, %v2862_v16  ;;  %v6074_v16 = vld [vmem:[#allocation10 + $0x8] ss:$16 sps:$4 sm:$0xff]  }
 0x259   :  { %2488 = vmatpush1.bf16.msra.mxu0 %v6011_v19  ;;  %v2866_v19 = vld [vmem:[#allocation11 + $0x108] sm:$0xff] }
 0x25a   :  { %2489 = vmatprep.subr.bf16.mxu0 %v6016_v20  ;;  %v2870_v20 = vld [vmem:[#allocation11 + $0x128] sm:$0xff] }
 0x25d   :  { %2490 = vmatpush1.bf16.msra.mxu0 %v6014_v21  ;;  %v5252_v21 = vcombine.high %v2866_v19, %v2870_v20 }
 0x25e   :  { %2491 = vmatprep.subr.bf16.mxu0 %v6019_v11  ;;  %v5251_v11 = vcombine.low %v2866_v19, %v2870_v20  ;;  %v6077_v19 = vld [vmem:[#allocation10 + $0x28] ss:$16 sps:$4 sm:$0xff]   ;;  %v6082_v20 = vld [vmem:[#allocation10 + $0x4c] ss:$16 sps:$4 sm:$0xff]  }
 0x261   :  { %2492 = vmatpush1.bf16.msra.mxu0 %v6017_v13  ;;  %v2874_v13 = vld [vmem:[#allocation11 + $0x148] sm:$0xff] }
 0x262   :  { %2493 = vmatprep.subr.bf16.mxu0 %v6022_v22  ;;  %v2878_v22 = vld [vmem:[#allocation11 + $0x168] sm:$0xff] }
 0x265   :  { %2494 = vmatpush1.bf16.msra.mxu0 %v6020_v23  ;;  %v5260_v23 = vcombine.high %v2874_v13, %v2878_v22 }
 0x266   :  { %2495 = vmatprep.subr.bf16.mxu0 %v6025_v24  ;;  %v5259_v24 = vcombine.low %v2874_v13, %v2878_v22  ;;  %v6083_v13 = vld [vmem:[#allocation10 + $0x68] ss:$16 sps:$4 sm:$0xff]   ;;  %v6088_v22 = vld [vmem:[#allocation10 + $0x8c] ss:$16 sps:$4 sm:$0xff]  }
 0x269   :  { %2496 = vmatpush1.bf16.msra.mxu0 %v6023_v25  ;;  %v2882_v25 = vld [vmem:[#allocation11 + $0x188] sm:$0xff] }
 0x26a   :  { %2497 = vmatprep.subr.bf16.mxu0 %v6028_v26  ;;  %v2886_v26 = vld [vmem:[#allocation11 + $0x1a8] sm:$0xff] }
 0x26d   :  { %2498 = vmatpush1.bf16.msra.mxu0 %v6026_v27  ;;  %v5268_v27 = vcombine.high %v2882_v25, %v2886_v26 }
 0x26e   :  { %2499 = vmatprep.subr.bf16.mxu0 %v6031_v28  ;;  %v5267_v28 = vcombine.low %v2882_v25, %v2886_v26  ;;  %v6089_v25 = vld [vmem:[#allocation10 + $0xa8] ss:$16 sps:$4 sm:$0xff]   ;;  %v6094_v26 = vld [vmem:[#allocation10 + $0xcc] ss:$16 sps:$4 sm:$0xff]  }
 0x271   :  { %2500 = vmatpush1.bf16.msra.mxu0 %v6029_v29  ;;  %v2890_v29 = vld [vmem:[#allocation11 + $0x1c8] sm:$0xff] }
 0x272   :  { %2501 = vmatprep.subr.bf16.mxu0 %v6034_v30  ;;  %v2894_v30 = vld [vmem:[#allocation11 + $0x1e8] sm:$0xff] }
 0x275   :  { %2502 = vmatpush1.bf16.msra.mxu0 %v6032_v31  ;;  %v5276_v31 = vcombine.high %v2890_v29, %v2894_v30 }
 0x276   :  { %2503 = vmatprep.subr.bf16.mxu0 %v6037_v32  ;;  %v5275_v32 = vcombine.low %v2890_v29, %v2894_v30  ;;  %v2837_v29 = vld [vmem:[#allocation11 + $0x20] sm:$0xff]  ;;  %v6095_v30 = vld [vmem:[#allocation10 + $0xe8] ss:$16 sps:$4 sm:$0xff]  }
 0x279   :  { %2504 = vmatpush1.bf16.msra.mxu0 %v6035_v33  ;;  %v2898_v33 = vld [vmem:[#allocation11 + $0x208] sm:$0xff] }
 0x27a   :  { %2505 = vmatprep.subr.bf16.mxu0 %v6040_v34  ;;  %v2902_v34 = vld [vmem:[#allocation11 + $0x228] sm:$0xff] }
 0x27d   :  { %2506 = vmatpush1.bf16.msra.mxu0 %v6038_v35  ;;  %v5284_v35 = vcombine.high %v2898_v33, %v2902_v34 }
 0x27e   :  { %2507 = vmatprep.subr.bf16.mxu0 %v6043_v37  ;;  %v5283_v37 = vcombine.low %v2898_v33, %v2902_v34  ;;  %v2845_v33 = vld [vmem:[#allocation11 + $0x60] sm:$0xff] }
 0x281   :  { %2508 = vmatpush1.bf16.msra.mxu0 %v6041_v38  ;;  %v2906_v38 = vld [vmem:[#allocation11 + $0x248] sm:$0xff] }
 0x282   :  { %2509 = vmatprep.subr.bf16.mxu0 %v6046_v40  ;;  %v5292_v40 = vcombine.high %v2906_v38, %v2910_v39 }
 0x285   :  { %2510 = vmatpush1.bf16.msra.mxu0 %v6044_v41  ;;  %v5291_v41 = vcombine.low %v2906_v38, %v2910_v39  ;;  %v2853_v38 = vld [vmem:[#allocation11 + $0xa0] sm:$0xff] }
 0x286   :  { %2511 = vmatprep.subr.bf16.mxu0 %v6049_v43  ;;  %v2918_v43 = vld [vmem:[#allocation11 + $0x2a8] sm:$0xff] }
 0x287   :  { %v5299_v45 = vcombine.low %v2914_v42, %v2918_v43 }
 0x289   :  { %2512 = vmatpush1.bf16.msra.mxu0 %v6047_v44  ;;  %v5300_v44 = vcombine.high %v2914_v42, %v2918_v43  ;;  %v2861_v42 = vld [vmem:[#allocation11 + $0xe0] sm:$0xff] }
 0x28a   :  { %4493 = vmatprep.subr.bf16.mxu0 %v5220_v4 }
 0x28c   :  { %2514 = vmatmul.mubr.bf16.vlgmr.msra.gmra.mrb[4].mxu0 %v2042_v46  ;;  %v2922_v46 = vld [vmem:[#allocation11 + $0x2c8] sm:$0xff] }
 0x28d   :  { %4494 = vmatpush1.bf16.msra.mxu0 %v5219_v3  ;;  %v5308_v48 = vcombine.high %v2922_v46, %v2926_v47  ;;  %v5307_v49 = vcombine.low %v2922_v46, %v2926_v47  ;;  %v2869_v46 = vld [vmem:[#allocation11 + $0x120] sm:$0xff] }
 0x28e   :  { %4495 = vmatprep.subr.bf16.mxu0 %v5228_v7 }
 0x291   :  { %4496 = vmatpush1.bf16.msra.mxu0 %v5227_v8 }
 0x292   :  { %4497 = vmatprep.subr.bf16.mxu0 %v5236_v12 }
 0x295   :  { %4498 = vmatpush1.bf16.msra.mxu0 %v5235_v14 }
 0x296   :  { %4499 = vmatprep.subr.bf16.mxu0 %v5244_v17 }
 0x299   :  { %4500 = vmatpush1.bf16.msra.mxu0 %v5243_v18  ;;  %v6079_v18 = vld [vmem:[#allocation10 + $0x2c] ss:$16 sps:$4 sm:$0xff]  }
 0x29a   :  { %4501 = vmatprep.subr.bf16.mxu0 %v5252_v21  ;;  %v6080_v21 = vld [vmem:[#allocation10 + $0x48] ss:$16 sps:$4 sm:$0xff]  }
 0x29d   :  { %4502 = vmatpush1.bf16.msra.mxu0 %v5251_v11  ;;  %v6085_v11 = vld [vmem:[#allocation10 + $0x6c] ss:$16 sps:$4 sm:$0xff]  }
 0x29e   :  { %4503 = vmatprep.subr.bf16.mxu0 %v5260_v23  ;;  %v6086_v23 = vld [vmem:[#allocation10 + $0x88] ss:$16 sps:$4 sm:$0xff]  }
 0x2a1   :  { %4504 = vmatpush1.bf16.msra.mxu0 %v5259_v24  ;;  %v6091_v24 = vld [vmem:[#allocation10 + $0xac] ss:$16 sps:$4 sm:$0xff]  }
 0x2a2   :  { %4505 = vmatprep.subr.bf16.mxu0 %v5268_v27  ;;  %v6097_v27 = vld [vmem:[#allocation10 + $0xec] ss:$16 sps:$4 sm:$0xff]  }
 0x2a5   :  { %4506 = vmatpush1.bf16.msra.mxu0 %v5267_v28  ;;  %v2833_v28 = vld [vmem:[#allocation11] sm:$0xff] }
 0x2a6   :  { %4507 = vmatprep.subr.bf16.mxu0 %v5276_v31  ;;  %v5218_v31 = vcombine.high %v2833_v28, %v2837_v29  ;;  %v5217_v34 = vcombine.low %v2833_v28, %v2837_v29  ;;  %v2946_v28 = vld [vmem:[#allocation11 + $0x388] sm:$0xff] }
 0x2a9   :  { %4508 = vmatpush1.bf16.msra.mxu0 %v5275_v32  ;;  %v2841_v32 = vld [vmem:[#allocation11 + $0x40] sm:$0xff] }
 0x2aa   :  { %4509 = vmatprep.subr.bf16.mxu0 %v5284_v35  ;;  %v5226_v35 = vcombine.high %v2841_v32, %v2845_v33  ;;  %v5225_v39 = vcombine.low %v2841_v32, %v2845_v33 }
 0x2ad   :  { %4510 = vmatpush1.bf16.msra.mxu0 %v5283_v37  ;;  %v2849_v37 = vld [vmem:[#allocation11 + $0x80] sm:$0xff] }
 0x2ae   :  { %4511 = vmatprep.subr.bf16.mxu0 %v5292_v40  ;;  %v5234_v40 = vcombine.high %v2849_v37, %v2853_v38  ;;  %v5233_v43 = vcombine.low %v2849_v37, %v2853_v38  ;;  %v2954_v37 = vld [vmem:[#allocation11 + $0x3c8] sm:$0xff] }
 0x2b1   :  { %4512 = vmatpush1.bf16.msra.mxu0 %v5291_v41  ;;  %v2857_v41 = vld [vmem:[#allocation11 + $0xc0] sm:$0xff] }
 0x2b2   :  { %4513 = vmatprep.subr.bf16.mxu0 %v5300_v44  ;;  %v5242_v44 = vcombine.high %v2857_v41, %v2861_v42  ;;  %v5241_v47 = vcombine.low %v2857_v41, %v2861_v42 }
 0x2b5   :  { %4514 = vmatpush1.bf16.msra.mxu0 %v5299_v45  ;;  %v2865_v45 = vld [vmem:[#allocation11 + $0x100] sm:$0xff] }
 0x2b6   :  { %4515 = vmatprep.subr.bf16.mxu0 %v5308_v48  ;;  %v5250_v48 = vcombine.high %v2865_v45, %v2869_v46  ;;  %v5249_v55 = vcombine.low %v2865_v45, %v2869_v46  ;;  %v2962_v45 = vld [vmem:[#allocation11 + $0x408] sm:$0xff] }
 0x2b9   :  { %4516 = vmatpush1.bf16.msra.mxu0 %v5307_v49  ;;  %v2873_v49 = vld [vmem:[#allocation11 + $0x140] sm:$0xff] }
 0x2ba   :  { %4517 = vmatprep.subr.bf16.mxu0 %v5316_v56  ;;  %v5258_v56 = vcombine.high %v2873_v49, %v2877_v52  ;;  %v5257_v59 = vcombine.low %v2873_v49, %v2877_v52 }
 0x2bd   :  { %4518 = vmatpush1.bf16.msra.mxu0 %v5315_v57  ;;  %v2881_v57 = vld [vmem:[#allocation11 + $0x180] sm:$0xff] }
 0x2be   :  { %4519 = vmatprep.subr.bf16.mxu0 %v5324_v61  ;;  %v5266_v61 = vcombine.high %v2881_v57, %v2885_v58 }
 0x2c1   :  { %4520 = vmatpush1.bf16.msra.mxu0 %v5323_v62  ;;  %v2889_v62 = vld [vmem:[#allocation11 + $0x1c0] sm:$0xff] }
 0x35f   :  { %v2515_v2 = vpop.f32.mrb[4].mxu0 }
 0x360   :  { %v5493_v3 = vadd.f32 %v2515_v2, %v2113_v0  ;;  %v2517_v4 = vpop.f32.mrb[5].mxu0  ;;  %v5265_v0 = vcombine.low %v2881_v57, %v2885_v58  ;;  %v2897_v2 = vld [vmem:[#allocation11 + $0x200] sm:$0xff] }
 0x361   :  { %v5494_v5 = vadd.f32 %v2517_v4, %v2117_v1  ;;  %v2519_v6 = vpop.f32.mrb[6].mxu0  ;;  %v5274_v1 = vcombine.high %v2889_v62, %v2893_v63  ;;  %v5273_v4 = vcombine.low %v2889_v62, %v2893_v63 }
 0x362   :  { %4823 = vst [vmem:[#allocation14] sm:$0xff] %v5493_v3  ;;  %v2520_v7 = vpop.f32.mrb[7].mxu0  ;;  %v2905_v6 = vld [vmem:[#allocation11 + $0x240] sm:$0xff] }
 0x363   :  { %v2522_v8 = vmul.f32 0.5, %v5494_v5  ;;  %4824 = vst [vmem:[#allocation14 + $0x8] sm:$0xff] %v5494_v5  ;;  %v2909_v7 = vld [vmem:[#allocation11 + $0x260] sm:$0xff] }
 0x365   :  { %v2523_v9 = vmul.f32 1.442695, %v2522_v8 }
 0x367   :  { %6098 = vpow2.f32 %v2523_v9  ;;  %v5290_v9 = vcombine.high %v2905_v6, %v2909_v7 }
 0x371   :  { %v6099_v12 = vpop.eup %6098 }
 0x372   :  { %v2526_v14 = vmul.f32 %v6099_v12, %v2525_v10  ;;  %v2913_v10 = vld [vmem:[#allocation11 + $0x280] sm:$0xff] }
 0x373   :  { %v2917_v12 = vld [vmem:[#allocation11 + $0x2a0] sm:$0xff] }
 0x374   :  { %v2527_v15 = vadd.f32 %v5493_v3, %v2526_v14  ;;  %v2901_v3 = vld [vmem:[#allocation11 + $0x220] sm:$0xff]  ;;  %v5289_v14 = vcombine.low %v2905_v6, %v2909_v7  ;;  %v2974_v6 = vld [vmem:[#allocation11 + $0x468] sm:$0xff] }
 0x375   :  { %v5282_v5 = vcombine.high %v2897_v2, %v2901_v3  ;;  %v5281_v8 = vcombine.low %v2897_v2, %v2901_v3  ;;  %v2969_v2 = vld [vmem:[#allocation11 + $0x440] sm:$0xff] }
 0x376   :  { %v2528_v17 = vpack.c.bf16 %v2527_v15, %v2527_v15  ;;  %v5298_v15 = vcombine.high %v2913_v10, %v2917_v12 }
 0x378   :  { %2776 = vmatmul.mubr.bf16.vlgmr.msra.gmra.mrb[4].mxu1 %v2528_v17 }
 0x379   :  { %2785 = vmatpush1.bf16.msra.mxu1 %v6074_v16  ;;  %2816 = vmatprep.mubr.bf16.mxu1 %v6332_v60  ;;  %v6092_v60 = vld [vmem:[#allocation10 + $0xc8] ss:$16 sps:$4 sm:$0xff]   ;;  %v2921_v16 = vld [vmem:[#allocation11 + $0x2c0] sm:$0xff] }
 0x37a   :  { %2786 = vmatprep.subr.bf16.mxu1 %v6079_v18  ;;  %v5297_v18 = vcombine.low %v2913_v10, %v2917_v12  ;;  %v2977_v12 = vld [vmem:[#allocation11 + $0x480] sm:$0xff] }
 0x37d   :  { %2787 = vmatpush1.bf16.msra.mxu1 %v6077_v19 }
 0x37e   :  { %2788 = vmatprep.subr.bf16.mxu1 %v6082_v20  ;;  %v2929_v20 = vld [vmem:[#allocation11 + $0x300] sm:$0xff] }
 0x381   :  { %2789 = vmatpush1.bf16.msra.mxu1 %v6080_v21  ;;  %v2933_v21 = vld [vmem:[#allocation11 + $0x320] sm:$0xff] }
 0x382   :  { %2790 = vmatprep.subr.bf16.mxu1 %v6085_v11 }
 0x385   :  { %2791 = vmatpush1.bf16.msra.mxu1 %v6083_v13  ;;  %v5314_v13 = vcombine.high %v2929_v20, %v2933_v21 }
 0x386   :  { %2792 = vmatprep.subr.bf16.mxu1 %v6088_v22  ;;  %v2937_v22 = vld [vmem:[#allocation11 + $0x340] sm:$0xff] }
 0x389   :  { %2793 = vmatpush1.bf16.msra.mxu1 %v6086_v23  ;;  %v2941_v23 = vld [vmem:[#allocation11 + $0x360] sm:$0xff] }
 0x38a   :  { %2794 = vmatprep.subr.bf16.mxu1 %v6091_v24  ;;  %v5313_v24 = vcombine.low %v2929_v20, %v2933_v21  ;;  %v2985_v21 = vld [vmem:[#allocation11 + $0x4c0] sm:$0xff] }
 0x38d   :  { %2795 = vmatpush1.bf16.msra.mxu1 %v6089_v25  ;;  %v5322_v25 = vcombine.high %v2937_v22, %v2941_v23 }
 0x38e   :  { %2796 = vmatprep.subr.bf16.mxu1 %v6094_v26  ;;  %v5321_v26 = vcombine.low %v2937_v22, %v2941_v23  ;;  %v2990_v22 = vld [vmem:[#allocation11 + $0x4e8] sm:$0xff] }
 0x391   :  { %2797 = vmatpush1.bf16.msra.mxu1 %v6092_v60  ;;  %v2945_v60 = vld [vmem:[#allocation11 + $0x380] sm:$0xff] }
 0x392   :  { %2798 = vmatprep.subr.bf16.mxu1 %v6097_v27  ;;  %v2949_v27 = vld [vmem:[#allocation11 + $0x3a0] sm:$0xff] }
 0x393   :  { %v5330_v29 = vcombine.high %v2945_v60, %v2949_v27  ;;  %v5329_v33 = vcombine.low %v2945_v60, %v2949_v27  ;;  %v2993_v60 = vld [vmem:[#allocation11 + $0x500] sm:$0xff] }
 0x394   :  { %v2997_v27 = vld [vmem:[#allocation11 + $0x520] sm:$0xff] }
 0x395   :  { %2799 = vmatpush1.bf16.msra.mxu1 %v6095_v30  ;;  %v2950_v30 = vld [vmem:[#allocation11 + $0x3a8] sm:$0xff] }
 0x396   :  { %4411 = vmatprep.subr.bf16.mxu1 %v5218_v31  ;;  %v5331_v31 = vcombine.low %v2946_v28, %v2950_v30  ;;  %v5332_v32 = vcombine.high %v2946_v28, %v2950_v30  ;;  %v2994_v28 = vld [vmem:[#allocation11 + $0x508] sm:$0xff] }
 0x398   :  { %2817 = vmatmul.mubr.bf16.vlgmr.msra.gmra.mrb[8].mxu1 %v2528_v17  ;;  %v2925_v17 = vld [vmem:[#allocation11 + $0x2e0] sm:$0xff]  ;;  %4521 = vmatprep.subr.bf16.mxu0 %v5332_v32  ;;  %v5378_v32 = vcombine.high %v2993_v60, %v2997_v27 }
 0x399   :  { %4412 = vmatpush1.bf16.msra.mxu1 %v5217_v34  ;;  %v5306_v19 = vcombine.high %v2921_v16, %v2925_v17  ;;  %v5305_v11 = vcombine.low %v2921_v16, %v2925_v17  ;;  %v2953_v34 = vld [vmem:[#allocation11 + $0x3c0] sm:$0xff]  ;;  %4522 = vmatpush1.bf16.msra.mxu0 %v5331_v31  ;;  %v2982_v16 = vld [vmem:[#allocation11 + $0x4a8] sm:$0xff] }
 0x39a   :  { %4413 = vmatprep.subr.bf16.mxu1 %v5226_v35  ;;  %v2957_v35 = vld [vmem:[#allocation11 + $0x3e0] sm:$0xff] }
 0x39b   :  { %v5338_v38 = vcombine.high %v2953_v34, %v2957_v35  ;;  %v5337_v42 = vcombine.low %v2953_v34, %v2957_v35  ;;  %v3001_v34 = vld [vmem:[#allocation11 + $0x540] sm:$0xff] }
 0x39c   :  { %v3005_v35 = vld [vmem:[#allocation11 + $0x560] sm:$0xff] }
 0x39d   :  { %4414 = vmatpush1.bf16.msra.mxu1 %v5225_v39  ;;  %v2958_v39 = vld [vmem:[#allocation11 + $0x3e8] sm:$0xff] }
 0x39e   :  { %4415 = vmatprep.subr.bf16.mxu1 %v5234_v40  ;;  %v5339_v40 = vcombine.low %v2954_v37, %v2958_v39  ;;  %v5340_v41 = vcombine.high %v2954_v37, %v2958_v39  ;;  %v3002_v37 = vld [vmem:[#allocation11 + $0x548] sm:$0xff]  ;;  %v5377_v39 = vcombine.low %v2993_v60, %v2997_v27  ;;  %v3041_v60 = vld [vmem:[#allocation11 + $0x680] sm:$0xff] }
 0x39f   :  { %v3045_v27 = vld [vmem:[#allocation11 + $0x6a0] sm:$0xff] }
 0x3a0   :  { %4523 = vmatprep.subr.bf16.mxu0 %v5340_v41  ;;  %v5386_v41 = vcombine.high %v3001_v34, %v3005_v35 }
 0x3a1   :  { %4416 = vmatpush1.bf16.msra.mxu1 %v5233_v43  ;;  %v2961_v43 = vld [vmem:[#allocation11 + $0x400] sm:$0xff]  ;;  %4524 = vmatpush1.bf16.msra.mxu0 %v5339_v40 }
 0x3a2   :  { %4417 = vmatprep.subr.bf16.mxu1 %v5242_v44  ;;  %v2965_v44 = vld [vmem:[#allocation11 + $0x420] sm:$0xff] }
 0x3a3   :  { %v5346_v46 = vcombine.high %v2961_v43, %v2965_v44 }
 0x3a5   :  { %4418 = vmatpush1.bf16.msra.mxu1 %v5241_v47  ;;  %v2966_v47 = vld [vmem:[#allocation11 + $0x428] sm:$0xff] }
 0x3a6   :  { %4419 = vmatprep.subr.bf16.mxu1 %v5250_v48  ;;  %v5345_v48 = vcombine.low %v2961_v43, %v2965_v44  ;;  %v5347_v49 = vcombine.low %v2962_v45, %v2966_v47  ;;  %v5348_v52 = vcombine.high %v2962_v45, %v2966_v47  ;;  %v3009_v43 = vld [vmem:[#allocation11 + $0x580] sm:$0xff]  ;;  %v3010_v45 = vld [vmem:[#allocation11 + $0x588] sm:$0xff]  ;;  %v5385_v47 = vcombine.low %v3001_v34, %v3005_v35 }
 0x3a7   :  { %v3013_v44 = vld [vmem:[#allocation11 + $0x5a0] sm:$0xff] }
 0x3a8   :  { %4534 = vmatprep.subr.bf16.mxu0 %v5348_v52  ;;  %v3049_v34 = vld [vmem:[#allocation11 + $0x6c0] sm:$0xff] }
 0x3a9   :  { %4420 = vmatpush1.bf16.msra.mxu1 %v5249_v55  ;;  %v6546_v55 = vld [vmem:[%s6635_s7] sm:$0xf]  ;;  %v3053_v35 = vld [vmem:[#allocation11 + $0x6e0] sm:$0xff] }
 0x3aa   :  { %4421 = vmatprep.subr.bf16.mxu1 %v5258_v56  ;;  %v2566_v56 = vrot.slane %v6546_v55, %v6509_v51  ;;  %v2570_v57 = vrot.slane %v6546_v55, %v6517_v53 }
 0x3ad   :  { %4422 = vmatpush1.bf16.msra.mxu1 %v5257_v59 }
 0x3ae   :  { %4423 = vmatprep.subr.bf16.mxu1 %v5266_v61 }
 0x3b1   :  { %4424 = vmatpush1.bf16.msra.mxu1 %v5265_v0 }
 0x3b2   :  { %4425 = vmatprep.subr.bf16.mxu1 %v5274_v1 }
 0x3b5   :  { %4426 = vmatpush1.bf16.msra.mxu1 %v5273_v4  ;;  %v2973_v4 = vld [vmem:[#allocation11 + $0x460] sm:$0xff] }
 0x3b6   :  { %4427 = vmatprep.subr.bf16.mxu1 %v5282_v5  ;;  %v2970_v5 = vld [vmem:[#allocation11 + $0x448] sm:$0xff]  ;;  %v5353_v17 = vcombine.low %v2969_v2, %v2973_v4 }
 0x3b7   :  { %v5356_v10 = vcombine.high %v2970_v5, %v2974_v6 }
 0x3b9   :  { %4428 = vmatpush1.bf16.msra.mxu1 %v5281_v8 }
 0x3ba   :  { %4429 = vmatprep.subr.bf16.mxu1 %v5290_v9  ;;  %v5354_v9 = vcombine.high %v2969_v2, %v2973_v4  ;;  %v3025_v2 = vld [vmem:[#allocation11 + $0x600] sm:$0xff] }
 0x3bb   :  { %v3029_v4 = vld [vmem:[#allocation11 + $0x620] sm:$0xff] }
 0x3bd   :  { %4430 = vmatpush1.bf16.msra.mxu1 %v5289_v14  ;;  %v2981_v14 = vld [vmem:[#allocation11 + $0x4a0] sm:$0xff] }
 0x3be   :  { %4431 = vmatprep.subr.bf16.mxu1 %v5298_v15  ;;  %v2978_v15 = vld [vmem:[#allocation11 + $0x488] sm:$0xff]  ;;  %v5361_v23 = vcombine.low %v2977_v12, %v2981_v14 }
 0x3bf   :  { %v5364_v20 = vcombine.high %v2978_v15, %v2982_v16 }
 0x3c1   :  { %4432 = vmatpush1.bf16.msra.mxu1 %v5297_v18  ;;  %v5355_v18 = vcombine.low %v2970_v5, %v2974_v6  ;;  %v3026_v5 = vld [vmem:[#allocation11 + $0x608] sm:$0xff] }
 0x3c2   :  { %4433 = vmatprep.subr.bf16.mxu1 %v5306_v19  ;;  %v5362_v19 = vcombine.high %v2977_v12, %v2981_v14  ;;  %v3030_v6 = vld [vmem:[#allocation11 + $0x628] sm:$0xff] }
 0x3c5   :  { %4434 = vmatpush1.bf16.msra.mxu1 %v5305_v11  ;;  %v2989_v11 = vld [vmem:[#allocation11 + $0x4e0] sm:$0xff] }
 0x3c6   :  { %4435 = vmatprep.subr.bf16.mxu1 %v5314_v13  ;;  %v2986_v13 = vld [vmem:[#allocation11 + $0x4c8] sm:$0xff]  ;;  %v5369_v30 = vcombine.low %v2985_v21, %v2989_v11 }
 0x3c7   :  { %v5371_v31 = vcombine.low %v2986_v13, %v2990_v22 }
 0x3c9   :  { %4436 = vmatpush1.bf16.msra.mxu1 %v5313_v24  ;;  %v5363_v24 = vcombine.low %v2978_v15, %v2982_v16 }
 0x3ca   :  { %4437 = vmatprep.subr.bf16.mxu1 %v5322_v25  ;;  %v5370_v25 = vcombine.high %v2985_v21, %v2989_v11  ;;  %v3037_v21 = vld [vmem:[#allocation11 + $0x660] sm:$0xff]  ;;  %v3034_v11 = vld [vmem:[#allocation11 + $0x648] sm:$0xff] }
 0x3cd   :  { %4438 = vmatpush1.bf16.msra.mxu1 %v5321_v26  ;;  %v5372_v26 = vcombine.high %v2986_v13, %v2990_v22  ;;  %v3038_v13 = vld [vmem:[#allocation11 + $0x668] sm:$0xff] }
 0x3ce   :  { %4439 = vmatprep.subr.bf16.mxu1 %v5330_v29  ;;  %v2998_v29 = vld [vmem:[#allocation11 + $0x528] sm:$0xff] }
 0x3cf   :  { %v5379_v40 = vcombine.low %v2994_v28, %v2998_v29 }
 0x3d1   :  { %4440 = vmatpush1.bf16.msra.mxu1 %v5329_v33  ;;  %v5380_v33 = vcombine.high %v2994_v28, %v2998_v29  ;;  %v3042_v28 = vld [vmem:[#allocation11 + $0x688] sm:$0xff] }
 0x3d2   :  { %4441 = vmatprep.subr.bf16.mxu1 %v5338_v38  ;;  %v3006_v38 = vld [vmem:[#allocation11 + $0x568] sm:$0xff] }
 0x3d3   :  { %v3046_v29 = vld [vmem:[#allocation11 + $0x6a8] sm:$0xff] }
 0x3d5   :  { %4442 = vmatpush1.bf16.msra.mxu1 %v5337_v42  ;;  %v5388_v42 = vcombine.high %v3002_v37, %v3006_v38 }
 0x3d6   :  { %4452 = vmatprep.subr.bf16.mxu1 %v5346_v46  ;;  %v3014_v46 = vld [vmem:[#allocation11 + $0x5a8] sm:$0xff] }
 0x3d7   :  { %v5396_v52 = vcombine.high %v3010_v45, %v3014_v46 }
 0x44b   :  { %v2777_v58 = vpop.f32.mrb[4].mxu1 }
 0x44c   :  { %v2778_v59 = vadd.f32 %v2777_v58, %v2566_v56  ;;  %v2779_v61 = vpop.f32.mrb[5].mxu1  ;;  %v3017_v56 = vld [vmem:[#allocation11 + $0x5c0] sm:$0xff]  ;;  %v3018_v58 = vld [vmem:[#allocation11 + $0x5c8] sm:$0xff] }
 0x44d   :  { %v2780_v62 = vadd.f32 %v2779_v61, %v2570_v57  ;;  %v2781_v63 = vpop.f32.mrb[6].mxu1  ;;  %v3021_v57 = vld [vmem:[#allocation11 + $0x5e0] sm:$0xff]  ;;  %v2578_v61 = vrot.slane %v6546_v55, %v6520_v54 }
 0x44e   :  { %v2825_v0 = vmax.f32 %v2778_v59, 0.0  ;;  %v2782_v1 = vpop.f32.mrb[7].mxu1  ;;  %v3022_v59 = vld [vmem:[#allocation11 + $0x5e8] sm:$0xff]  ;;  %v5395_v63 = vcombine.low %v3010_v45, %v3014_v46  ;;  %v5401_v14 = vcombine.low %v3017_v56, %v3021_v57 }
 0x44f   :  { %v2826_v3 = vmax.f32 %v2780_v62, 0.0  ;;  %v5393_v62 = vcombine.low %v3009_v43, %v3013_v44  ;;  %v5404_v1 = vcombine.high %v3018_v58, %v3022_v59  ;;  %v5403_v15 = vcombine.low %v3018_v58, %v3022_v59  ;;  %v3058_v45 = vld [vmem:[#allocation11 + $0x708] sm:$0xff] }
 0x450   :  { %v6554_v8 = vpack.c.bf16 %v2825_v0, %v2825_v0  ;;  %v5402_v0 = vcombine.high %v3017_v56, %v3021_v57  ;;  %v3062_v46 = vld [vmem:[#allocation11 + $0x728] sm:$0xff]  ;;  %v3065_v56 = vld [vmem:[#allocation11 + $0x740] sm:$0xff] }
 0x451   :  { %v6552_v7 = vpack.c.bf16 %v2826_v3, %v2826_v3  ;;  %v3069_v57 = vld [vmem:[#allocation11 + $0x760] sm:$0xff]  ;;  %v3066_v58 = vld [vmem:[#allocation11 + $0x748] sm:$0xff] }
 0x452   :  { %v3070_v59 = vld [vmem:[#allocation11 + $0x768] sm:$0xff] }
 0x453   :  { %4443 = vmatprep.mubr.bf16.mxu1 %v6552_v7  ;;  %4525 = vmatprep.mubr.bf16.mxu0 %v6552_v7 }
 0x454   :  { %4444 = vmatmul.mubr.bf16.vlgmr.msra.gmra.mrb[12].mxu1 %v6554_v8  ;;  %4526 = vmatmul.mubr.bf16.vlgmr.msra.gmra.mrb[8].mxu0 %v6554_v8 }
 0x455   :  { %4453 = vmatpush1.bf16.msra.mxu1 %v5345_v48  ;;  %4535 = vmatpush1.bf16.msra.mxu0 %v5347_v49  ;;  %v5387_v48 = vcombine.low %v3002_v37, %v3006_v38  ;;  %v5394_v49 = vcombine.high %v3009_v43, %v3013_v44  ;;  %v3050_v37 = vld [vmem:[#allocation11 + $0x6c8] sm:$0xff]  ;;  %v3057_v43 = vld [vmem:[#allocation11 + $0x700] sm:$0xff] }
 0x456   :  { %4454 = vmatprep.subr.bf16.mxu1 %v5354_v9  ;;  %4536 = vmatprep.subr.bf16.mxu0 %v5356_v10  ;;  %v3054_v38 = vld [vmem:[#allocation11 + $0x6e8] sm:$0xff]  ;;  %v3061_v44 = vld [vmem:[#allocation11 + $0x720] sm:$0xff] }
 0x459   :  { %4455 = vmatpush1.bf16.msra.mxu1 %v5353_v17  ;;  %4537 = vmatpush1.bf16.msra.mxu0 %v5355_v18  ;;  %v5410_v17 = vcombine.high %v3025_v2, %v3029_v4  ;;  %v5412_v18 = vcombine.high %v3026_v5, %v3030_v6 }
 0x45a   :  { %4456 = vmatprep.subr.bf16.mxu1 %v5362_v19  ;;  %4538 = vmatprep.subr.bf16.mxu0 %v5364_v20  ;;  %v3033_v19 = vld [vmem:[#allocation11 + $0x640] sm:$0xff] }
 0x45d   :  { %4457 = vmatpush1.bf16.msra.mxu1 %v5361_v23  ;;  %4539 = vmatpush1.bf16.msra.mxu0 %v5363_v24  ;;  %v5409_v23 = vcombine.low %v3025_v2, %v3029_v4  ;;  %v5411_v24 = vcombine.low %v3026_v5, %v3030_v6  ;;  %v3077_v2 = vld [vmem:[#allocation11 + $0x7a0] sm:$0xff]  ;;  %v3074_v4 = vld [vmem:[#allocation11 + $0x788] sm:$0xff]  ;;  %v5449_v6 = vcombine.low %v3065_v56, %v3069_v57 }
 0x45e   :  { %4458 = vmatprep.subr.bf16.mxu1 %v5370_v25  ;;  %4540 = vmatprep.subr.bf16.mxu0 %v5372_v26  ;;  %v5418_v25 = vcombine.high %v3033_v19, %v3037_v21  ;;  %v5420_v26 = vcombine.high %v3034_v11, %v3038_v13  ;;  %v3078_v5 = vld [vmem:[#allocation11 + $0x7a8] sm:$0xff] }
 0x461   :  { %4459 = vmatpush1.bf16.msra.mxu1 %v5369_v30  ;;  %4541 = vmatpush1.bf16.msra.mxu0 %v5371_v31  ;;  %v5417_v30 = vcombine.low %v3033_v19, %v3037_v21  ;;  %v5419_v31 = vcombine.low %v3034_v11, %v3038_v13 }
 0x462   :  { %4460 = vmatprep.subr.bf16.mxu1 %v5378_v32  ;;  %4542 = vmatprep.subr.bf16.mxu0 %v5380_v33  ;;  %v5426_v32 = vcombine.high %v3041_v60, %v3045_v27  ;;  %v5428_v33 = vcombine.high %v3042_v28, %v3046_v29 }
 0x465   :  { %4461 = vmatpush1.bf16.msra.mxu1 %v5377_v39  ;;  %4543 = vmatpush1.bf16.msra.mxu0 %v5379_v40  ;;  %v5425_v39 = vcombine.low %v3041_v60, %v3045_v27  ;;  %v5427_v40 = vcombine.low %v3042_v28, %v3046_v29 }
 0x466   :  { %4462 = vmatprep.subr.bf16.mxu1 %v5386_v41  ;;  %4544 = vmatprep.subr.bf16.mxu0 %v5388_v42  ;;  %v5434_v41 = vcombine.high %v3049_v34, %v3053_v35  ;;  %v5436_v42 = vcombine.high %v3050_v37, %v3054_v38 }
 0x469   :  { %4463 = vmatpush1.bf16.msra.mxu1 %v5385_v47  ;;  %4545 = vmatpush1.bf16.msra.mxu0 %v5387_v48  ;;  %v5433_v47 = vcombine.low %v3049_v34, %v3053_v35  ;;  %v5435_v48 = vcombine.low %v3050_v37, %v3054_v38 }
 0x46a   :  { %4464 = vmatprep.subr.bf16.mxu1 %v5394_v49  ;;  %4546 = vmatprep.subr.bf16.mxu0 %v5396_v52  ;;  %v5442_v49 = vcombine.high %v3057_v43, %v3061_v44  ;;  %v5444_v52 = vcombine.high %v3058_v45, %v3062_v46 }
 0x46b   :  { %v6562_v3 = vpop.f32.mrb[8].mxu1 }
 0x46c   :  { %v2820_v9 = vpop.f32.mrb[9].mxu1 }
 0x46d   :  { %v2821_v10 = vadd.f32 %v2820_v9, %v2578_v61  ;;  %v2822_v12 = vpop.f32.mrb[10].mxu1  ;;  %4465 = vmatpush1.bf16.msra.mxu1 %v5393_v62  ;;  %4547 = vmatpush1.bf16.msra.mxu0 %v5395_v63  ;;  %v5441_v61 = vcombine.low %v3057_v43, %v3061_v44  ;;  %v5443_v62 = vcombine.low %v3058_v45, %v3062_v46 }
 0x46e   :  { %v2823_v16 = vpop.f32.mrb[11].mxu1  ;;  %4466 = vmatprep.subr.bf16.mxu1 %v5402_v0  ;;  %4548 = vmatprep.subr.bf16.mxu0 %v5404_v1  ;;  %v5450_v63 = vcombine.high %v3065_v56, %v3069_v57  ;;  %v5452_v0 = vcombine.high %v3066_v58, %v3070_v59  ;;  %v3073_v1 = vld [vmem:[#allocation11 + $0x780] sm:$0xff]  ;;  %v5451_v9 = vcombine.low %v3066_v58, %v3070_v59 }
 0x46f   :  { %v2828_v20 = vmax.f32 %v2821_v10, 0.0  ;;  %v2574_v10 = vrot.slane %v6546_v55, %v6531_v36  ;;  %v5458_v12 = vcombine.high %v3073_v1, %v3077_v2  ;;  %v3085_v16 = vld [vmem:[#allocation11 + $0x7e0] sm:$0xff]  ;;  %v5457_v19 = vcombine.low %v3073_v1, %v3077_v2  ;;  %v2839_v55 = vld [vmem:[#allocation11 + $0x30] sm:$0xff] }
 0x471   :  { %v6564_v22 = vpack.c.bf16 %v2828_v20, %v2828_v20  ;;  %4467 = vmatpush1.bf16.msra.mxu1 %v5401_v14  ;;  %4549 = vmatpush1.bf16.msra.mxu0 %v5403_v15  ;;  %v5460_v14 = vcombine.high %v3074_v4, %v3078_v5  ;;  %v3081_v15 = vld [vmem:[#allocation11 + $0x7c0] sm:$0xff]  ;;  %v5459_v20 = vcombine.low %v3074_v4, %v3078_v5  ;;  %v2875_v5 = vld [vmem:[#allocation11 + $0x150] sm:$0xff] }
 0x472   :  { %4468 = vmatprep.subr.bf16.mxu1 %v5410_v17  ;;  %4550 = vmatprep.subr.bf16.mxu0 %v5412_v18  ;;  %v3082_v17 = vld [vmem:[#allocation11 + $0x7c8] sm:$0xff]  ;;  %v2819_v21 = vadd.f32 %v6562_v3, %v2574_v10  ;;  %v5466_v11 = vcombine.high %v3081_v15, %v3085_v16  ;;  %v2844_v3 = vld [vmem:[#allocation11 + $0x58] sm:$0xff] }
 0x473   :  { %4484 = vmatprep.mubr.bf16.mxu1 %v6564_v22  ;;  %4566 = vmatprep.mubr.bf16.mxu0 %v6564_v22  ;;  %v3086_v18 = vld [vmem:[#allocation11 + $0x7e8] sm:$0xff]  ;;  %v2880_v10 = vld [vmem:[#allocation11 + $0x178] sm:$0xff] }
 0x474   :  { %v5468_v13 = vcombine.high %v3082_v17, %v3086_v18  ;;  %v5467_v60 = vcombine.low %v3082_v17, %v3086_v18  ;;  %v2827_v27 = vmax.f32 %v2819_v21, 0.0  ;;  %v2883_v17 = vld [vmem:[#allocation11 + $0x190] sm:$0xff] }
 0x475   :  { %4469 = vmatpush1.bf16.msra.mxu1 %v5409_v23  ;;  %4551 = vmatpush1.bf16.msra.mxu0 %v5411_v24  ;;  %v2835_v23 = vld [vmem:[#allocation11 + $0x10] sm:$0xff]  ;;  %v2836_v24 = vld [vmem:[#allocation11 + $0x18] sm:$0xff] }
 0x476   :  { %4470 = vmatprep.subr.bf16.mxu1 %v5418_v25  ;;  %4552 = vmatprep.subr.bf16.mxu0 %v5420_v26  ;;  %v2840_v25 = vld [vmem:[#allocation11 + $0x38] sm:$0xff]  ;;  %v5465_v26 = vcombine.low %v3081_v15, %v3085_v16  ;;  %v5222_v28 = vcombine.high %v2835_v23, %v2839_v55  ;;  %v6571_v34 = vpack.c.bf16 %v2827_v27, %v2827_v27  ;;  %v2887_v18 = vld [vmem:[#allocation11 + $0x1b0] sm:$0xff] }
 0x477   :  { %v5224_v29 = vcombine.high %v2836_v24, %v2840_v25  ;;  %v5223_v35 = vcombine.low %v2836_v24, %v2840_v25  ;;  %v2895_v24 = vld [vmem:[#allocation11 + $0x1f0] sm:$0xff]  ;;  %v2892_v25 = vld [vmem:[#allocation11 + $0x1d8] sm:$0xff] }
 0x479   :  { %4471 = vmatpush1.bf16.msra.mxu1 %v5417_v30  ;;  %4553 = vmatpush1.bf16.msra.mxu0 %v5419_v31  ;;  %v2843_v30 = vld [vmem:[#allocation11 + $0x50] sm:$0xff] }
 0x47a   :  { %4472 = vmatprep.subr.bf16.mxu1 %v5426_v32  ;;  %4554 = vmatprep.subr.bf16.mxu0 %v5428_v33  ;;  %v2847_v31 = vld [vmem:[#allocation11 + $0x70] sm:$0xff]  ;;  %v2848_v32 = vld [vmem:[#allocation11 + $0x78] sm:$0xff]  ;;  %v5221_v33 = vcombine.low %v2835_v23, %v2839_v55 }
 0x47b   :  { %v5230_v37 = vcombine.high %v2843_v30, %v2847_v31  ;;  %v5232_v38 = vcombine.high %v2844_v3, %v2848_v32  ;;  %v5229_v43 = vcombine.low %v2843_v30, %v2847_v31  ;;  %v5231_v44 = vcombine.low %v2844_v3, %v2848_v32  ;;  %v2891_v55 = vld [vmem:[#allocation11 + $0x1d0] sm:$0xff]  ;;  %v2900_v3 = vld [vmem:[#allocation11 + $0x218] sm:$0xff] }
 0x47c   :  { %v2899_v30 = vld [vmem:[#allocation11 + $0x210] sm:$0xff]  ;;  %v2904_v32 = vld [vmem:[#allocation11 + $0x238] sm:$0xff] }
 0x47d   :  { %4473 = vmatpush1.bf16.msra.mxu1 %v5425_v39  ;;  %4555 = vmatpush1.bf16.msra.mxu0 %v5427_v40  ;;  %v2851_v39 = vld [vmem:[#allocation11 + $0x90] sm:$0xff] }
 0x47e   :  { %4474 = vmatprep.subr.bf16.mxu1 %v5434_v41  ;;  %4556 = vmatprep.subr.bf16.mxu0 %v5436_v42  ;;  %v2855_v40 = vld [vmem:[#allocation11 + $0xb0] sm:$0xff]  ;;  %v2852_v41 = vld [vmem:[#allocation11 + $0x98] sm:$0xff] }
 0x47f   :  { %v2856_v42 = vld [vmem:[#allocation11 + $0xb8] sm:$0xff]  ;;  %v5238_v45 = vcombine.high %v2851_v39, %v2855_v40  ;;  %v5237_v56 = vcombine.low %v2851_v39, %v2855_v40  ;;  %v2903_v31 = vld [vmem:[#allocation11 + $0x230] sm:$0xff] }
 0x480   :  { %v5240_v46 = vcombine.high %v2852_v41, %v2856_v42  ;;  %v5239_v57 = vcombine.low %v2852_v41, %v2856_v42  ;;  %v2907_v39 = vld [vmem:[#allocation11 + $0x250] sm:$0xff]  ;;  %v2908_v41 = vld [vmem:[#allocation11 + $0x258] sm:$0xff] }
 0x481   :  { %4475 = vmatpush1.bf16.msra.mxu1 %v5433_v47  ;;  %4557 = vmatpush1.bf16.msra.mxu0 %v5435_v48  ;;  %v2859_v47 = vld [vmem:[#allocation11 + $0xd0] sm:$0xff]  ;;  %v2912_v42 = vld [vmem:[#allocation11 + $0x278] sm:$0xff] }
 0x482   :  { %4476 = vmatprep.subr.bf16.mxu1 %v5442_v49  ;;  %4558 = vmatprep.subr.bf16.mxu0 %v5444_v52  ;;  %v2863_v48 = vld [vmem:[#allocation11 + $0xf0] sm:$0xff]  ;;  %v2860_v49 = vld [vmem:[#allocation11 + $0xd8] sm:$0xff] }
 0x483   :  { %v2864_v52 = vld [vmem:[#allocation11 + $0xf8] sm:$0xff]  ;;  %v5246_v58 = vcombine.high %v2859_v47, %v2863_v48  ;;  %v2911_v40 = vld [vmem:[#allocation11 + $0x270] sm:$0xff] }
 0x484   :  { %v5248_v59 = vcombine.high %v2860_v49, %v2864_v52  ;;  %v5247_v1 = vcombine.low %v2860_v49, %v2864_v52  ;;  %v2916_v49 = vld [vmem:[#allocation11 + $0x298] sm:$0xff] }
 0x485   :  { %4477 = vmatpush1.bf16.msra.mxu1 %v5441_v61  ;;  %4559 = vmatpush1.bf16.msra.mxu0 %v5443_v62  ;;  %v2867_v61 = vld [vmem:[#allocation11 + $0x110] sm:$0xff]  ;;  %v2920_v52 = vld [vmem:[#allocation11 + $0x2b8] sm:$0xff] }
 0x486   :  { %4478 = vmatprep.subr.bf16.mxu1 %v5450_v63  ;;  %4560 = vmatprep.subr.bf16.mxu0 %v5452_v0  ;;  %v2871_v62 = vld [vmem:[#allocation11 + $0x130] sm:$0xff]  ;;  %v2872_v63 = vld [vmem:[#allocation11 + $0x138] sm:$0xff]  ;;  %v5245_v0 = vcombine.low %v2859_v47, %v2863_v48 }
 0x487   :  { %v5254_v2 = vcombine.high %v2867_v61, %v2871_v62  ;;  %v2915_v47 = vld [vmem:[#allocation11 + $0x290] sm:$0xff] }
 0x488   :  { %v2919_v48 = vld [vmem:[#allocation11 + $0x2b0] sm:$0xff] }
 0x489   :  { %4479 = vmatpush1.bf16.msra.mxu1 %v5449_v6  ;;  %4561 = vmatpush1.bf16.msra.mxu0 %v5451_v9  ;;  %v2879_v6 = vld [vmem:[#allocation11 + $0x170] sm:$0xff]  ;;  %v2876_v9 = vld [vmem:[#allocation11 + $0x158] sm:$0xff] }
 0x48a   :  { %4480 = vmatprep.subr.bf16.mxu1 %v5458_v12  ;;  %4562 = vmatprep.subr.bf16.mxu0 %v5460_v14  ;;  %v5253_v12 = vcombine.low %v2867_v61, %v2871_v62  ;;  %v5262_v15 = vcombine.high %v2875_v5, %v2879_v6  ;;  %v5264_v16 = vcombine.high %v2876_v9, %v2880_v10  ;;  %v2923_v61 = vld [vmem:[#allocation11 + $0x2d0] sm:$0xff] }
 0x48b   :  { %v5261_v21 = vcombine.low %v2875_v5, %v2879_v6  ;;  %v2927_v62 = vld [vmem:[#allocation11 + $0x2f0] sm:$0xff] }
 0x48c   :  { %v2931_v5 = vld [vmem:[#allocation11 + $0x310] sm:$0xff] }
 0x48d   :  { %4481 = vmatpush1.bf16.msra.mxu1 %v5457_v19  ;;  %4563 = vmatpush1.bf16.msra.mxu0 %v5459_v20  ;;  %v2884_v19 = vld [vmem:[#allocation11 + $0x198] sm:$0xff]  ;;  %v2935_v6 = vld [vmem:[#allocation11 + $0x330] sm:$0xff] }
 0x48e   :  { %4482 = vmatprep.subr.bf16.mxu1 %v5466_v11  ;;  %4564 = vmatprep.subr.bf16.mxu0 %v5468_v13  ;;  %v2888_v20 = vld [vmem:[#allocation11 + $0x1b8] sm:$0xff]  ;;  %v5263_v11 = vcombine.low %v2876_v9, %v2880_v10  ;;  %v5270_v13 = vcombine.high %v2883_v17, %v2887_v18 }
 0x48f   :  { %v5272_v23 = vcombine.high %v2884_v19, %v2888_v20  ;;  %v5271_v27 = vcombine.low %v2884_v19, %v2888_v20  ;;  %v2932_v9 = vld [vmem:[#allocation11 + $0x318] sm:$0xff] }
 0x490   :  { %v2936_v10 = vld [vmem:[#allocation11 + $0x338] sm:$0xff] }
 0x491   :  { %4483 = vmatpush1.bf16.msra.mxu1 %v5465_v26  ;;  %4565 = vmatpush1.bf16.msra.mxu0 %v5467_v60  ;;  %v2896_v26 = vld [vmem:[#allocation11 + $0x1f8] sm:$0xff]  ;;  %v5269_v60 = vcombine.low %v2883_v17, %v2887_v18  ;;  %v2939_v17 = vld [vmem:[#allocation11 + $0x350] sm:$0xff] }
 0x492   :  { %4575 = vmatprep.subr.bf16.mxu1 %v5222_v28  ;;  %4657 = vmatprep.subr.bf16.mxu0 %v5224_v29  ;;  %v5278_v28 = vcombine.high %v2891_v55, %v2895_v24  ;;  %v5280_v29 = vcombine.high %v2892_v25, %v2896_v26  ;;  %v2943_v18 = vld [vmem:[#allocation11 + $0x370] sm:$0xff]  ;;  %v2940_v19 = vld [vmem:[#allocation11 + $0x358] sm:$0xff] }
 0x493   :  { %v2944_v20 = vld [vmem:[#allocation11 + $0x378] sm:$0xff] }
 0x494   :  { %4485 = vmatmul.mubr.bf16.vlgmr.msra.gmra.mrb[12].mxu1 %v6571_v34  ;;  %4567 = vmatmul.mubr.bf16.vlgmr.msra.gmra.mrb[8].mxu0 %v6571_v34 }
 0x495   :  { %4576 = vmatpush1.bf16.msra.mxu1 %v5221_v33  ;;  %4607 = vmatprep.mubr.bf16.mxu1 %v6552_v7  ;;  %v5277_v33 = vcombine.low %v2891_v55, %v2895_v24  ;;  %v2947_v55 = vld [vmem:[#allocation11 + $0x390] sm:$0xff] }
 0x496   :  { %4658 = vmatpush1.bf16.msra.mxu0 %v5223_v35  ;;  %4689 = vmatprep.mubr.bf16.mxu0 %v6552_v7  ;;  %v2868_v7 = vld [vmem:[#allocation11 + $0x118] sm:$0xff]  ;;  %v5279_v35 = vcombine.low %v2892_v25, %v2896_v26  ;;  %v2951_v24 = vld [vmem:[#allocation11 + $0x3b0] sm:$0xff] }
 0x497   :  { %4577 = vmatprep.subr.bf16.mxu1 %v5230_v37  ;;  %4659 = vmatprep.subr.bf16.mxu0 %v5232_v38  ;;  %v5256_v4 = vcombine.high %v2868_v7, %v2872_v63  ;;  %v5255_v14 = vcombine.low %v2868_v7, %v2872_v63  ;;  %v5286_v37 = vcombine.high %v2899_v30, %v2903_v31  ;;  %v2924_v7 = vld [vmem:[#allocation11 + $0x2d8] sm:$0xff] }
 0x498   :  { %v5288_v38 = vcombine.high %v2900_v3, %v2904_v32  ;;  %v2928_v63 = vld [vmem:[#allocation11 + $0x2f8] sm:$0xff] }
 0x499   :  { %4578 = vmatpush1.bf16.msra.mxu1 %v5229_v43  ;;  %v5285_v43 = vcombine.low %v2899_v30, %v2903_v31  ;;  %v2948_v25 = vld [vmem:[#allocation11 + $0x398] sm:$0xff]  ;;  %v2955_v30 = vld [vmem:[#allocation11 + $0x3d0] sm:$0xff] }
 0x49a   :  { %4660 = vmatpush1.bf16.msra.mxu0 %v5231_v44  ;;  %4579 = vmatprep.subr.bf16.mxu1 %v5238_v45  ;;  %v5287_v44 = vcombine.low %v2900_v3, %v2904_v32  ;;  %v5294_v45 = vcombine.high %v2907_v39, %v2911_v40  ;;  %v2952_v26 = vld [vmem:[#allocation11 + $0x3b8] sm:$0xff]  ;;  %v2959_v31 = vld [vmem:[#allocation11 + $0x3f0] sm:$0xff] }
 0x49b   :  { %4661 = vmatprep.subr.bf16.mxu0 %v5240_v46  ;;  %v5296_v46 = vcombine.high %v2908_v41, %v2912_v42  ;;  %v2956_v3 = vld [vmem:[#allocation11 + $0x3d8] sm:$0xff] }
 0x49c   :  { %v2960_v32 = vld [vmem:[#allocation11 + $0x3f8] sm:$0xff] }
 0x49d   :  { %4580 = vmatpush1.bf16.msra.mxu1 %v5237_v56  ;;  %v5293_v56 = vcombine.low %v2907_v39, %v2911_v40  ;;  %v2963_v39 = vld [vmem:[#allocation11 + $0x410] sm:$0xff] }
 0x49e   :  { %4662 = vmatpush1.bf16.msra.mxu0 %v5239_v57  ;;  %4581 = vmatprep.subr.bf16.mxu1 %v5246_v58  ;;  %v5295_v57 = vcombine.low %v2908_v41, %v2912_v42  ;;  %v5302_v58 = vcombine.high %v2915_v47, %v2919_v48  ;;  %v2967_v40 = vld [vmem:[#allocation11 + $0x430] sm:$0xff]  ;;  %v2964_v41 = vld [vmem:[#allocation11 + $0x418] sm:$0xff] }
 0x49f   :  { %4663 = vmatprep.subr.bf16.mxu0 %v5248_v59  ;;  %v5304_v59 = vcombine.high %v2916_v49, %v2920_v52  ;;  %v2968_v42 = vld [vmem:[#allocation11 + $0x438] sm:$0xff] }
 0x4a1   :  { %4582 = vmatpush1.bf16.msra.mxu1 %v5245_v0  ;;  %v5301_v0 = vcombine.low %v2915_v47, %v2919_v48  ;;  %v2971_v47 = vld [vmem:[#allocation11 + $0x450] sm:$0xff] }
 0x4a2   :  { %4664 = vmatpush1.bf16.msra.mxu0 %v5247_v1  ;;  %4583 = vmatprep.subr.bf16.mxu1 %v5254_v2  ;;  %v5303_v1 = vcombine.low %v2916_v49, %v2920_v52  ;;  %v5310_v2 = vcombine.high %v2923_v61, %v2927_v62  ;;  %v2975_v48 = vld [vmem:[#allocation11 + $0x470] sm:$0xff]  ;;  %v5349_v49 = vcombine.low %v2963_v39, %v2967_v40  ;;  %v2972_v52 = vld [vmem:[#allocation11 + $0x458] sm:$0xff] }
 0x4a3   :  { %4665 = vmatprep.subr.bf16.mxu0 %v5256_v4  ;;  %v5312_v4 = vcombine.high %v2924_v7, %v2928_v63 }
 0x4a5   :  { %4584 = vmatpush1.bf16.msra.mxu1 %v5253_v12  ;;  %v5309_v12 = vcombine.low %v2923_v61, %v2927_v62  ;;  %v2983_v61 = vld [vmem:[#allocation11 + $0x4b0] sm:$0xff] }
 0x4a6   :  { %4666 = vmatpush1.bf16.msra.mxu0 %v5255_v14  ;;  %4585 = vmatprep.subr.bf16.mxu1 %v5262_v15  ;;  %v5311_v14 = vcombine.low %v2924_v7, %v2928_v63  ;;  %v5318_v15 = vcombine.high %v2931_v5, %v2935_v6  ;;  %v2980_v7 = vld [vmem:[#allocation11 + $0x498] sm:$0xff] }
 0x4a7   :  { %4667 = vmatprep.subr.bf16.mxu0 %v5264_v16  ;;  %v5320_v16 = vcombine.high %v2932_v9, %v2936_v10  ;;  %v2984_v63 = vld [vmem:[#allocation11 + $0x4b8] sm:$0xff] }
 0x4a9   :  { %4586 = vmatpush1.bf16.msra.mxu1 %v5261_v21  ;;  %v5317_v21 = vcombine.low %v2931_v5, %v2935_v6  ;;  %v2987_v5 = vld [vmem:[#allocation11 + $0x4d0] sm:$0xff] }
 0x4aa   :  { %4668 = vmatpush1.bf16.msra.mxu0 %v5263_v11  ;;  %4587 = vmatprep.subr.bf16.mxu1 %v5270_v13  ;;  %v5319_v11 = vcombine.low %v2932_v9, %v2936_v10  ;;  %v5326_v13 = vcombine.high %v2939_v17, %v2943_v18  ;;  %v2991_v6 = vld [vmem:[#allocation11 + $0x4f0] sm:$0xff]  ;;  %v2988_v9 = vld [vmem:[#allocation11 + $0x4d8] sm:$0xff] }
 0x4ab   :  { %4669 = vmatprep.subr.bf16.mxu0 %v5272_v23  ;;  %v5328_v23 = vcombine.high %v2940_v19, %v2944_v20  ;;  %v2992_v10 = vld [vmem:[#allocation11 + $0x4f8] sm:$0xff] }
 0x4ad   :  { %4588 = vmatpush1.bf16.msra.mxu1 %v5269_v60  ;;  %v5325_v60 = vcombine.low %v2939_v17, %v2943_v18  ;;  %v2999_v17 = vld [vmem:[#allocation11 + $0x530] sm:$0xff]  ;;  %v2996_v18 = vld [vmem:[#allocation11 + $0x518] sm:$0xff] }
 0x4ae   :  { %4670 = vmatpush1.bf16.msra.mxu0 %v5271_v27  ;;  %4589 = vmatprep.subr.bf16.mxu1 %v5278_v28  ;;  %v5327_v27 = vcombine.low %v2940_v19, %v2944_v20  ;;  %v5334_v28 = vcombine.high %v2947_v55, %v2951_v24  ;;  %v3000_v19 = vld [vmem:[#allocation11 + $0x538] sm:$0xff]  ;;  %v5375_v20 = vcombine.low %v2988_v9, %v2992_v10 }
 0x4af   :  { %4671 = vmatprep.subr.bf16.mxu0 %v5280_v29  ;;  %v5336_v29 = vcombine.high %v2948_v25, %v2952_v26 }
 0x4b1   :  { %4590 = vmatpush1.bf16.msra.mxu1 %v5277_v33  ;;  %v5333_v33 = vcombine.low %v2947_v55, %v2951_v24  ;;  %v3004_v55 = vld [vmem:[#allocation11 + $0x558] sm:$0xff] }
 0x4b2   :  { %4672 = vmatpush1.bf16.msra.mxu0 %v5279_v35  ;;  %4591 = vmatprep.subr.bf16.mxu1 %v5286_v37  ;;  %v5335_v35 = vcombine.low %v2948_v25, %v2952_v26  ;;  %v5342_v37 = vcombine.high %v2955_v30, %v2959_v31  ;;  %v3008_v24 = vld [vmem:[#allocation11 + $0x578] sm:$0xff]  ;;  %v5383_v26 = vcombine.low %v2996_v18, %v3000_v19 }
 0x4b3   :  { %4673 = vmatprep.subr.bf16.mxu0 %v5288_v38  ;;  %v5344_v38 = vcombine.high %v2956_v3, %v2960_v32 }
 0x4b5   :  { %4592 = vmatpush1.bf16.msra.mxu1 %v5285_v43  ;;  %v5341_v43 = vcombine.low %v2955_v30, %v2959_v31  ;;  %v3012_v30 = vld [vmem:[#allocation11 + $0x598] sm:$0xff] }
 0x4b6   :  { %4674 = vmatpush1.bf16.msra.mxu0 %v5287_v44  ;;  %4593 = vmatprep.subr.bf16.mxu1 %v5294_v45  ;;  %v5343_v44 = vcombine.low %v2956_v3, %v2960_v32  ;;  %v5350_v45 = vcombine.high %v2963_v39, %v2967_v40  ;;  %v3016_v31 = vld [vmem:[#allocation11 + $0x5b8] sm:$0xff]  ;;  %v5391_v32 = vcombine.low %v3004_v55, %v3008_v24 }
 0x4b7   :  { %4675 = vmatprep.subr.bf16.mxu0 %v5296_v46  ;;  %v5352_v46 = vcombine.high %v2964_v41, %v2968_v42  ;;  %v3020_v39 = vld [vmem:[#allocation11 + $0x5d8] sm:$0xff] }
 0x4b8   :  { %v3024_v40 = vld [vmem:[#allocation11 + $0x5f8] sm:$0xff] }
 0x4b9   :  { %4594 = vmatpush1.bf16.msra.mxu1 %v5293_v56  ;;  %v2976_v56 = vld [vmem:[#allocation11 + $0x478] sm:$0xff] }
 0x4ba   :  { %4676 = vmatpush1.bf16.msra.mxu0 %v5295_v57  ;;  %4595 = vmatprep.subr.bf16.mxu1 %v5302_v58  ;;  %v5351_v57 = vcombine.low %v2964_v41, %v2968_v42  ;;  %v5358_v58 = vcombine.high %v2971_v47, %v2975_v48  ;;  %v5360_v62 = vcombine.high %v2972_v52, %v2976_v56 }
 0x4bb   :  { %4677 = vmatprep.subr.bf16.mxu0 %v5304_v59  ;;  %v2979_v59 = vld [vmem:[#allocation11 + $0x490] sm:$0xff]  ;;  %v5399_v42 = vcombine.low %v3012_v30, %v3016_v31 }
 0x4bd   :  { %4596 = vmatpush1.bf16.msra.mxu1 %v5301_v0  ;;  %v5357_v0 = vcombine.low %v2971_v47, %v2975_v48  ;;  %v3028_v47 = vld [vmem:[#allocation11 + $0x618] sm:$0xff] }
 0x4be   :  { %4678 = vmatpush1.bf16.msra.mxu0 %v5303_v1  ;;  %4597 = vmatprep.subr.bf16.mxu1 %v5310_v2  ;;  %v5359_v1 = vcombine.low %v2972_v52, %v2976_v56  ;;  %v5366_v2 = vcombine.high %v2979_v59, %v2983_v61  ;;  %v3032_v48 = vld [vmem:[#allocation11 + $0x638] sm:$0xff]  ;;  %v5407_v52 = vcombine.low %v3020_v39, %v3024_v40 }
 0x4bf   :  { %4679 = vmatprep.subr.bf16.mxu0 %v5312_v4  ;;  %v5368_v4 = vcombine.high %v2980_v7, %v2984_v63 }
 0x4c1   :  { %4598 = vmatpush1.bf16.msra.mxu1 %v5309_v12  ;;  %v5365_v12 = vcombine.low %v2979_v59, %v2983_v61  ;;  %v3039_v59 = vld [vmem:[#allocation11 + $0x670] sm:$0xff]  ;;  %v3036_v61 = vld [vmem:[#allocation11 + $0x658] sm:$0xff] }
 0x4c2   :  { %4680 = vmatpush1.bf16.msra.mxu0 %v5311_v14  ;;  %4599 = vmatprep.subr.bf16.mxu1 %v5318_v15  ;;  %v5374_v14 = vcombine.high %v2987_v5, %v2991_v6  ;;  %v5376_v15 = vcombine.high %v2988_v9, %v2992_v10 }
 0x4c3   :  { %4681 = vmatprep.subr.bf16.mxu0 %v5320_v16  ;;  %v2995_v16 = vld [vmem:[#allocation11 + $0x510] sm:$0xff] }
 0x4c4   :  { %v5381_v25 = vcombine.low %v2995_v16, %v2999_v17 }
 0x4c5   :  { %4600 = vmatpush1.bf16.msra.mxu1 %v5317_v21  ;;  %v5382_v21 = vcombine.high %v2995_v16, %v2999_v17  ;;  %v3052_v16 = vld [vmem:[#allocation11 + $0x6d8] sm:$0xff] }
 0x4c6   :  { %4682 = vmatpush1.bf16.msra.mxu0 %v5319_v11  ;;  %4601 = vmatprep.subr.bf16.mxu1 %v5326_v13  ;;  %v5384_v11 = vcombine.high %v2996_v18, %v3000_v19  ;;  %v3003_v13 = vld [vmem:[#allocation11 + $0x550] sm:$0xff]  ;;  %v3056_v17 = vld [vmem:[#allocation11 + $0x6f8] sm:$0xff] }
 0x4c7   :  { %4683 = vmatprep.subr.bf16.mxu0 %v5328_v23  ;;  %v3007_v23 = vld [vmem:[#allocation11 + $0x570] sm:$0xff] }
 0x4c8   :  { %v5389_v3 = vcombine.low %v3003_v13, %v3007_v23 }
 0x4c9   :  { %4602 = vmatpush1.bf16.msra.mxu1 %v5325_v60  ;;  %v5390_v60 = vcombine.high %v3003_v13, %v3007_v23  ;;  %v3060_v13 = vld [vmem:[#allocation11 + $0x718] sm:$0xff] }
 0x4ca   :  { %4684 = vmatpush1.bf16.msra.mxu0 %v5327_v27  ;;  %4603 = vmatprep.subr.bf16.mxu1 %v5334_v28  ;;  %v5392_v27 = vcombine.high %v3004_v55, %v3008_v24  ;;  %v3011_v28 = vld [vmem:[#allocation11 + $0x590] sm:$0xff]  ;;  %v3064_v23 = vld [vmem:[#allocation11 + $0x738] sm:$0xff]  ;;  %v5439_v24 = vcombine.low %v3052_v16, %v3056_v17 }
 0x4cb   :  { %4685 = vmatprep.subr.bf16.mxu0 %v5336_v29  ;;  %v3015_v29 = vld [vmem:[#allocation11 + $0x5b0] sm:$0xff] }
 0x4cc   :  { %v5397_v41 = vcombine.low %v3011_v28, %v3015_v29 }
 0x4cd   :  { %4604 = vmatpush1.bf16.msra.mxu1 %v5333_v33  ;;  %v5398_v33 = vcombine.high %v3011_v28, %v3015_v29  ;;  %v3068_v28 = vld [vmem:[#allocation11 + $0x758] sm:$0xff] }
 0x4ce   :  { %4686 = vmatpush1.bf16.msra.mxu0 %v5335_v35  ;;  %4605 = vmatprep.subr.bf16.mxu1 %v5342_v37  ;;  %v5400_v35 = vcombine.high %v3012_v30, %v3016_v31  ;;  %v3019_v37 = vld [vmem:[#allocation11 + $0x5d0] sm:$0xff]  ;;  %v3072_v29 = vld [vmem:[#allocation11 + $0x778] sm:$0xff]  ;;  %v5447_v31 = vcombine.low %v3060_v13, %v3064_v23 }
 0x4cf   :  { %4687 = vmatprep.subr.bf16.mxu0 %v5344_v38  ;;  %v3023_v38 = vld [vmem:[#allocation11 + $0x5f0] sm:$0xff] }
 0x4d1   :  { %4606 = vmatpush1.bf16.msra.mxu1 %v5341_v43  ;;  %v5406_v43 = vcombine.high %v3019_v37, %v3023_v38 }
 0x4d2   :  { %4688 = vmatpush1.bf16.msra.mxu0 %v5343_v44  ;;  %4616 = vmatprep.subr.bf16.mxu1 %v5350_v45  ;;  %v5408_v44 = vcombine.high %v3020_v39, %v3024_v40  ;;  %v3027_v45 = vld [vmem:[#allocation11 + $0x610] sm:$0xff]  ;;  %v5455_v40 = vcombine.low %v3068_v28, %v3072_v29 }
 0x4d3   :  { %4698 = vmatprep.subr.bf16.mxu0 %v5352_v46  ;;  %v3031_v46 = vld [vmem:[#allocation11 + $0x630] sm:$0xff] }
 0x4d4   :  { %4608 = vmatmul.mubr.bf16.vlgmr.msra.gmra.mrb[16].mxu1 %v6554_v8  ;;  %v5414_v56 = vcombine.high %v3027_v45, %v3031_v46 }
 0x4d5   :  { %4690 = vmatmul.mubr.bf16.vlgmr.msra.gmra.mrb[12].mxu0 %v6554_v8  ;;  %4617 = vmatpush1.bf16.msra.mxu1 %v5349_v49  ;;  %v5367_v8 = vcombine.low %v2980_v7, %v2984_v63  ;;  %v5405_v49 = vcombine.low %v3019_v37, %v3023_v38  ;;  %v5413_v7 = vcombine.low %v3027_v45, %v3031_v46  ;;  %v3076_v37 = vld [vmem:[#allocation11 + $0x798] sm:$0xff] }
 0x4d6   :  { %4648 = vmatprep.mubr.bf16.mxu1 %v6564_v22  ;;  %4699 = vmatpush1.bf16.msra.mxu0 %v5351_v57  ;;  %v5416_v57 = vcombine.high %v3028_v47, %v3032_v48  ;;  %v5415_v63 = vcombine.low %v3028_v47, %v3032_v48  ;;  %v3080_v38 = vld [vmem:[#allocation11 + $0x7b8] sm:$0xff] }
 0x4d7   :  { %4730 = vmatprep.mubr.bf16.mxu0 %v6564_v22  ;;  %4618 = vmatprep.subr.bf16.mxu1 %v5358_v58  ;;  %v5373_v22 = vcombine.low %v2987_v5, %v2991_v6  ;;  %v3035_v58 = vld [vmem:[#allocation11 + $0x650] sm:$0xff]  ;;  %v3044_v5 = vld [vmem:[#allocation11 + $0x698] sm:$0xff]  ;;  %v5463_v48 = vcombine.low %v3076_v37, %v3080_v38 }
 0x4d8   :  { %4700 = vmatprep.subr.bf16.mxu0 %v5360_v62  ;;  %v3040_v62 = vld [vmem:[#allocation11 + $0x678] sm:$0xff]  ;;  %v5421_v9 = vcombine.low %v3035_v58, %v3039_v59 }
 0x4d9   :  { %4619 = vmatpush1.bf16.msra.mxu1 %v5357_v0  ;;  %v5422_v0 = vcombine.high %v3035_v58, %v3039_v59  ;;  %v3048_v6 = vld [vmem:[#allocation11 + $0x6b8] sm:$0xff]  ;;  %v5423_v10 = vcombine.low %v3036_v61, %v3040_v62 }
 0x4da   :  { %4701 = vmatpush1.bf16.msra.mxu0 %v5359_v1  ;;  %4620 = vmatprep.subr.bf16.mxu1 %v5366_v2  ;;  %v5424_v1 = vcombine.high %v3036_v61, %v3040_v62  ;;  %v3043_v2 = vld [vmem:[#allocation11 + $0x690] sm:$0xff]  ;;  %v5431_v19 = vcombine.low %v3044_v5, %v3048_v6  ;;  %v3084_v45 = vld [vmem:[#allocation11 + $0x7d8] sm:$0xff] }
 0x4db   :  { %4702 = vmatprep.subr.bf16.mxu0 %v5368_v4  ;;  %v3047_v4 = vld [vmem:[#allocation11 + $0x6b0] sm:$0xff]  ;;  %v3088_v46 = vld [vmem:[#allocation11 + $0x7f8] sm:$0xff] }
 0x4dc   :  { %v5429_v18 = vcombine.low %v3043_v2, %v3047_v4  ;;  %v6586_v58 = vld [vmem:[%s6637_s9] sm:$0xff]  ;;  %s6333_s9 = smov [#allocation14]  }
 0x4dd   :  { %4621 = vmatpush1.bf16.msra.mxu1 %v5365_v12  ;;  %v5430_v12 = vcombine.high %v3043_v2, %v3047_v4  ;;  %v3094_v59 = vrot.slane %v6586_v58, %v6509_v51  ;;  %v3102_v61 = vrot.slane %v6586_v58, %v6531_v36  ;;  %v3098_v62 = vrot.slane %v6586_v58, %v6517_v53  ;;  %s4841_s4 = sshll.u32 %s6333_s9, 4  ;;  %s4842_s4 = int_to_ptr.vmem [resolvable:$true] %s4841_s4 }
 0x4de   :  { %4703 = vmatpush1.bf16.msra.mxu0 %v5367_v8  ;;  %4622 = vmatprep.subr.bf16.mxu1 %v5374_v14  ;;  %v5432_v8 = vcombine.high %v3044_v5, %v3048_v6  ;;  %v3051_v14 = vld [vmem:[#allocation11 + $0x6d0] sm:$0xff]  ;;  %s6264_s20 = scalar_lea.vmem %s4842_s4, 256  ;;  %p6269_p7 = scmp.lt.s32.totalorder %s4842_s4, %s4842_s4 }
 0x4df   :  { %4704 = vmatprep.subr.bf16.mxu0 %v5376_v15  ;;  %v3055_v15 = vld [vmem:[#allocation11 + $0x6f0] sm:$0xff]  ;;  %p6265_p6 = scmp.ne.s32.totalorder %s4842_s4, %s6264_s20  ;;  %p6270_p8 = scmp.lt.s32.totalorder %s6264_s20, %s6264_s20 }
 0x4e0   :  { %v5437_v55 = vcombine.low %v3051_v14, %v3055_v15 }
 0x4e1   :  { %4623 = vmatpush1.bf16.msra.mxu1 %v5373_v22  ;;  %v5438_v22 = vcombine.high %v3051_v14, %v3055_v15  ;;  %p6271_p9 = por %p6270_p8, %p6269_p7 }
 0x4e2   :  { %4705 = vmatpush1.bf16.msra.mxu0 %v5375_v20  ;;  %4624 = vmatprep.subr.bf16.mxu1 %v5382_v21  ;;  %v5440_v20 = vcombine.high %v3052_v16, %v3056_v17  ;;  %v3059_v21 = vld [vmem:[#allocation11 + $0x710] sm:$0xff] }
 0x4e3   :  { %4706 = vmatprep.subr.bf16.mxu0 %v5384_v11  ;;  %v3063_v11 = vld [vmem:[#allocation11 + $0x730] sm:$0xff]  ;;  %p6272_p10 = pnand %p6271_p9, %p6265_p6 }
 0x4e4   :  { %v5445_v30 = vcombine.low %v3059_v21, %v3063_v11 }
 0x4e5   :  { %4625 = vmatpush1.bf16.msra.mxu1 %v5381_v25  ;;  %v5446_v25 = vcombine.high %v3059_v21, %v3063_v11 }
 0x4e6   :  { %4707 = vmatpush1.bf16.msra.mxu0 %v5383_v26  ;;  %4626 = vmatprep.subr.bf16.mxu1 %v5390_v60  ;;  %v5448_v26 = vcombine.high %v3060_v13, %v3064_v23  ;;  %v3067_v60 = vld [vmem:[#allocation11 + $0x750] sm:$0xff] }
 0x4e7   :  { %4708 = vmatprep.subr.bf16.mxu0 %v5392_v27  ;;  %v3071_v27 = vld [vmem:[#allocation11 + $0x770] sm:$0xff] }
 0x4e8   :  { %v5453_v39 = vcombine.low %v3067_v60, %v3071_v27 }
 0x4e9   :  { %4627 = vmatpush1.bf16.msra.mxu1 %v5389_v3  ;;  %v5454_v3 = vcombine.high %v3067_v60, %v3071_v27 }
 0x4ea   :  { %4709 = vmatpush1.bf16.msra.mxu0 %v5391_v32  ;;  %4628 = vmatprep.subr.bf16.mxu1 %v5398_v33  ;;  %v5456_v32 = vcombine.high %v3068_v28, %v3072_v29  ;;  %v3075_v33 = vld [vmem:[#allocation11 + $0x790] sm:$0xff] }
 0x4eb   :  { %4710 = vmatprep.subr.bf16.mxu0 %v5400_v35  ;;  %v3079_v35 = vld [vmem:[#allocation11 + $0x7b0] sm:$0xff] }
 0x4ec   :  { %v5461_v47 = vcombine.low %v3075_v33, %v3079_v35 }
 0x4ed   :  { %4629 = vmatpush1.bf16.msra.mxu1 %v5397_v41  ;;  %v5462_v41 = vcombine.high %v3075_v33, %v3079_v35 }
 0x4ee   :  { %4711 = vmatpush1.bf16.msra.mxu0 %v5399_v42  ;;  %4630 = vmatprep.subr.bf16.mxu1 %v5406_v43  ;;  %v5464_v42 = vcombine.high %v3076_v37, %v3080_v38  ;;  %v3083_v43 = vld [vmem:[#allocation11 + $0x7d0] sm:$0xff] }
 0x4ef   :  { %4712 = vmatprep.subr.bf16.mxu0 %v5408_v44  ;;  %v3087_v44 = vld [vmem:[#allocation11 + $0x7f0] sm:$0xff] }
 0x4f1   :  { %4631 = vmatpush1.bf16.msra.mxu1 %v5405_v49  ;;  %v5470_v49 = vcombine.high %v3083_v43, %v3087_v44 }
 0x4f2   :  { %4713 = vmatpush1.bf16.msra.mxu0 %v5407_v52  ;;  %4632 = vmatprep.subr.bf16.mxu1 %v5414_v56  ;;  %v5472_v52 = vcombine.high %v3084_v45, %v3088_v46  ;;  %v5469_v56 = vcombine.low %v3083_v43, %v3087_v44 }
 0x4f3   :  { %4714 = vmatprep.subr.bf16.mxu0 %v5416_v57  ;;  %v5471_v57 = vcombine.low %v3084_v45, %v3088_v46 }
 0x4f5   :  { %4633 = vmatpush1.bf16.msra.mxu1 %v5413_v7  ;;  %v3106_v7 = vrot.slane %v6586_v58, %v6520_v54 }
 0x4f6   :  { %4715 = vmatpush1.bf16.msra.mxu0 %v5415_v63  ;;  %4634 = vmatprep.subr.bf16.mxu1 %v5422_v0 }
 0x4f7   :  { %4716 = vmatprep.subr.bf16.mxu0 %v5424_v1 }
 0x4f9   :  { %4635 = vmatpush1.bf16.msra.mxu1 %v5421_v9 }
 0x4fa   :  { %4717 = vmatpush1.bf16.msra.mxu0 %v5423_v10  ;;  %4636 = vmatprep.subr.bf16.mxu1 %v5430_v12 }
 0x4fb   :  { %4718 = vmatprep.subr.bf16.mxu0 %v5432_v8 }
 0x4fd   :  { %4637 = vmatpush1.bf16.msra.mxu1 %v5429_v18 }
 0x4fe   :  { %4719 = vmatpush1.bf16.msra.mxu0 %v5431_v19  ;;  %4638 = vmatprep.subr.bf16.mxu1 %v5438_v22 }
 0x4ff   :  { %4720 = vmatprep.subr.bf16.mxu0 %v5440_v20 }
 0x501   :  { %4639 = vmatpush1.bf16.msra.mxu1 %v5437_v55 }
 0x502   :  { %4721 = vmatpush1.bf16.msra.mxu0 %v5439_v24  ;;  %4640 = vmatprep.subr.bf16.mxu1 %v5446_v25 }
 0x503   :  { %4722 = vmatprep.subr.bf16.mxu0 %v5448_v26 }
 0x505   :  { %4641 = vmatpush1.bf16.msra.mxu1 %v5445_v30 }
 0x506   :  { %4723 = vmatpush1.bf16.msra.mxu0 %v5447_v31  ;;  %4642 = vmatprep.subr.bf16.mxu1 %v5454_v3 }
 0x507   :  { %4724 = vmatprep.subr.bf16.mxu0 %v5456_v32 }
 0x509   :  { %4643 = vmatpush1.bf16.msra.mxu1 %v5453_v39 }
 0x50a   :  { %4725 = vmatpush1.bf16.msra.mxu0 %v5455_v40  ;;  %4644 = vmatprep.subr.bf16.mxu1 %v5462_v41 }
 0x50b   :  { %4726 = vmatprep.subr.bf16.mxu0 %v5464_v42 }
 0x50d   :  { %4645 = vmatpush1.bf16.msra.mxu1 %v5461_v47 }
 0x50e   :  { %4727 = vmatpush1.bf16.msra.mxu0 %v5463_v48  ;;  %4646 = vmatprep.subr.bf16.mxu1 %v5470_v49 }
 0x50f   :  { %4728 = vmatprep.subr.bf16.mxu0 %v5472_v52 }
 0x511   :  { %4647 = vmatpush1.bf16.msra.mxu1 %v5469_v56 }
 0x512   :  { %4729 = vmatpush1.bf16.msra.mxu0 %v5471_v57 }
 0x514   :  { %4649 = vmatmul.mubr.bf16.vlgmr.msra.gmra.mrb[16].mxu1 %v6571_v34 }
 0x515   :  { %4731 = vmatmul.mubr.bf16.vlgmr.msra.gmra.mrb[12].mxu0 %v6571_v34 }
 0x567   :  { %v4486_v63 = vpop.f32.mrb[12].mxu1  ;;  %v4568_v0 = vpop.f32.mrb[8].mxu0 }
 0x568   :  { %v5495_v34 = vadd.f32 %v4486_v63, %v3094_v59  ;;  %v5497_v1 = vadd.f32 %v4568_v0, %v3102_v61  ;;  %v4488_v2 = vpop.f32.mrb[13].mxu1  ;;  %v4570_v4 = vpop.f32.mrb[9].mxu0 }
 0x569   :  { %v5496_v5 = vadd.f32 %v4488_v2, %v3098_v62  ;;  %v5498_v6 = vadd.f32 %v4570_v4, %v3106_v7  ;;  %v4490_v9 = vpop.f32.mrb[14].mxu1  ;;  %v4572_v10 = vpop.f32.mrb[10].mxu0 }
 0x56a   :  { %v5473_v51 = vmul.f32 -1.442695, %v5495_v34  ;;  %v5475_v12 = vmul.f32 -1.442695, %v5497_v1  ;;  %v4491_v8 = vpop.f32.mrb[15].mxu1  ;;  %v4573_v36 = vpop.f32.mrb[11].mxu0 }
 0x56b   :  { %v5474_v14 = vmul.f32 -1.442695, %v5496_v5  ;;  %v5476_v15 = vmul.f32 -1.442695, %v5498_v6 }
 0x56c   :  { %6100 = vpow2.f32 %v5473_v51 }
 0x56d   :  { %6102 = vpow2.f32 %v5475_v12 }
 0x56e   :  { %6104 = vpow2.f32 %v5474_v14 }
 0x56f   :  { %6106 = vpow2.f32 %v5476_v15 }
 0x576   :  { %v6101_v53 = vpop.eup %6100 }
 0x577   :  { %v6103_v54 = vpop.eup %6102  ;;  %v4763_v16 = vadd.f32 1.0, %v6101_v53 }
 0x578   :  { %v6105_v17 = vpop.eup %6104  ;;  %v4765_v18 = vadd.f32 1.0, %v6103_v54 }
 0x579   :  { %v6107_v19 = vpop.eup %6106  ;;  %6108 = vrcp.f32 %v4763_v16  ;;  %v4764_v22 = vadd.f32 1.0, %v6105_v17 }
 0x57a   :  { %6110 = vrcp.f32 %v4765_v18  ;;  %v4766_v20 = vadd.f32 1.0, %v6107_v19 }
 0x57b   :  { %6112 = vrcp.f32 %v4764_v22 }
 0x57c   :  { %6114 = vrcp.f32 %v4766_v20 }
 0x583   :  { %v6109_v21 = vpop.eup %6108 }
 0x584   :  { %v6111_v11 = vpop.eup %6110 }
 0x585   :  { %v6113_v13 = vpop.eup %6112 }
 0x586   :  { %v6115_v23 = vpop.eup %6114  ;;  %v5485_v55 = vpack.c.bf16 %v6113_v13, %v6109_v21 }
 0x587   :  { %v5486_v24 = vpack.c.bf16 %v6115_v23, %v6111_v11 }
 0x588   :  { %4819 = vst [vmem:[#allocation13] sm:$0xff] %v5485_v55 }
 0x589   :  { %4820 = vst [vmem:[#allocation13 + $0x8] sm:$0xff] %v5486_v24 }
 0x58a   :  { %6275 = shalt.err (!%p6272_p10)
}
 0x58b   :  { %s6276_s19 = scalar_lea.hbm %s6639_s11, 256 }
 0x58c   :  { %p6277_p11 = scmp.ne.s32.totalorder %s6639_s11, %s6276_s19  ;;  %p6280_p12 = scmp.lt.u32.totalorder %s6276_s19, %s6639_s11 }
 0x58e   :  { %p6282_p13 = pnand %p6280_p12, %p6277_p11 }
 0x590   :  { %6285 = shalt.err (!%p6282_p13)
}
 0x591   :  { %4844 = dma.vmem_to_hbm [thread:$0]  %s4842_s4, 256, %s6639_s11, [#allocation15]   ;;  %v3109_v25 = vsub.s32 4, %v6506_v50  ;;  %v3117_v26 = vsub.s32 6, %v6506_v50  ;;  %v3113_v60 = vsub.s32 5, %v6506_v50  ;;  %v3121_v27 = vsub.s32 7, %v6506_v50 }
 0x592   :  { %s6334_s11 = smov [#allocation13]  }
 0x593   :  { %v3110_v28 = vrot.slane %v6586_v58, %v3109_v25  ;;  %v3118_v29 = vrot.slane %v6586_v58, %v3117_v26  ;;  %v3114_v30 = vrot.slane %v6586_v58, %v3113_v60  ;;  %v3122_v31 = vrot.slane %v6586_v58, %v3121_v27  ;;  %s4831_s23 = sshll.u32 %s6334_s11, 4  ;;  %s4832_s23 = int_to_ptr.vmem [resolvable:$true] %s4831_s23 }
 0x594   :  { %s6286_s24 = scalar_lea.vmem %s4832_s23, 512  ;;  %p6291_p1 = scmp.lt.s32.totalorder %s4832_s23, %s4832_s23 }
 0x595   :  { %p6287_p0 = scmp.ne.s32.totalorder %s4832_s23, %s6286_s24  ;;  %p6292_p2 = scmp.lt.s32.totalorder %s6286_s24, %s6286_s24 }
 0x597   :  { %p6293_p3 = por %p6292_p2, %p6291_p1 }
 0x599   :  { %p6294_p4 = pnand %p6293_p3, %p6287_p0 }
 0x5e7   :  { %v4650_v3 = vpop.f32.mrb[16].mxu1 }
 0x5e8   :  { %v5499_v32 = vadd.f32 %v4650_v3, %v3110_v28  ;;  %v4732_v33 = vpop.f32.mrb[12].mxu0  ;;  %v4652_v35 = vpop.f32.mrb[17].mxu1 }
 0x5e9   :  { %v5501_v37 = vadd.f32 %v4732_v33, %v3118_v29  ;;  %v5500_v38 = vadd.f32 %v4652_v35, %v3114_v30  ;;  %v4734_v39 = vpop.f32.mrb[13].mxu0  ;;  %v4654_v40 = vpop.f32.mrb[18].mxu1 }
 0x5ea   :  { %v5477_v41 = vmul.f32 -1.442695, %v5499_v32  ;;  %v5502_v42 = vadd.f32 %v4734_v39, %v3122_v31  ;;  %v4736_v43 = vpop.f32.mrb[14].mxu0  ;;  %v4655_v50 = vpop.f32.mrb[19].mxu1 }
 0x5eb   :  { %v5479_v44 = vmul.f32 -1.442695, %v5501_v37  ;;  %v5478_v45 = vmul.f32 -1.442695, %v5500_v38  ;;  %v4737_v46 = vpop.f32.mrb[15].mxu0 }
 0x5ec   :  { %6116 = vpow2.f32 %v5477_v41  ;;  %v5480_v47 = vmul.f32 -1.442695, %v5502_v42 }
 0x5ed   :  { %6118 = vpow2.f32 %v5479_v44 }
 0x5ee   :  { %6120 = vpow2.f32 %v5478_v45 }
 0x5ef   :  { %6122 = vpow2.f32 %v5480_v47 }
 0x5f6   :  { %v6117_v48 = vpop.eup %6116 }
 0x5f7   :  { %v6119_v49 = vpop.eup %6118  ;;  %v4767_v52 = vadd.f32 1.0, %v6117_v48 }
 0x5f8   :  { %v6121_v56 = vpop.eup %6120  ;;  %v4769_v57 = vadd.f32 1.0, %v6119_v49 }
 0x5f9   :  { %v6123_v58 = vpop.eup %6122  ;;  %6124 = vrcp.f32 %v4767_v52  ;;  %v4768_v59 = vadd.f32 1.0, %v6121_v56 }
 0x5fa   :  { %6126 = vrcp.f32 %v4769_v57  ;;  %v4770_v61 = vadd.f32 1.0, %v6123_v58 }
 0x5fb   :  { %6128 = vrcp.f32 %v4768_v59 }
 0x5fc   :  { %6130 = vrcp.f32 %v4770_v61 }
 0x603   :  { %v6125_v62 = vpop.eup %6124 }
 0x604   :  { %v6127_v7 = vpop.eup %6126 }
 0x605   :  { %v6129_v63 = vpop.eup %6128 }
 0x606   :  { %v6131_v0 = vpop.eup %6130  ;;  %v5487_v34 = vpack.c.bf16 %v6129_v63, %v6125_v62 }
 0x607   :  { %v5488_v1 = vpack.c.bf16 %v6131_v0, %v6127_v7 }
 0x608   :  { %4821 = vst [vmem:[#allocation13 + $0x10] sm:$0xff] %v5487_v34 }
 0x609   :  { %4822 = vst [vmem:[#allocation13 + $0x18] sm:$0xff] %v5488_v1 }
 0x60a   :  { %6297 = shalt.err (!%p6294_p4)
}
 0x60b   :  { %s6298_s29 = scalar_lea.hbm %s6638_s10, 512 }
 0x60c   :  { %p6299_p5 = scmp.ne.s32.totalorder %s6638_s10, %s6298_s29  ;;  %p6302_p6 = scmp.lt.u32.totalorder %s6298_s29, %s6638_s10 }
 0x60e   :  { %p6304_p7 = pnand %p6302_p6, %p6299_p5 }
 0x610   :  { %6307 = shalt.err (!%p6304_p7)
}
 0x611   :  { %4834 = dma.vmem_to_hbm [thread:$0]  %s4832_s23, 512, %s6638_s10, [#allocation4]  }
 0x612   :  { %6316 = dma.done.wait [#allocation4], 512  }
 0x613   :  { %6317 = vsyncadd [#allocation4], 4294966784 }
 0x614   :  { %6318 = dma.done.wait [#allocation15], 256  }
 0x615   :  { %6319 = vsyncadd [#allocation15], 4294967040 }
 0x616   :  { %4851 = vsyncpa [#allocation3], 1 }
 0x617   :  { %4852 = vsyncpa [#allocation6], 1 }
 0x618   :  { %4853 = vsyncpa [#allocation9], 1 }
 0x619   :  { %4854 = vsyncpa [#allocation12], 1 }
 0x61a   :  { %4855 = vsyncpa [#allocation4], 1 }
 0x61b   :  { %4856 = vsyncpa [#allocation15], 1 }

</bundles_post_ra>
